<compile_context>
chip_gen: v5e
topology: v5e:2x2
jax: 0.10.0
libtpu: 0.0.40
codegen_flags: <defaults>
</compile_context>

<pallas_src>
import functools
import math

import jax
import jax.numpy as jnp
from jax.experimental import pallas as pl
from jax.experimental.pallas import tpu as pltpu


def _transformer_block_kernel(
    x_ref,
    ln1w_ref, ln1b_ref,
    wqkv_ref, bqkv_ref,
    wproj_ref, bproj_ref,
    ln2w_ref, ln2b_ref,
    w1_ref, b1_ref,
    w2_ref, b2_ref,
    o_ref,
    *, num_heads, head_dim, n_actual, eps,
):
    C = num_heads * head_dim
    f32 = jnp.float32
    bf16 = jnp.bfloat16
    N = x_ref.shape[1]                                    # padded token count

    x = x_ref[0].astype(f32)                              # (N, C)

    # ---- LayerNorm 1 (f32) ----
    mu = jnp.mean(x, axis=-1, keepdims=True)
    var = jnp.mean(jnp.square(x - mu), axis=-1, keepdims=True)
    xn = (x - mu) * jax.lax.rsqrt(var + eps)
    xn = xn * ln1w_ref[0] + ln1b_ref[0]

    # ---- QKV projection (softmax scale pre-folded into the q columns) ----
    qkv = jnp.dot(xn.astype(bf16), wqkv_ref[...],
                  preferred_element_type=f32) + bqkv_ref[0]       # (N, 3C) f32

    # Key mask for padded tokens (static: only emitted when padding exists).
    if n_actual < N:
        key_idx = jax.lax.broadcasted_iota(jnp.int32, (1, N), 1)
        neg_mask = jnp.where(key_idx < n_actual,
                             jnp.float32(0.0), jnp.float32(-1e30))
    else:
        neg_mask = None

    # ---- Per-head attention; head outputs gathered into one (N, C) slab so
    #      the output projection is a single K=C matmul. ----
    head_outs = []
    for h in range(num_heads):
        lo = h * head_dim
        qh = qkv[:, lo:lo + head_dim].astype(bf16)                 # scale already folded
        kh = qkv[:, C + lo:C + lo + head_dim].astype(bf16)
        vh = qkv[:, 2 * C + lo:2 * C + lo + head_dim].astype(bf16)

        # q k^T without materializing k^T: contract the last dims of both.
        s = jax.lax.dot_general(qh, kh, (((1,), (1,)), ((), ())),
                                preferred_element_type=f32)        # (N, N) f32
        if neg_mask is not None:
            s = s + neg_mask
        s = s - jnp.max(s, axis=-1, keepdims=True)
        p = jnp.exp(s)
        inv_l = pl.reciprocal(jnp.sum(p, axis=-1, keepdims=True), approx=True)

        # Unnormalized p @ v, normalized on the (N, hd) result (cheaper than (N, N)).
        head_outs.append(
            jnp.dot(p.astype(bf16), vh, preferred_element_type=f32) * inv_l)

    heads_cat = jnp.concatenate(head_outs, axis=-1)                # (N, C) f32
    attn = jnp.dot(heads_cat.astype(bf16), wproj_ref[...],
                   preferred_element_type=f32) + bproj_ref[0]
    x = x + attn

    # ---- LayerNorm 2 (f32) ----
    mu2 = jnp.mean(x, axis=-1, keepdims=True)
    var2 = jnp.mean(jnp.square(x - mu2), axis=-1, keepdims=True)
    xn2 = (x - mu2) * jax.lax.rsqrt(var2 + eps)
    xn2 = xn2 * ln2w_ref[0] + ln2b_ref[0]

    # ---- MLP: fc1 -> GELU (exact erf, matches nn.GELU()) -> fc2 + residual ----
    h1 = jnp.dot(xn2.astype(bf16), w1_ref[...], preferred_element_type=f32) + b1_ref[0]
    h1 = 0.5 * h1 * (1.0 + jax.lax.erf(h1 * jnp.float32(1.0 / math.sqrt(2.0))))
    h2 = jnp.dot(h1.astype(bf16), w2_ref[...], preferred_element_type=f32) + b2_ref[0]
    x = x + h2

    o_ref[0] = x.astype(o_ref.dtype)


def _nbytes(a):
    return a.size * jnp.dtype(a.dtype).itemsize


def prepare_params(params, *, num_heads):
    """One-time parameter prep (do NOT call per forward pass):
    fold the softmax scale into the q columns of wqkv/bqkv (exact) and cast
    matmul weights to bf16 (MXU-native; halves resident VMEM)."""
    bf16 = jnp.bfloat16
    C = params["wqkv"].shape[0]
    head_dim = C // num_heads
    scale = jnp.float32(head_dim ** (-0.5))

    wqkv = params["wqkv"].astype(jnp.float32).at[:, :C].multiply(scale)
    bqkv = params["bqkv"].astype(jnp.float32).at[:, :C].multiply(scale)

    out = dict(params)
    out["wqkv"] = wqkv.astype(bf16)
    out["bqkv"] = bqkv                                  # biases stay f32
    out["wproj"] = params["wproj"].astype(bf16)
    out["w1"] = params["w1"].astype(bf16)
    out["w2"] = params["w2"].astype(bf16)
    return out


def _vmem_limit_bytes(need_bytes):
    """Generation-aware scoped-VMEM request with ~15% headroom."""
    try:
        cap = int(pltpu.get_tpu_info().vmem_capacity_bytes)
    except Exception:
        cap = 64 * 2 ** 20          # safe for any generation
    ceil = int(cap * 0.85)
    return int(min(max(need_bytes, 32 * 2 ** 20), ceil))


def transformer_block(x, params, *, num_heads):
    """x: (B, N, C) f32. `params` must come from prepare_params()."""
    if params["wqkv"].dtype != jnp.bfloat16:
        raise ValueError("pass params through prepare_params() once (bf16 weights, "
                         "scale folded) instead of converting per call")

    B, N, C = x.shape
    head_dim = C // num_heads
    hidden = params["w1"].shape[1]

    # Pad tokens to a lane-dense multiple of 128; padded keys are masked in the
    # kernel and padded rows are dropped after the call.
    N_pad = max(128, ((N + 127) // 128) * 128)
    if N_pad != N:
        x_in = jnp.pad(x, ((0, 0), (0, N_pad - N), (0, 0)))
    else:
        x_in = x

    kernel = functools.partial(
        _transformer_block_kernel,
        num_heads=num_heads, head_dim=head_dim, n_actual=N, eps=1e-5,
    )

    # Grid-invariant operands: single-buffered (DMA'd once, one VMEM copy).
    def const(shape):
        return pl.BlockSpec(shape, lambda b: (0,) * len(shape),
                            pipeline_mode=pl.Buffered(buffer_count=1))

    # VMEM budget: single-buffered weights + double-buffered x/out blocks +
    # generous f32 intermediate estimate (all heads' score/prob live at once).
    resident = sum(_nbytes(params[k]) for k in (
        "wqkv", "bqkv", "wproj", "bproj", "w1", "b1", "w2", "b2",
        "ln1_w", "ln1_b", "ln2_w", "ln2_b"))
    resident += 2 * 2 * N_pad * C * jnp.dtype(x.dtype).itemsize
    interm = 4 * (N_pad * 3 * C
                  + num_heads * (2 * N_pad * N_pad + N_pad * head_dim)
                  + 4 * N_pad * C
                  + 2 * N_pad * hidden)
    vmem_limit = _vmem_limit_bytes(resident + interm)

    out = pl.pallas_call(
        kernel,
        out_shape=jax.ShapeDtypeStruct((B, N_pad, C), x.dtype),
        grid_spec=pltpu.PrefetchScalarGridSpec(
            num_scalar_prefetch=0,
            grid=(B,),
            in_specs=[
                pl.BlockSpec((1, N_pad, C), lambda b: (b, 0, 0)),   # x (double-buffered)
                const((1, C)), const((1, C)),                        # ln1 w, b
                const((C, 3 * C)), const((1, 3 * C)),                # qkv W^T (bf16), b
                const((C, C)), const((1, C)),                        # proj W^T (bf16), b
                const((1, C)), const((1, C)),                        # ln2 w, b
                const((C, hidden)), const((1, hidden)),              # fc1 W^T (bf16), b
                const((hidden, C)), const((1, C)),                   # fc2 W^T (bf16), b
            ],
            out_specs=pl.BlockSpec((1, N_pad, C), lambda b: (b, 0, 0)),
        ),
        compiler_params=pltpu.CompilerParams(
            dimension_semantics=("parallel",),
            vmem_limit_bytes=vmem_limit,
        ),
    )(
        x_in,
        params["ln1_w"], params["ln1_b"],
        params["wqkv"], params["bqkv"],
        params["wproj"], params["bproj"],
        params["ln2_w"], params["ln2_b"],
        params["w1"], params["b1"],
        params["w2"], params["b2"],
    )
    return out[:, :N, :]


def _reference(x, params, *, num_heads):
    """Pure-JAX f32 reference mirroring the PyTorch forward (eval mode)."""
    B, N, C = x.shape
    hd = C // num_heads
    scale = hd ** (-0.5)

    def ln(v, w, b):
        mu = jnp.mean(v, axis=-1, keepdims=True)
        var = jnp.mean((v - mu) ** 2, axis=-1, keepdims=True)
        return (v - mu) / jnp.sqrt(var + 1e-5) * w[0] + b[0]

    xn = ln(x, params["ln1_w"], params["ln1_b"])
    qkv = xn @ params["wqkv"] + params["bqkv"][0]
    qkv = qkv.reshape(B, N, 3, num_heads, hd).transpose(2, 0, 3, 1, 4)
    q, k, v = qkv[0], qkv[1], qkv[2]
    attn = jax.nn.softmax(q @ k.transpose(0, 1, 3, 2) * scale, axis=-1)
    out = (attn @ v).transpose(0, 2, 1, 3).reshape(B, N, C)
    out = out @ params["wproj"] + params["bproj"][0]
    x = x + out

    xn2 = ln(x, params["ln2_w"], params["ln2_b"])
    h = xn2 @ params["w1"] + params["b1"][0]
    h = 0.5 * h * (1.0 + jax.lax.erf(h / jnp.sqrt(2.0)))
    h = h @ params["w2"] + params["b2"][0]
    return x + h


def make_params(key, embed_dim, num_heads, mlp_ratio):
    hidden = int(embed_dim * mlp_ratio)
    ks = jax.random.split(key, 8)
    s = 0.02
    return {
        "ln1_w": jnp.ones((1, embed_dim), jnp.float32),
        "ln1_b": jnp.zeros((1, embed_dim), jnp.float32),
        "wqkv": s * jax.random.normal(ks[0], (embed_dim, 3 * embed_dim), jnp.float32),
        "bqkv": s * jax.random.normal(ks[1], (1, 3 * embed_dim), jnp.float32),
        "wproj": s * jax.random.normal(ks[2], (embed_dim, embed_dim), jnp.float32),
        "bproj": s * jax.random.normal(ks[3], (1, embed_dim), jnp.float32),
        "ln2_w": jnp.ones((1, embed_dim), jnp.float32),
        "ln2_b": jnp.zeros((1, embed_dim), jnp.float32),
        "w1": s * jax.random.normal(ks[4], (embed_dim, hidden), jnp.float32),
        "b1": s * jax.random.normal(ks[5], (1, hidden), jnp.float32),
        "w2": s * jax.random.normal(ks[6], (hidden, embed_dim), jnp.float32),
        "b2": s * jax.random.normal(ks[7], (1, embed_dim), jnp.float32),
    }


if __name__ == "__main__":
    B, N, embed_dim, num_heads, mlp_ratio = 2, 8, 32, 4, 4.0

    key = jax.random.PRNGKey(0)
    kx, kp = jax.random.split(key)
    x = jax.random.normal(kx, (B, N, embed_dim), jnp.float32)
    params = make_params(kp, embed_dim, num_heads, mlp_ratio)

    prepared = prepare_params(params, num_heads=num_heads)   # one-time prep
    out = transformer_block(x, prepared, num_heads=num_heads)
    out = jax.block_until_ready(out)

    ref = _reference(x, params, num_heads=num_heads)
    # bf16 MXU operands + approx reciprocal in softmax => looser tolerance than f32.
    assert out.shape == ref.shape
    assert jnp.allclose(out, ref, atol=2e-2, rtol=2e-2), "mismatch vs reference"

    print("KERNEL_OK")
</pallas_src>

<mosaic_0001>
module attributes {stable_mosaic.version = 11 : i64} {
  func.func @_transformer_block_kernel(%arg0: i32, %arg1: memref<1x128x32xf32, #tpu.memory_space<vmem>>, %arg2: memref<1x32xf32, #tpu.memory_space<vmem>>, %arg3: memref<1x32xf32, #tpu.memory_space<vmem>>, %arg4: memref<32x96xbf16, #tpu.memory_space<vmem>>, %arg5: memref<1x96xf32, #tpu.memory_space<vmem>>, %arg6: memref<32x32xbf16, #tpu.memory_space<vmem>>, %arg7: memref<1x32xf32, #tpu.memory_space<vmem>>, %arg8: memref<1x32xf32, #tpu.memory_space<vmem>>, %arg9: memref<1x32xf32, #tpu.memory_space<vmem>>, %arg10: memref<32x128xbf16, #tpu.memory_space<vmem>>, %arg11: memref<1x128xf32, #tpu.memory_space<vmem>>, %arg12: memref<128x32xbf16, #tpu.memory_space<vmem>>, %arg13: memref<1x32xf32, #tpu.memory_space<vmem>>, %arg14: memref<1x128x32xf32, #tpu.memory_space<vmem>>) attributes {dimension_semantics = [#tpu.dimension_semantics<parallel>], iteration_bounds = array<i64: 2>, scalar_prefetch = 0 : i64, scratch_operands = 0 : i64, tpu.core_type = #tpu.core_type<tc>, window_params = [{transform_indices = @transform_0, window_bounds = array<i64: 1, 128, 32>}, {pipeline_mode = #tpu.pipeline_mode<synchronous>, transform_indices = @transform_1, window_bounds = array<i64: 1, 32>}, {pipeline_mode = #tpu.pipeline_mode<synchronous>, transform_indices = @transform_2, window_bounds = array<i64: 1, 32>}, {pipeline_mode = #tpu.pipeline_mode<synchronous>, transform_indices = @transform_3, window_bounds = array<i64: 32, 96>}, {pipeline_mode = #tpu.pipeline_mode<synchronous>, transform_indices = @transform_4, window_bounds = array<i64: 1, 96>}, {pipeline_mode = #tpu.pipeline_mode<synchronous>, transform_indices = @transform_5, window_bounds = array<i64: 32, 32>}, {pipeline_mode = #tpu.pipeline_mode<synchronous>, transform_indices = @transform_6, window_bounds = array<i64: 1, 32>}, {pipeline_mode = #tpu.pipeline_mode<synchronous>, transform_indices = @transform_7, window_bounds = array<i64: 1, 32>}, {pipeline_mode = #tpu.pipeline_mode<synchronous>, transform_indices = @transform_8, window_bounds = array<i64: 1, 32>}, {pipeline_mode = #tpu.pipeline_mode<synchronous>, transform_indices = @transform_9, window_bounds = array<i64: 32, 128>}, {pipeline_mode = #tpu.pipeline_mode<synchronous>, transform_indices = @transform_10, window_bounds = array<i64: 1, 128>}, {pipeline_mode = #tpu.pipeline_mode<synchronous>, transform_indices = @transform_11, window_bounds = array<i64: 128, 32>}, {pipeline_mode = #tpu.pipeline_mode<synchronous>, transform_indices = @transform_12, window_bounds = array<i64: 1, 32>}, {transform_indices = @transform_13, window_bounds = array<i64: 1, 128, 32>}]} {
    %c0 = arith.constant 0 : index
    %c0_0 = arith.constant 0 : index
    %c0_1 = arith.constant 0 : index
    %0 = vector.load %arg1[%c0, %c0_0, %c0_1] : memref<1x128x32xf32, #tpu.memory_space<vmem>>, vector<1x128x32xf32>
    %1 = vector.shape_cast %0 : vector<1x128x32xf32> to vector<128x32xf32>
    %cst = arith.constant dense<0.000000e+00> : vector<128xf32>
    %2 = vector.multi_reduction <add>, %1, %cst [1] : vector<128x32xf32> to vector<128xf32>
    %3 = vector.shape_cast %2 : vector<128xf32> to vector<128x1xf32>
    %cst_2 = arith.constant 3.200000e+01 : f32
    %4 = vector.broadcast %cst_2 : f32 to vector<128x1xf32>
    %5 = arith.divf %3, %4 : vector<128x1xf32>
    %6 = vector.broadcast %5 : vector<128x1xf32> to vector<128x32xf32>
    %7 = arith.subf %1, %6 : vector<128x32xf32>
    %8 = arith.mulf %7, %7 : vector<128x32xf32>
    %cst_3 = arith.constant dense<0.000000e+00> : vector<128xf32>
    %9 = vector.multi_reduction <add>, %8, %cst_3 [1] : vector<128x32xf32> to vector<128xf32>
    %10 = vector.shape_cast %9 : vector<128xf32> to vector<128x1xf32>
    %cst_4 = arith.constant 3.200000e+01 : f32
    %11 = vector.broadcast %cst_4 : f32 to vector<128x1xf32>
    %12 = arith.divf %10, %11 : vector<128x1xf32>
    %13 = vector.broadcast %5 : vector<128x1xf32> to vector<128x32xf32>
    %14 = arith.subf %1, %13 : vector<128x32xf32>
    %cst_5 = arith.constant 9.99999974E-6 : f32
    %15 = vector.broadcast %cst_5 : f32 to vector<128x1xf32>
    %16 = arith.addf %12, %15 : vector<128x1xf32>
    %17 = math.rsqrt %16 : vector<128x1xf32>
    %18 = vector.broadcast %17 : vector<128x1xf32> to vector<128x32xf32>
    %19 = arith.mulf %14, %18 : vector<128x32xf32>
    %c0_6 = arith.constant 0 : index
    %c0_7 = arith.constant 0 : index
    %20 = vector.load %arg2[%c0_6, %c0_7] : memref<1x32xf32, #tpu.memory_space<vmem>>, vector<1x32xf32>
    %21 = vector.shape_cast %20 : vector<1x32xf32> to vector<32xf32>
    %22 = vector.shape_cast %21 : vector<32xf32> to vector<1x32xf32>
    %23 = vector.broadcast %22 : vector<1x32xf32> to vector<128x32xf32>
    %24 = arith.mulf %19, %23 : vector<128x32xf32>
    %c0_8 = arith.constant 0 : index
    %c0_9 = arith.constant 0 : index
    %25 = vector.load %arg3[%c0_8, %c0_9] : memref<1x32xf32, #tpu.memory_space<vmem>>, vector<1x32xf32>
    %26 = vector.shape_cast %25 : vector<1x32xf32> to vector<32xf32>
    %27 = vector.shape_cast %26 : vector<32xf32> to vector<1x32xf32>
    %28 = vector.broadcast %27 : vector<1x32xf32> to vector<128x32xf32>
    %29 = arith.addf %24, %28 : vector<128x32xf32>
    %30 = arith.truncf %29 : vector<128x32xf32> to vector<128x32xbf16>
    %c0_10 = arith.constant 0 : index
    %c0_11 = arith.constant 0 : index
    %31 = vector.load %arg4[%c0_10, %c0_11] : memref<32x96xbf16, #tpu.memory_space<vmem>>, vector<32x96xbf16>
    %cst_12 = arith.constant dense<0.000000e+00> : vector<128x96xf32>
    %32 = tpu.matmul %30, %31, %cst_12 {dimension_numbers = #tpu.dot_dimension_numbers<[1], [0], [0], [1], [0, 0, 1, 1], [], []>} : vector<128x32xbf16>, vector<32x96xbf16>, vector<128x96xf32> -> vector<128x96xf32>
    %c0_13 = arith.constant 0 : index
    %c0_14 = arith.constant 0 : index
    %33 = vector.load %arg5[%c0_13, %c0_14] : memref<1x96xf32, #tpu.memory_space<vmem>>, vector<1x96xf32>
    %34 = vector.shape_cast %33 : vector<1x96xf32> to vector<96xf32>
    %35 = vector.shape_cast %34 : vector<96xf32> to vector<1x96xf32>
    %36 = vector.broadcast %35 : vector<1x96xf32> to vector<128x96xf32>
    %37 = arith.addf %32, %36 : vector<128x96xf32>
    %38 = tpu.iota {dimensions = array<i32: 1>} : vector<1x128xi32>
    %c8_i32 = arith.constant 8 : i32
    %39 = vector.broadcast %c8_i32 : i32 to vector<1x128xi32>
    %40 = arith.cmpi slt, %38, %39 : vector<1x128xi32>
    %cst_15 = arith.constant 0.000000e+00 : f32
    %cst_16 = arith.constant -1.000000e+30 : f32
    %41 = vector.broadcast %cst_15 : f32 to vector<1x128xf32>
    %42 = vector.broadcast %cst_16 : f32 to vector<1x128xf32>
    %43 = arith.select %40, %41, %42 : vector<1x128xi1>, vector<1x128xf32>
    %44 = vector.extract_strided_slice %37 {offsets = [0, 0], sizes = [128, 8], strides = [1, 1]} : vector<128x96xf32> to vector<128x8xf32>
    %45 = arith.truncf %44 : vector<128x8xf32> to vector<128x8xbf16>
    %46 = vector.extract_strided_slice %37 {offsets = [0, 32], sizes = [128, 8], strides = [1, 1]} : vector<128x96xf32> to vector<128x8xf32>
    %47 = arith.truncf %46 : vector<128x8xf32> to vector<128x8xbf16>
    %48 = vector.extract_strided_slice %37 {offsets = [0, 64], sizes = [128, 8], strides = [1, 1]} : vector<128x96xf32> to vector<128x8xf32>
    %49 = arith.truncf %48 : vector<128x8xf32> to vector<128x8xbf16>
    %cst_17 = arith.constant dense<0.000000e+00> : vector<128x128xf32>
    %50 = tpu.matmul %45, %47, %cst_17 {dimension_numbers = #tpu.dot_dimension_numbers<[1], [1], [0], [0], [0, 0, 1, 0], [], []>} : vector<128x8xbf16>, vector<128x8xbf16>, vector<128x128xf32> -> vector<128x128xf32>
    %51 = vector.broadcast %43 : vector<1x128xf32> to vector<128x128xf32>
    %52 = arith.addf %50, %51 : vector<128x128xf32>
    %cst_18 = arith.constant dense<0xFF800000> : vector<128xf32>
    %53 = vector.multi_reduction <maximumf>, %52, %cst_18 [1] : vector<128x128xf32> to vector<128xf32>
    %54 = vector.shape_cast %53 : vector<128xf32> to vector<128x1xf32>
    %55 = vector.broadcast %54 : vector<128x1xf32> to vector<128x128xf32>
    %56 = arith.subf %52, %55 : vector<128x128xf32>
    %57 = math.exp %56 : vector<128x128xf32>
    %cst_19 = arith.constant dense<0.000000e+00> : vector<128xf32>
    %58 = vector.multi_reduction <add>, %57, %cst_19 [1] : vector<128x128xf32> to vector<128xf32>
    %59 = vector.shape_cast %58 : vector<128xf32> to vector<128x1xf32>
    %60 = tpu.reciprocal %59 {approx = true} : vector<128x1xf32> -> vector<128x1xf32>
    %61 = arith.truncf %57 : vector<128x128xf32> to vector<128x128xbf16>
    %cst_20 = arith.constant dense<0.000000e+00> : vector<128x8xf32>
    %62 = tpu.matmul %61, %49, %cst_20 {dimension_numbers = #tpu.dot_dimension_numbers<[1], [0], [0], [1], [0, 0, 1, 1], [], []>} : vector<128x128xbf16>, vector<128x8xbf16>, vector<128x8xf32> -> vector<128x8xf32>
    %63 = vector.broadcast %60 : vector<128x1xf32> to vector<128x8xf32>
    %64 = arith.mulf %62, %63 : vector<128x8xf32>
    %65 = vector.extract_strided_slice %37 {offsets = [0, 8], sizes = [128, 8], strides = [1, 1]} : vector<128x96xf32> to vector<128x8xf32>
    %66 = arith.truncf %65 : vector<128x8xf32> to vector<128x8xbf16>
    %67 = vector.extract_strided_slice %37 {offsets = [0, 40], sizes = [128, 8], strides = [1, 1]} : vector<128x96xf32> to vector<128x8xf32>
    %68 = arith.truncf %67 : vector<128x8xf32> to vector<128x8xbf16>
    %69 = vector.extract_strided_slice %37 {offsets = [0, 72], sizes = [128, 8], strides = [1, 1]} : vector<128x96xf32> to vector<128x8xf32>
    %70 = arith.truncf %69 : vector<128x8xf32> to vector<128x8xbf16>
    %cst_21 = arith.constant dense<0.000000e+00> : vector<128x128xf32>
    %71 = tpu.matmul %66, %68, %cst_21 {dimension_numbers = #tpu.dot_dimension_numbers<[1], [1], [0], [0], [0, 0, 1, 0], [], []>} : vector<128x8xbf16>, vector<128x8xbf16>, vector<128x128xf32> -> vector<128x128xf32>
    %72 = vector.broadcast %43 : vector<1x128xf32> to vector<128x128xf32>
    %73 = arith.addf %71, %72 : vector<128x128xf32>
    %cst_22 = arith.constant dense<0xFF800000> : vector<128xf32>
    %74 = vector.multi_reduction <maximumf>, %73, %cst_22 [1] : vector<128x128xf32> to vector<128xf32>
    %75 = vector.shape_cast %74 : vector<128xf32> to vector<128x1xf32>
    %76 = vector.broadcast %75 : vector<128x1xf32> to vector<128x128xf32>
    %77 = arith.subf %73, %76 : vector<128x128xf32>
    %78 = math.exp %77 : vector<128x128xf32>
    %cst_23 = arith.constant dense<0.000000e+00> : vector<128xf32>
    %79 = vector.multi_reduction <add>, %78, %cst_23 [1] : vector<128x128xf32> to vector<128xf32>
    %80 = vector.shape_cast %79 : vector<128xf32> to vector<128x1xf32>
    %81 = tpu.reciprocal %80 {approx = true} : vector<128x1xf32> -> vector<128x1xf32>
    %82 = arith.truncf %78 : vector<128x128xf32> to vector<128x128xbf16>
    %cst_24 = arith.constant dense<0.000000e+00> : vector<128x8xf32>
    %83 = tpu.matmul %82, %70, %cst_24 {dimension_numbers = #tpu.dot_dimension_numbers<[1], [0], [0], [1], [0, 0, 1, 1], [], []>} : vector<128x128xbf16>, vector<128x8xbf16>, vector<128x8xf32> -> vector<128x8xf32>
    %84 = vector.broadcast %81 : vector<128x1xf32> to vector<128x8xf32>
    %85 = arith.mulf %83, %84 : vector<128x8xf32>
    %86 = vector.extract_strided_slice %37 {offsets = [0, 16], sizes = [128, 8], strides = [1, 1]} : vector<128x96xf32> to vector<128x8xf32>
    %87 = arith.truncf %86 : vector<128x8xf32> to vector<128x8xbf16>
    %88 = vector.extract_strided_slice %37 {offsets = [0, 48], sizes = [128, 8], strides = [1, 1]} : vector<128x96xf32> to vector<128x8xf32>
    %89 = arith.truncf %88 : vector<128x8xf32> to vector<128x8xbf16>
    %90 = vector.extract_strided_slice %37 {offsets = [0, 80], sizes = [128, 8], strides = [1, 1]} : vector<128x96xf32> to vector<128x8xf32>
    %91 = arith.truncf %90 : vector<128x8xf32> to vector<128x8xbf16>
    %cst_25 = arith.constant dense<0.000000e+00> : vector<128x128xf32>
    %92 = tpu.matmul %87, %89, %cst_25 {dimension_numbers = #tpu.dot_dimension_numbers<[1], [1], [0], [0], [0, 0, 1, 0], [], []>} : vector<128x8xbf16>, vector<128x8xbf16>, vector<128x128xf32> -> vector<128x128xf32>
    %93 = vector.broadcast %43 : vector<1x128xf32> to vector<128x128xf32>
    %94 = arith.addf %92, %93 : vector<128x128xf32>
    %cst_26 = arith.constant dense<0xFF800000> : vector<128xf32>
    %95 = vector.multi_reduction <maximumf>, %94, %cst_26 [1] : vector<128x128xf32> to vector<128xf32>
    %96 = vector.shape_cast %95 : vector<128xf32> to vector<128x1xf32>
    %97 = vector.broadcast %96 : vector<128x1xf32> to vector<128x128xf32>
    %98 = arith.subf %94, %97 : vector<128x128xf32>
    %99 = math.exp %98 : vector<128x128xf32>
    %cst_27 = arith.constant dense<0.000000e+00> : vector<128xf32>
    %100 = vector.multi_reduction <add>, %99, %cst_27 [1] : vector<128x128xf32> to vector<128xf32>
    %101 = vector.shape_cast %100 : vector<128xf32> to vector<128x1xf32>
    %102 = tpu.reciprocal %101 {approx = true} : vector<128x1xf32> -> vector<128x1xf32>
    %103 = arith.truncf %99 : vector<128x128xf32> to vector<128x128xbf16>
    %cst_28 = arith.constant dense<0.000000e+00> : vector<128x8xf32>
    %104 = tpu.matmul %103, %91, %cst_28 {dimension_numbers = #tpu.dot_dimension_numbers<[1], [0], [0], [1], [0, 0, 1, 1], [], []>} : vector<128x128xbf16>, vector<128x8xbf16>, vector<128x8xf32> -> vector<128x8xf32>
    %105 = vector.broadcast %102 : vector<128x1xf32> to vector<128x8xf32>
    %106 = arith.mulf %104, %105 : vector<128x8xf32>
    %107 = vector.extract_strided_slice %37 {offsets = [0, 24], sizes = [128, 8], strides = [1, 1]} : vector<128x96xf32> to vector<128x8xf32>
    %108 = arith.truncf %107 : vector<128x8xf32> to vector<128x8xbf16>
    %109 = vector.extract_strided_slice %37 {offsets = [0, 56], sizes = [128, 8], strides = [1, 1]} : vector<128x96xf32> to vector<128x8xf32>
    %110 = arith.truncf %109 : vector<128x8xf32> to vector<128x8xbf16>
    %111 = vector.extract_strided_slice %37 {offsets = [0, 88], sizes = [128, 8], strides = [1, 1]} : vector<128x96xf32> to vector<128x8xf32>
    %112 = arith.truncf %111 : vector<128x8xf32> to vector<128x8xbf16>
    %cst_29 = arith.constant dense<0.000000e+00> : vector<128x128xf32>
    %113 = tpu.matmul %108, %110, %cst_29 {dimension_numbers = #tpu.dot_dimension_numbers<[1], [1], [0], [0], [0, 0, 1, 0], [], []>} : vector<128x8xbf16>, vector<128x8xbf16>, vector<128x128xf32> -> vector<128x128xf32>
    %114 = vector.broadcast %43 : vector<1x128xf32> to vector<128x128xf32>
    %115 = arith.addf %113, %114 : vector<128x128xf32>
    %cst_30 = arith.constant dense<0xFF800000> : vector<128xf32>
    %116 = vector.multi_reduction <maximumf>, %115, %cst_30 [1] : vector<128x128xf32> to vector<128xf32>
    %117 = vector.shape_cast %116 : vector<128xf32> to vector<128x1xf32>
    %118 = vector.broadcast %117 : vector<128x1xf32> to vector<128x128xf32>
    %119 = arith.subf %115, %118 : vector<128x128xf32>
    %120 = math.exp %119 : vector<128x128xf32>
    %cst_31 = arith.constant dense<0.000000e+00> : vector<128xf32>
    %121 = vector.multi_reduction <add>, %120, %cst_31 [1] : vector<128x128xf32> to vector<128xf32>
    %122 = vector.shape_cast %121 : vector<128xf32> to vector<128x1xf32>
    %123 = tpu.reciprocal %122 {approx = true} : vector<128x1xf32> -> vector<128x1xf32>
    %124 = arith.truncf %120 : vector<128x128xf32> to vector<128x128xbf16>
    %cst_32 = arith.constant dense<0.000000e+00> : vector<128x8xf32>
    %125 = tpu.matmul %124, %112, %cst_32 {dimension_numbers = #tpu.dot_dimension_numbers<[1], [0], [0], [1], [0, 0, 1, 1], [], []>} : vector<128x128xbf16>, vector<128x8xbf16>, vector<128x8xf32> -> vector<128x8xf32>
    %126 = vector.broadcast %123 : vector<128x1xf32> to vector<128x8xf32>
    %127 = arith.mulf %125, %126 : vector<128x8xf32>
    %128 = tpu.concatenate %64, %85, %106, %127 in 1 : vector<128x8xf32>, vector<128x8xf32>, vector<128x8xf32>, vector<128x8xf32> -> vector<128x32xf32>
    %129 = arith.truncf %128 : vector<128x32xf32> to vector<128x32xbf16>
    %c0_33 = arith.constant 0 : index
    %c0_34 = arith.constant 0 : index
    %130 = vector.load %arg6[%c0_33, %c0_34] : memref<32x32xbf16, #tpu.memory_space<vmem>>, vector<32x32xbf16>
    %cst_35 = arith.constant dense<0.000000e+00> : vector<128x32xf32>
    %131 = tpu.matmul %129, %130, %cst_35 {dimension_numbers = #tpu.dot_dimension_numbers<[1], [0], [0], [1], [0, 0, 1, 1], [], []>} : vector<128x32xbf16>, vector<32x32xbf16>, vector<128x32xf32> -> vector<128x32xf32>
    %c0_36 = arith.constant 0 : index
    %c0_37 = arith.constant 0 : index
    %132 = vector.load %arg7[%c0_36, %c0_37] : memref<1x32xf32, #tpu.memory_space<vmem>>, vector<1x32xf32>
    %133 = vector.shape_cast %132 : vector<1x32xf32> to vector<32xf32>
    %134 = vector.shape_cast %133 : vector<32xf32> to vector<1x32xf32>
    %135 = vector.broadcast %134 : vector<1x32xf32> to vector<128x32xf32>
    %136 = arith.addf %131, %135 : vector<128x32xf32>
    %137 = arith.addf %1, %136 : vector<128x32xf32>
    %cst_38 = arith.constant dense<0.000000e+00> : vector<128xf32>
    %138 = vector.multi_reduction <add>, %137, %cst_38 [1] : vector<128x32xf32> to vector<128xf32>
    %139 = vector.shape_cast %138 : vector<128xf32> to vector<128x1xf32>
    %cst_39 = arith.constant 3.200000e+01 : f32
    %140 = vector.broadcast %cst_39 : f32 to vector<128x1xf32>
    %141 = arith.divf %139, %140 : vector<128x1xf32>
    %142 = vector.broadcast %141 : vector<128x1xf32> to vector<128x32xf32>
    %143 = arith.subf %137, %142 : vector<128x32xf32>
    %144 = arith.mulf %143, %143 : vector<128x32xf32>
    %cst_40 = arith.constant dense<0.000000e+00> : vector<128xf32>
    %145 = vector.multi_reduction <add>, %144, %cst_40 [1] : vector<128x32xf32> to vector<128xf32>
    %146 = vector.shape_cast %145 : vector<128xf32> to vector<128x1xf32>
    %cst_41 = arith.constant 3.200000e+01 : f32
    %147 = vector.broadcast %cst_41 : f32 to vector<128x1xf32>
    %148 = arith.divf %146, %147 : vector<128x1xf32>
    %149 = vector.broadcast %141 : vector<128x1xf32> to vector<128x32xf32>
    %150 = arith.subf %137, %149 : vector<128x32xf32>
    %cst_42 = arith.constant 9.99999974E-6 : f32
    %151 = vector.broadcast %cst_42 : f32 to vector<128x1xf32>
    %152 = arith.addf %148, %151 : vector<128x1xf32>
    %153 = math.rsqrt %152 : vector<128x1xf32>
    %154 = vector.broadcast %153 : vector<128x1xf32> to vector<128x32xf32>
    %155 = arith.mulf %150, %154 : vector<128x32xf32>
    %c0_43 = arith.constant 0 : index
    %c0_44 = arith.constant 0 : index
    %156 = vector.load %arg8[%c0_43, %c0_44] : memref<1x32xf32, #tpu.memory_space<vmem>>, vector<1x32xf32>
    %157 = vector.shape_cast %156 : vector<1x32xf32> to vector<32xf32>
    %158 = vector.shape_cast %157 : vector<32xf32> to vector<1x32xf32>
    %159 = vector.broadcast %158 : vector<1x32xf32> to vector<128x32xf32>
    %160 = arith.mulf %155, %159 : vector<128x32xf32>
    %c0_45 = arith.constant 0 : index
    %c0_46 = arith.constant 0 : index
    %161 = vector.load %arg9[%c0_45, %c0_46] : memref<1x32xf32, #tpu.memory_space<vmem>>, vector<1x32xf32>
    %162 = vector.shape_cast %161 : vector<1x32xf32> to vector<32xf32>
    %163 = vector.shape_cast %162 : vector<32xf32> to vector<1x32xf32>
    %164 = vector.broadcast %163 : vector<1x32xf32> to vector<128x32xf32>
    %165 = arith.addf %160, %164 : vector<128x32xf32>
    %166 = arith.truncf %165 : vector<128x32xf32> to vector<128x32xbf16>
    %c0_47 = arith.constant 0 : index
    %c0_48 = arith.constant 0 : index
    %167 = vector.load %arg10[%c0_47, %c0_48] : memref<32x128xbf16, #tpu.memory_space<vmem>>, vector<32x128xbf16>
    %cst_49 = arith.constant dense<0.000000e+00> : vector<128x128xf32>
    %168 = tpu.matmul %166, %167, %cst_49 {dimension_numbers = #tpu.dot_dimension_numbers<[1], [0], [0], [1], [0, 0, 1, 1], [], []>} : vector<128x32xbf16>, vector<32x128xbf16>, vector<128x128xf32> -> vector<128x128xf32>
    %c0_50 = arith.constant 0 : index
    %c0_51 = arith.constant 0 : index
    %169 = vector.load %arg11[%c0_50, %c0_51] : memref<1x128xf32, #tpu.memory_space<vmem>>, vector<1x128xf32>
    %170 = vector.shape_cast %169 : vector<1x128xf32> to vector<128xf32>
    %171 = vector.shape_cast %170 : vector<128xf32> to vector<1x128xf32>
    %172 = vector.broadcast %171 : vector<1x128xf32> to vector<128x128xf32>
    %173 = arith.addf %168, %172 : vector<128x128xf32>
    %cst_52 = arith.constant 5.000000e-01 : f32
    %174 = vector.broadcast %cst_52 : f32 to vector<128x128xf32>
    %175 = arith.mulf %174, %173 : vector<128x128xf32>
    %cst_53 = arith.constant 0.707106769 : f32
    %176 = vector.broadcast %cst_53 : f32 to vector<128x128xf32>
    %177 = arith.mulf %173, %176 : vector<128x128xf32>
    %178 = math.erf %177 : vector<128x128xf32>
    %cst_54 = arith.constant 1.000000e+00 : f32
    %179 = vector.broadcast %cst_54 : f32 to vector<128x128xf32>
    %180 = arith.addf %179, %178 : vector<128x128xf32>
    %181 = arith.mulf %175, %180 : vector<128x128xf32>
    %182 = arith.truncf %181 : vector<128x128xf32> to vector<128x128xbf16>
    %c0_55 = arith.constant 0 : index
    %c0_56 = arith.constant 0 : index
    %183 = vector.load %arg12[%c0_55, %c0_56] : memref<128x32xbf16, #tpu.memory_space<vmem>>, vector<128x32xbf16>
    %cst_57 = arith.constant dense<0.000000e+00> : vector<128x32xf32>
    %184 = tpu.matmul %182, %183, %cst_57 {dimension_numbers = #tpu.dot_dimension_numbers<[1], [0], [0], [1], [0, 0, 1, 1], [], []>} : vector<128x128xbf16>, vector<128x32xbf16>, vector<128x32xf32> -> vector<128x32xf32>
    %c0_58 = arith.constant 0 : index
    %c0_59 = arith.constant 0 : index
    %185 = vector.load %arg13[%c0_58, %c0_59] : memref<1x32xf32, #tpu.memory_space<vmem>>, vector<1x32xf32>
    %186 = vector.shape_cast %185 : vector<1x32xf32> to vector<32xf32>
    %187 = vector.shape_cast %186 : vector<32xf32> to vector<1x32xf32>
    %188 = vector.broadcast %187 : vector<1x32xf32> to vector<128x32xf32>
    %189 = arith.addf %184, %188 : vector<128x32xf32>
    %190 = arith.addf %137, %189 : vector<128x32xf32>
    %c0_60 = arith.constant 0 : index
    %c0_61 = arith.constant 0 : index
    %c0_62 = arith.constant 0 : index
    %191 = vector.load %arg14[%c0_60, %c0_61, %c0_62] : memref<1x128x32xf32, #tpu.memory_space<vmem>>, vector<1x128x32xf32>
    %192 = vector.shape_cast %191 : vector<1x128x32xf32> to vector<128x32xf32>
    %193 = vector.shape_cast %190 : vector<128x32xf32> to vector<1x128x32xf32>
    tpu.vector_store %arg14[%c0_60, %c0_61, %c0_62], %193 {strides = array<i32>} : memref<1x128x32xf32, #tpu.memory_space<vmem>>, vector<1x128x32xf32>,
    return
  }
  func.func @transform_0(%arg0: i32) -> (i32, i32, i32) {
    %c0_i32 = arith.constant 0 : i32
    %c0_i32_0 = arith.constant 0 : i32
    %c0_i32_1 = arith.constant 0 : i32
    return %arg0, %c0_i32, %c0_i32_0 : i32, i32, i32
  }
  func.func @transform_1(%arg0: i32) -> (i32, i32) {
    %c0_i32 = arith.constant 0 : i32
    %c0_i32_0 = arith.constant 0 : i32
    %c0_i32_1 = arith.constant 0 : i32
    return %c0_i32, %c0_i32_0 : i32, i32
  }
  func.func @transform_2(%arg0: i32) -> (i32, i32) {
    %c0_i32 = arith.constant 0 : i32
    %c0_i32_0 = arith.constant 0 : i32
    %c0_i32_1 = arith.constant 0 : i32
    return %c0_i32, %c0_i32_0 : i32, i32
  }
  func.func @transform_3(%arg0: i32) -> (i32, i32) {
    %c0_i32 = arith.constant 0 : i32
    %c0_i32_0 = arith.constant 0 : i32
    %c0_i32_1 = arith.constant 0 : i32
    return %c0_i32, %c0_i32_0 : i32, i32
  }
  func.func @transform_4(%arg0: i32) -> (i32, i32) {
    %c0_i32 = arith.constant 0 : i32
    %c0_i32_0 = arith.constant 0 : i32
    %c0_i32_1 = arith.constant 0 : i32
    return %c0_i32, %c0_i32_0 : i32, i32
  }
  func.func @transform_5(%arg0: i32) -> (i32, i32) {
    %c0_i32 = arith.constant 0 : i32
    %c0_i32_0 = arith.constant 0 : i32
    %c0_i32_1 = arith.constant 0 : i32
    return %c0_i32, %c0_i32_0 : i32, i32
  }
  func.func @transform_6(%arg0: i32) -> (i32, i32) {
    %c0_i32 = arith.constant 0 : i32
    %c0_i32_0 = arith.constant 0 : i32
    %c0_i32_1 = arith.constant 0 : i32
    return %c0_i32, %c0_i32_0 : i32, i32
  }
  func.func @transform_7(%arg0: i32) -> (i32, i32) {
    %c0_i32 = arith.constant 0 : i32
    %c0_i32_0 = arith.constant 0 : i32
    %c0_i32_1 = arith.constant 0 : i32
    return %c0_i32, %c0_i32_0 : i32, i32
  }
  func.func @transform_8(%arg0: i32) -> (i32, i32) {
    %c0_i32 = arith.constant 0 : i32
    %c0_i32_0 = arith.constant 0 : i32
    %c0_i32_1 = arith.constant 0 : i32
    return %c0_i32, %c0_i32_0 : i32, i32
  }
  func.func @transform_9(%arg0: i32) -> (i32, i32) {
    %c0_i32 = arith.constant 0 : i32
    %c0_i32_0 = arith.constant 0 : i32
    %c0_i32_1 = arith.constant 0 : i32
    return %c0_i32, %c0_i32_0 : i32, i32
  }
  func.func @transform_10(%arg0: i32) -> (i32, i32) {
    %c0_i32 = arith.constant 0 : i32
    %c0_i32_0 = arith.constant 0 : i32
    %c0_i32_1 = arith.constant 0 : i32
    return %c0_i32, %c0_i32_0 : i32, i32
  }
  func.func @transform_11(%arg0: i32) -> (i32, i32) {
    %c0_i32 = arith.constant 0 : i32
    %c0_i32_0 = arith.constant 0 : i32
    %c0_i32_1 = arith.constant 0 : i32
    return %c0_i32, %c0_i32_0 : i32, i32
  }
  func.func @transform_12(%arg0: i32) -> (i32, i32) {
    %c0_i32 = arith.constant 0 : i32
    %c0_i32_0 = arith.constant 0 : i32
    %c0_i32_1 = arith.constant 0 : i32
    return %c0_i32, %c0_i32_0 : i32, i32
  }
  func.func @transform_13(%arg0: i32) -> (i32, i32, i32) {
    %c0_i32 = arith.constant 0 : i32
    %c0_i32_0 = arith.constant 0 : i32
    %c0_i32_1 = arith.constant 0 : i32
    return %arg0, %c0_i32, %c0_i32_0 : i32, i32, i32
  }
}

</mosaic_0001>

<bundles_post_ra>
// kernel: tpu_custom_call.1
= control target key start
LH: loop header
LB: loop body
LE: loop exit
PB: predicated region body
PF: predicated region fallthrough
CT: control target
= control target key end

     0   :  { %s4932_s25 = smov 0   ;;  %s7501_s0 = inlined_call_operand.vmem [shape: f32[2,128,32], index: 0, kind: input, shape index: {}]   ;;  %s7502_s1 = inlined_call_operand.vmem [shape: f32[1,32], index: 1, kind: input, shape index: {}]   ;;  %s7503_s2 = inlined_call_operand.vmem [shape: f32[1,32], index: 2, kind: input, shape index: {}]   ;;  %s7504_s3 = inlined_call_operand.vmem [shape: bf16[32,96], index: 3, kind: input, shape index: {}]   ;;  %s7505_s4 = inlined_call_operand.vmem [shape: f32[1,96], index: 4, kind: input, shape index: {}]   ;;  %s7506_s5 = inlined_call_operand.vmem [shape: bf16[32,32], index: 5, kind: input, shape index: {}]   ;;  %s7507_s6 = inlined_call_operand.vmem [shape: f32[1,32], index: 6, kind: input, shape index: {}]   ;;  %s7508_s7 = inlined_call_operand.vmem [shape: f32[1,32], index: 7, kind: input, shape index: {}]   ;;  %s7509_s8 = inlined_call_operand.vmem [shape: f32[1,32], index: 8, kind: input, shape index: {}]   ;;  %s7510_s9 = inlined_call_operand.vmem [shape: bf16[32,128], index: 9, kind: input, shape index: {}]   ;;  %s7511_s10 = inlined_call_operand.vmem [shape: f32[1,128], index: 10, kind: input, shape index: {}]   ;;  %s7512_s11 = inlined_call_operand.vmem [shape: bf16[128,32], index: 11, kind: input, shape index: {}]   ;;  %s7513_s12 = inlined_call_operand.vmem [shape: f32[1,32], index: 12, kind: input, shape index: {}]   ;;  %s7514_s13 = inlined_call_operand.vmem [shape: f32[2,128,32], index: 13, kind: output, shape index: {}]  }
   0x1 LB: > { %s4148_s26 = sadd.s32 4294967295, %s4844_s25   ;;  %p4152_p0 = scmp.ge.s32.totalorder %s4844_s25, 1  ;;  %s4844_s25 = sphi %s4932_s25, %s23_s25  }
   0x2   : > { %p387_p1 = scmp.lt.s32.totalorder %s4844_s25, 3 }
   0x4   : > { %p388_p2 = pnand %p4152_p0, %p387_p1 }
   0x6   : > { %391 = sbr.rel (%p388_p2) target bundleno = 3015 (0xbc7), region = 72 }
   0xb   : > { %p431_p3 = scmp.lt.s32.totalorder %s4148_s26, 1  ;;  %vm458_vm0 = vcmask 261120   ;;  %v4846_v14 = vmov 32.0   ;;  %s4847_s24 = smov 96  }
   0xc   : > { %4465 = vrcp.f32 %v4846_v14  ;;  %s4848_s28 = smov 88   ;;  %s4849_s29 = smov 64  }
   0xd   : > { %s7574_s26 = smov (!%p431_p3, %s4148_s26), 1  ;;  %s4850_s14 = smov 80  }
   0xe   : > { %s4287_s27 = sshll.u32 %s7574_s26, 7  ;;  %s4851_s15 = smov 72  }
   0xf   : > { %s4948_s30 = scalar_lea.vmem %s7501_s0, %s4287_s27  ;;  %s4852_s16 = smov 120  }
  0x10   : > { %v444_v0 = vld [vmem:[%s4948_s30 + $0x10] sm:$0xff]  ;;  %v442_v1 = vld [vmem:[%s4948_s30] sm:$0xff]  ;;  %v445_v6 = vld [vmem:[%s4948_s30 + $0x18] sm:$0xff]  ;;  %s4853_s17 = smov 112   ;;  %s4854_s18 = smov 56  }
  0x11   : > { %v465_v2 = vsel %vm458_vm0, %v444_v0, 0.0  ;;  %v459_v3 = vsel %vm458_vm0, %v442_v1, 0.0  ;;  %v446_v4 = vld [vmem:[%s4948_s30 + $0x20] sm:$0xff]  ;;  %v443_v7 = vld [vmem:[%s4948_s30 + $0x8] sm:$0xff]  ;;  %v468_v9 = vsel %vm458_vm0, %v445_v6, 0.0  ;;  %v448_v12 = vld [vmem:[%s4948_s30 + $0x30] sm:$0xff] }
  0x12   : > { %466 = vadd.xlane.f32.xlu1 %v465_v2  ;;  %460 = vadd.xlane.f32.xlu0 %v459_v3  ;;  %v471_v5 = vsel %vm458_vm0, %v446_v4, 0.0  ;;  %v447_v8 = vld [vmem:[%s4948_s30 + $0x28] sm:$0xff]  ;;  %v462_v10 = vsel %vm458_vm0, %v443_v7, 0.0  ;;  %v477_v13 = vsel %vm458_vm0, %v448_v12, 0.0  ;;  %v4466_v15 = vpop.eup %4465  ;;  %v4977_v34 = vld [vmem:[%s4948_s30 + $0x38] sm:$0xff]  ;;  %v4999_v47 = vld [vmem:[%s4948_s30 + $0x40] sm:$0xff] }
  0x13   : > { %472 = vadd.xlane.f32.xlu2 %v471_v5  ;;  %v474_v11 = vsel %vm458_vm0, %v447_v8, 0.0  ;;  %v508_v16 = vmul.f32 32.0, %v4466_v15  ;;  %vm512_vm1 = vweird.f32 %v4466_v15  ;;  %v480_v40 = vsel %vm458_vm0, %v4977_v34, 0.0  ;;  %v5013_v56 = vld [vmem:[%s4948_s30 + $0x58] sm:$0xff]  ;;  %v5016_v57 = vld [vmem:[%s4948_s30 + $0x48] sm:$0xff]  ;;  %v5028_v63 = vld [vmem:[%s4948_s30 + $0x60] sm:$0xff] }
  0x14   : > { %v483_v51 = vsel %vm458_vm0, %v4999_v47, 0.0  ;;  %v492_v59 = vsel %vm458_vm0, %v5013_v56, 0.0  ;;  %v486_v61 = vsel %vm458_vm0, %v5016_v57, 0.0  ;;  %s4855_s19 = smov 104   ;;  %s4856_s20 = smov 48  }
  0x15   : > { %v509_v17 = vsub.f32 1.0, %v508_v16  ;;  %s4857_s21 = smov 40   ;;  %s4859_s22 = smov 8  }
  0x16   : > { %s4860_s23 = smov 24  }
  0x17   : > { %v510_v18 = vmul.f32 %v4466_v15, %v509_v17 }
  0x19   : > { %v511_v19 = vadd.f32 %v4466_v15, %v510_v18 }
  0x1a   : > { %469 = vadd.xlane.f32.xlu1 %v468_v9  ;;  %463 = vadd.xlane.f32.xlu0 %v462_v10  ;;  %v4290_v9 = vld [vmem:[%s7504_s3 + $0x8] sm:$0xff] }
  0x1b   : > { %475 = vadd.xlane.f32.xlu2 %v474_v11  ;;  %v4964_v20 = vsel %vm512_vm1, %v4466_v15, %v511_v19  ;;  %916 = vmatpush.bf16.msra.mxu0 %v4290_v9 }
  0x1c   : > { %7519 = vst [vmem:[#allocation2_spill] sm:$0xff] %v4964_v20 }
  0x23   : > { %478 = vadd.xlane.f32.xlu2 %v477_v13 }
  0x85   : > { %v467_v21 = vpop.xlane.xlu1 %466  ;;  %v461_v22 = vpop.xlane.xlu0 %460 }
  0x86   : > { %v514_v23 = vmul.f32 %v4964_v20, %v461_v22  ;;  %v473_v24 = vpop.xlane.xlu2 %472  ;;  %v516_v33 = vmul.f32 %v4964_v20, %v467_v21 }
  0x87   : > { %v518_v32 = vmul.f32 %v4964_v20, %v473_v24 }
  0x88   : > { %v4967_v25 = vsub.f32 %v442_v1, %v514_v23  ;;  %v4991_v42 = vsub.f32 %v444_v0, %v516_v33  ;;  %v5031_v0 = vld [vmem:[%s4948_s30 + $0x50] sm:$0xff]  ;;  %v495_v1 = vsel %vm458_vm0, %v5028_v63, 0.0 }
  0x89   : > { %v4983_v38 = vsub.f32 %v446_v4, %v518_v32  ;;  %v489_v3 = vsel %vm458_vm0, %v5031_v0, 0.0  ;;  %v5039_v4 = vld [vmem:[%s4948_s30 + $0x68] sm:$0xff] }
  0x8a   : > { %v546_v26 = vmul.f32 %v4967_v25, %v4967_v25  ;;  %v548_v48 = vmul.f32 %v4991_v42, %v4991_v42  ;;  %v498_v5 = vsel %vm458_vm0, %v5039_v4, 0.0 }
  0x8b   : > { %v550_v46 = vmul.f32 %v4983_v38, %v4983_v38 }
  0x8c   : > { %v562_v27 = vsel %vm458_vm0, %v546_v26, 0.0  ;;  %v568_v52 = vsel %vm458_vm0, %v548_v48, 0.0 }
  0x8d   : > { %v470_v28 = vpop.xlane.xlu1 %469  ;;  %563 = vadd.xlane.f32.xlu0 %v562_v27  ;;  %v464_v29 = vpop.xlane.xlu0 %463  ;;  %v574_v50 = vsel %vm458_vm0, %v550_v46, 0.0 }
  0x8e   : > { %v517_v30 = vmul.f32 %v4964_v20, %v470_v28  ;;  %v515_v31 = vmul.f32 %v4964_v20, %v464_v29  ;;  %v476_v37 = vpop.xlane.xlu2 %475 }
  0x8f   : > { %v519_v45 = vmul.f32 %v4964_v20, %v476_v37 }
  0x90   : > { %v4979_v35 = vsub.f32 %v445_v6, %v517_v30  ;;  %v4981_v36 = vsub.f32 %v443_v7, %v515_v31  ;;  %v5044_v6 = vld [vmem:[%s4948_s30 + $0x70] sm:$0xff] }
  0x91   : > { %v5003_v49 = vsub.f32 %v447_v8, %v519_v45  ;;  %v501_v7 = vsel %vm458_vm0, %v5044_v6, 0.0 }
  0x92   : > { %v549_v39 = vmul.f32 %v4979_v35, %v4979_v35  ;;  %v547_v41 = vmul.f32 %v4981_v36, %v4981_v36 }
  0x93   : > { %v551_v55 = vmul.f32 %v5003_v49, %v5003_v49 }
  0x94   : > { %v571_v43 = vsel %vm458_vm0, %v549_v39, 0.0  ;;  %v565_v44 = vsel %vm458_vm0, %v547_v41, 0.0 }
  0x95   : > { %572 = vadd.xlane.f32.xlu2 %v571_v43  ;;  %481 = vadd.xlane.f32.xlu0 %v480_v40  ;;  %v577_v60 = vsel %vm458_vm0, %v551_v55, 0.0 }
  0x96   : > { %566 = vadd.xlane.f32.xlu1 %v565_v44  ;;  %v479_v53 = vpop.xlane.xlu2 %478 }
  0x97   : > { %v520_v54 = vmul.f32 %v4964_v20, %v479_v53 }
  0x99   : > { %v5018_v58 = vsub.f32 %v448_v12, %v520_v54  ;;  %v4289_v12 = vld [vmem:[%s7504_s3] sm:$0xff] }
  0x9a   : > { %917 = vmatpush.bf16.msra.mxu0 %v4289_v12  ;;  %v5113_v12 = vld [vmem:[%s4948_s30 + $0x78] sm:$0xff] }
  0x9b   : > { %v552_v62 = vmul.f32 %v5018_v58, %v5018_v58 }
  0x9d   : > { %575 = vadd.xlane.f32.xlu2 %v574_v50  ;;  %484 = vadd.xlane.f32.xlu0 %v483_v51  ;;  %v580_v2 = vsel %vm458_vm0, %v552_v62, 0.0 }
  0x9e   : > { %569 = vadd.xlane.f32.xlu1 %v568_v52 }
  0xa5   : > { %493 = vadd.xlane.f32.xlu2 %v492_v59  ;;  %578 = vadd.xlane.f32.xlu0 %v577_v60 }
  0xa6   : > { %487 = vadd.xlane.f32.xlu1 %v486_v61 }
  0xad   : > { %496 = vadd.xlane.f32.xlu2 %v495_v1  ;;  %581 = vadd.xlane.f32.xlu0 %v580_v2 }
  0xae   : > { %490 = vadd.xlane.f32.xlu1 %v489_v3 }
  0xb5   : > { %499 = vadd.xlane.f32.xlu0 %v498_v5 }
  0xbd   : > { %502 = vadd.xlane.f32.xlu0 %v501_v7 }
 0x100   : > { %v564_v8 = vpop.xlane.xlu0 %563 }
 0x101   : > { %v610_v10 = vmul.f32 %v564_v8, %v4964_v20 }
 0x103   : > { %v626_v11 = vadd.f32 1e-05, %v610_v10 }
 0x105   : > { %4467 = vrsqrt.f32 %v626_v11  ;;  %vm648_vm3 = vweird.f32 %v626_v11 }
 0x108   : > { %v573_v13 = vpop.xlane.xlu2 %572  ;;  %v482_v14 = vpop.xlane.xlu0 %481 }
 0x109   : > { %v613_v15 = vmul.f32 %v573_v13, %v4964_v20  ;;  %v567_v16 = vpop.xlane.xlu1 %566  ;;  %v521_v17 = vmul.f32 %v4964_v20, %v482_v14 }
 0x10a   : > { %v611_v18 = vmul.f32 %v567_v16, %v4964_v20 }
 0x10b   : > { %v4468_v19 = vpop.eup %4467  ;;  %v5058_v21 = vadd.f32 1e-05, %v613_v15  ;;  %v5061_v22 = vsub.f32 %v4977_v34, %v521_v17  ;;  %v5122_v15 = vld [vmem:[%s7502_s1] ss:$0 sm:$0xff] }
 0x10c   : > { %v643_v23 = vmul.f32 %v4468_v19, %v626_v11  ;;  %v627_v24 = vadd.f32 1e-05, %v611_v18  ;;  %vm649_vm2 = vweird.f32 %v4468_v19 }
 0x10d   : > { %4469 = vrsqrt.f32 %v5058_v21  ;;  %v553_v26 = vmul.f32 %v5061_v22, %v5061_v22  ;;  %vm5084_vm6 = vmor %vm648_vm3, %vm649_vm2  ;;  %vm678_vm10 = vweird.f32 %v5058_v21 }
 0x10e   : > { %v644_v27 = vmul.f32 %v4468_v19, %v643_v23  ;;  %4471 = vrsqrt.f32 %v627_v24  ;;  %vm658_vm4 = vweird.f32 %v627_v24 }
 0x10f   : > { %v583_v28 = vsel %vm458_vm0, %v553_v26, 0.0 }
 0x110   : > { %v645_v29 = vmul.f32 0.5, %v644_v27  ;;  %v576_v30 = vpop.xlane.xlu2 %575  ;;  %584 = vadd.xlane.f32.xlu1 %v583_v28  ;;  %v485_v31 = vpop.xlane.xlu0 %484 }
 0x111   : > { %v570_v32 = vpop.xlane.xlu1 %569  ;;  %v522_v33 = vmul.f32 %v4964_v20, %v485_v31  ;;  %v614_v43 = vmul.f32 %v576_v30, %v4964_v20 }
 0x112   : > { %v646_v34 = vsub.f32 1.5, %v645_v29  ;;  %v612_v37 = vmul.f32 %v570_v32, %v4964_v20 }
 0x113   : > { %v5069_v39 = vpop.eup %4469  ;;  %v5072_v40 = vsub.f32 %v4999_v47, %v522_v33  ;;  %v5082_v47 = vadd.f32 1e-05, %v614_v43  ;;  %v5144_v33 = vld [vmem:[%s7503_s2] ss:$0 sm:$0xff] }
 0x114   : > { %v4472_v41 = vpop.eup %4471  ;;  %v5075_v44 = vadd.f32 1e-05, %v612_v37  ;;  %v647_v46 = vmul.f32 %v4468_v19, %v646_v34  ;;  %v673_v48 = vmul.f32 %v5069_v39, %v5058_v21  ;;  %vm679_vm11 = vweird.f32 %v5069_v39 }
 0x115   : > { %v653_v45 = vmul.f32 %v4472_v41, %v627_v24  ;;  %v554_v51 = vmul.f32 %v5072_v40, %v5072_v40  ;;  %vm659_vm5 = vweird.f32 %v4472_v41  ;;  %vm5176_vm13 = vmor %vm678_vm10, %vm679_vm11  ;;  %vm688_vm1 = vweird.f32 %v5082_v47 }
 0x116   : > { %4473 = vrsqrt.f32 %v5075_v44  ;;  %v651_v1 = vsel %vm5084_vm6, %v4468_v19, %v647_v46  ;;  %v674_v2 = vmul.f32 %v5069_v39, %v673_v48  ;;  %vm5104_vm7 = vmor %vm658_vm4, %vm659_vm5  ;;  %vm668_vm8 = vweird.f32 %v5075_v44 }
 0x117   : > { %v654_v50 = vmul.f32 %v4472_v41, %v653_v45  ;;  %v586_v61 = vsel %vm458_vm0, %v554_v51, 0.0  ;;  %4475 = vrsqrt.f32 %v5082_v47  ;;  %v802_v14 = vmul.f32 %v651_v1, %v4967_v25 }
 0x118   : > { %v494_v52 = vpop.xlane.xlu2 %493  ;;  %v579_v53 = vpop.xlane.xlu0 %578  ;;  %587 = vadd.xlane.f32.xlu1 %v586_v61  ;;  %v675_v16 = vmul.f32 0.5, %v674_v2  ;;  %v504_v25 = vsel %vm458_vm0, %v5113_v12, 0.0 }
 0x119   : > { %v655_v55 = vmul.f32 0.5, %v654_v50  ;;  %v525_v59 = vmul.f32 %v4964_v20, %v494_v52  ;;  %v488_v60 = vpop.xlane.xlu1 %487  ;;  %v615_v62 = vmul.f32 %v579_v53, %v4964_v20  ;;  %v822_v32 = vmul.f32 %v5122_v15, %v802_v14 }
 0x11a   : > { %v523_v3 = vmul.f32 %v4964_v20, %v488_v60  ;;  %v676_v37 = vsub.f32 1.5, %v675_v16 }
 0x11b   : > { %v656_v5 = vsub.f32 1.5, %v655_v55  ;;  %v5096_v7 = vsub.f32 %v5013_v56, %v525_v59  ;;  %v5098_v8 = vadd.f32 1e-05, %v615_v62 }
 0x11c   : > { %v5100_v9 = vpop.eup %4473  ;;  %v5110_v11 = vsub.f32 %v5016_v57, %v523_v3  ;;  %v677_v21 = vmul.f32 %v5069_v39, %v676_v37 }
 0x11d   : > { %v657_v13 = vmul.f32 %v4472_v41, %v656_v5  ;;  %v663_v56 = vmul.f32 %v5100_v9, %v5075_v44  ;;  %4477 = vrsqrt.f32 %v5098_v8  ;;  %v557_v57 = vmul.f32 %v5096_v7, %v5096_v7  ;;  %v5146_v34 = vpop.eup %4475 }
 0x11e   : > { %v555_v19 = vmul.f32 %v5110_v11, %v5110_v11  ;;  %vm669_vm9 = vweird.f32 %v5100_v9  ;;  %v683_v54 = vmul.f32 %v5146_v34, %v5082_v47  ;;  %v681_v5 = vsel %vm5176_vm13, %v5069_v39, %v677_v21 }
 0x11f   : > { %v661_v17 = vsel %vm5104_vm7, %v4472_v41, %v657_v13  ;;  %v664_v18 = vmul.f32 %v5100_v9, %v663_v56  ;;  %v595_v24 = vsel %vm458_vm0, %v557_v57, 0.0  ;;  %vm5163_vm12 = vmor %vm668_vm8, %vm669_vm9  ;;  %v805_v16 = vmul.f32 %v681_v5, %v4979_v35 }
 0x120   : > { %v497_v23 = vpop.xlane.xlu2 %496  ;;  %v5135_v26 = vpop.xlane.xlu0 %581  ;;  %v803_v27 = vmul.f32 %v661_v17, %v4981_v36  ;;  %596 = vadd.xlane.f32.xlu0 %v595_v24  ;;  %v589_v30 = vsel %vm458_vm0, %v555_v19, 0.0  ;;  %505 = vadd.xlane.f32.xlu1 %v504_v25  ;;  %v684_v10 = vmul.f32 %v5146_v34, %v683_v54  ;;  %vm698_vm14 = vweird.f32 %v5098_v8 }
 0x121   : > { %v665_v28 = vmul.f32 0.5, %v664_v18  ;;  %v526_v29 = vmul.f32 %v4964_v20, %v497_v23  ;;  %v491_v31 = vpop.xlane.xlu1 %490  ;;  %590 = vadd.xlane.f32.xlu2 %v589_v30  ;;  %vm689_vm2 = vweird.f32 %v5146_v34 }
 0x122   : > { %v524_v36 = vmul.f32 %v4964_v20, %v491_v31  ;;  %v823_v41 = vmul.f32 %v5122_v15, %v803_v27  ;;  %v685_v57 = vmul.f32 0.5, %v684_v10  ;;  %vm690_vm4 = vmor %vm688_vm1, %vm689_vm2 }
 0x123   : > { %v4478_v43 = vpop.eup %4477  ;;  %v666_v45 = vsub.f32 1.5, %v665_v28  ;;  %v5152_v46 = vsub.f32 %v5028_v63, %v526_v29  ;;  %v842_v63 = vadd.f32 %v5144_v33, %v822_v32 }
 0x124   : > { %v693_v48 = vmul.f32 %v4478_v43, %v5098_v8  ;;  %v5158_v50 = vsub.f32 %v5031_v0, %v524_v36  ;;  %v843_v53 = vadd.f32 %v5144_v33, %v823_v41  ;;  %v686_v23 = vsub.f32 1.5, %v685_v57 }
 0x125   : > { %v667_v51 = vmul.f32 %v5100_v9, %v666_v45  ;;  %v558_v55 = vmul.f32 %v5152_v46, %v5152_v46  ;;  %vm699_vm15 = vweird.f32 %v4478_v43 }
 0x126   : > { %v556_v0 = vmul.f32 %v5158_v50, %v5158_v50  ;;  %v858_v59 = vpack.c.bf16 %v843_v53, %v842_v63  ;;  %v694_v61 = vmul.f32 %v4478_v43, %v693_v48  ;;  %vm700_vm3 = vmor %vm698_vm14, %vm699_vm15  ;;  %v687_v8 = vmul.f32 %v5146_v34, %v686_v23 }
 0x127   : > { %v671_v60 = vsel %vm5163_vm12, %v5100_v9, %v667_v51  ;;  %v598_v1 = vsel %vm458_vm0, %v558_v55, 0.0 }
 0x128   : > { %v592_v62 = vsel %vm458_vm0, %v556_v0, 0.0  ;;  %v500_v2 = vpop.xlane.xlu0 %499  ;;  %4165 = vmatmul.msk.bf16.vlgmr.msra.gmra.mxu0 %vm458_vm0, %v858_v59  ;;  %599 = vadd.xlane.f32.xlu1 %v598_v1  ;;  %v804_v13 = vmul.f32 %v671_v60, %v4991_v42  ;;  %v695_v56 = vmul.f32 0.5, %v694_v61  ;;  %v691_v47 = vsel %vm690_vm4, %v5146_v34, %v687_v8 }
 0x129   : > { %v527_v3 = vmul.f32 %v4964_v20, %v500_v2  ;;  %593 = vadd.xlane.f32.xlu2 %v592_v62  ;;  %v806_v32 = vmul.f32 %v691_v47, %v4983_v38 }
 0x12a   : > { %v824_v39 = vmul.f32 %v5122_v15, %v804_v13  ;;  %v696_v18 = vsub.f32 1.5, %v695_v56 }
 0x12b   : > { %v5192_v9 = vsub.f32 %v5039_v4, %v527_v3  ;;  %v825_v4 = vmul.f32 %v5122_v15, %v805_v16  ;;  %v826_v36 = vmul.f32 %v5122_v15, %v806_v32 }
 0x12c   : > { %v844_v35 = vadd.f32 %v5144_v33, %v824_v39  ;;  %v697_v24 = vmul.f32 %v4478_v43, %v696_v18 }
 0x12d   : > { %v559_v14 = vmul.f32 %v5192_v9, %v5192_v9  ;;  %v845_v27 = vadd.f32 %v5144_v33, %v825_v4  ;;  %v846_v45 = vadd.f32 %v5144_v33, %v826_v36 }
 0x12e   : > { %v701_v30 = vsel %vm700_vm3, %v4478_v43, %v697_v24  ;;  %v616_v43 = vmul.f32 %v5135_v26, %v4964_v20 }
 0x12f   : > { %v601_v17 = vsel %vm458_vm0, %v559_v14, 0.0  ;;  %v859_v29 = vpack.c.bf16 %v845_v27, %v844_v35  ;;  %v807_v31 = vmul.f32 %v701_v30, %v5003_v49 }
 0x130   : > { %v503_v19 = vpop.xlane.xlu0 %502  ;;  %v632_v51 = vadd.f32 1e-05, %v616_v43 }
 0x131   : > { %v528_v25 = vmul.f32 %v4964_v20, %v503_v19  ;;  %602 = vadd.xlane.f32.xlu2 %v601_v17  ;;  %v827_v37 = vmul.f32 %v5122_v15, %v807_v31 }
 0x132   : > { %4479 = vrsqrt.f32 %v632_v51  ;;  %vm708_vm5 = vweird.f32 %v632_v51 }
 0x133   : > { %v5204_v42 = vsub.f32 %v5044_v6, %v528_v25  ;;  %v847_v41 = vadd.f32 %v5144_v33, %v827_v37 }
 0x135   : > { %v560_v28 = vmul.f32 %v5204_v42, %v5204_v42  ;;  %v860_v48 = vpack.c.bf16 %v847_v41, %v846_v45 }
 0x137   : > { %v604_v6 = vsel %vm458_vm0, %v560_v28, 0.0 }
 0x138   : > { %605 = vadd.xlane.f32.xlu0 %v604_v6  ;;  %4166 = vmatmul.msk.bf16.gmra.mxu0 %vm458_vm0, %v859_v29  ;;  %v4480_v34 = vpop.eup %4479 }
 0x139   : > { %v703_v49 = vmul.f32 %v4480_v34, %v632_v51  ;;  %vm709_vm6 = vweird.f32 %v4480_v34 }
 0x13a   : > { %vm5227_vm7 = vmor %vm708_vm5, %vm709_vm6 }
 0x13b   : > { %v704_v38 = vmul.f32 %v4480_v34, %v703_v49 }
 0x13d   : > { %v705_v21 = vmul.f32 0.5, %v704_v38 }
 0x13f   : > { %v706_v54 = vsub.f32 1.5, %v705_v21 }
 0x141   : > { %v707_v26 = vmul.f32 %v4480_v34, %v706_v54 }
 0x143   : > { %v711_v2 = vsel %vm5227_vm7, %v4480_v34, %v707_v26 }
 0x144   : > { %v808_v39 = vmul.f32 %v711_v2, %v5018_v58 }
 0x146   : > { %v828_v28 = vmul.f32 %v5122_v15, %v808_v39 }
 0x148   : > { %4167 = vmatmul.msk.bf16.gmra.mxu0 %vm458_vm0, %v860_v48  ;;  %v848_v32 = vadd.f32 %v5144_v33, %v828_v28 }
 0x183   : > { %v585_v52 = vpop.xlane.xlu1 %584 }
 0x184   : > { %v617_v63 = vmul.f32 %v585_v52, %v4964_v20 }
 0x186   : > { %v633_v53 = vadd.f32 1e-05, %v617_v63 }
 0x188   : > { %4481 = vrsqrt.f32 %v633_v53  ;;  %vm718_vm9 = vweird.f32 %v633_v53 }
 0x18b   : > { %v588_v0 = vpop.xlane.xlu1 %587 }
 0x18c   : > { %v618_v44 = vmul.f32 %v588_v0, %v4964_v20 }
 0x18e   : > { %v4482_v55 = vpop.eup %4481  ;;  %v634_v60 = vadd.f32 1e-05, %v618_v44 }
 0x18f   : > { %v713_v59 = vmul.f32 %v4482_v55, %v633_v53  ;;  %vm719_vm8 = vweird.f32 %v4482_v55 }
 0x190   : > { %4483 = vrsqrt.f32 %v634_v60  ;;  %vm720_vm10 = vmor %vm718_vm9, %vm719_vm8  ;;  %vm728_vm12 = vweird.f32 %v634_v60 }
 0x191   : > { %v714_v62 = vmul.f32 %v4482_v55, %v713_v59 }
 0x193   : > { %v715_v1 = vmul.f32 0.5, %v714_v62  ;;  %v597_v3 = vpop.xlane.xlu0 %596  ;;  %v506_v13 = vpop.xlane.xlu1 %505 }
 0x194   : > { %v591_v10 = vpop.xlane.xlu2 %590  ;;  %v621_v56 = vmul.f32 %v597_v3, %v4964_v20  ;;  %v529_v16 = vmul.f32 %v4964_v20, %v506_v13 }
 0x195   : > { %v716_v5 = vsub.f32 1.5, %v715_v1  ;;  %v619_v14 = vmul.f32 %v591_v10, %v4964_v20 }
 0x196   : > { %v5236_v17 = vadd.f32 1e-05, %v621_v56  ;;  %v4484_v18 = vpop.eup %4483  ;;  %v5240_v25 = vsub.f32 %v5113_v12, %v529_v16 }
 0x197   : > { %v717_v57 = vmul.f32 %v4482_v55, %v716_v5  ;;  %v635_v19 = vadd.f32 1e-05, %v619_v14  ;;  %v723_v23 = vmul.f32 %v4484_v18, %v634_v60  ;;  %vm729_vm11 = vweird.f32 %v4484_v18 }
 0x198   : > { %4485 = vrsqrt.f32 %v5236_v17  ;;  %v561_v35 = vmul.f32 %v5240_v25, %v5240_v25  ;;  %vm730_vm13 = vmor %vm728_vm12, %vm729_vm11  ;;  %vm758_vm4 = vweird.f32 %v5236_v17 }
 0x199   : > { %v721_v4 = vsel %vm720_vm10, %v4482_v55, %v717_v57  ;;  %4487 = vrsqrt.f32 %v635_v19  ;;  %v724_v24 = vmul.f32 %v4484_v18, %v723_v23  ;;  %vm738_vm14 = vweird.f32 %v635_v19 }
 0x19a   : > { %v809_v27 = vmul.f32 %v721_v4, %v5061_v22  ;;  %v607_v58 = vsel %vm458_vm0, %v561_v35, 0.0 }
 0x19b   : > { %v725_v8 = vmul.f32 0.5, %v724_v24  ;;  %608 = vadd.xlane.f32.xlu1 %v607_v58  ;;  %v600_v12 = vpop.xlane.xlu1 %599 }
 0x19c   : > { %v594_v29 = vpop.xlane.xlu2 %593  ;;  %v829_v6 = vmul.f32 %v5122_v15, %v809_v27  ;;  %v622_v41 = vmul.f32 %v600_v12, %v4964_v20 }
 0x19d   : > { %v620_v30 = vmul.f32 %v594_v29, %v4964_v20  ;;  %v726_v31 = vsub.f32 1.5, %v725_v8 }
 0x19e   : > { %v5250_v47 = vpop.eup %4485  ;;  %v849_v37 = vadd.f32 %v5144_v33, %v829_v6  ;;  %v638_v49 = vadd.f32 1e-05, %v622_v41 }
 0x19f   : > { %v4488_v22 = vpop.eup %4487  ;;  %v636_v36 = vadd.f32 1e-05, %v620_v30  ;;  %v727_v45 = vmul.f32 %v4484_v18, %v726_v31  ;;  %v753_v43 = vmul.f32 %v5250_v47, %v5236_v17  ;;  %vm759_vm5 = vweird.f32 %v5250_v47 }
 0x1a0   : > { %v733_v48 = vmul.f32 %v4488_v22, %v635_v19  ;;  %v861_v51 = vpack.c.bf16 %v849_v37, %v848_v32  ;;  %vm739_vm15 = vweird.f32 %v4488_v22  ;;  %vm760_vm7 = vmor %vm758_vm4, %vm759_vm5  ;;  %vm768_vm10 = vweird.f32 %v638_v49 }
 0x1a1   : > { %4489 = vrsqrt.f32 %v636_v36  ;;  %v731_v52 = vsel %vm730_vm13, %v4484_v18, %v727_v45  ;;  %v754_v63 = vmul.f32 %v5250_v47, %v753_v43  ;;  %vm740_vm1 = vmor %vm738_vm14, %vm739_vm15  ;;  %vm748_vm2 = vweird.f32 %v636_v36 }
 0x1a2   : > { %v734_v34 = vmul.f32 %v4488_v22, %v733_v48  ;;  %4168 = vmatmul.msk.bf16.gmra.mxu0 %vm458_vm0, %v861_v51  ;;  %4491 = vrsqrt.f32 %v638_v49  ;;  %v810_v44 = vmul.f32 %v731_v52, %v5072_v40  ;;  %vm995_vm5 = vcmask 64512  }
 0x1a3   : > { %v755_v26 = vmul.f32 0.5, %v754_v63 }
 0x1a4   : > { %v735_v38 = vmul.f32 0.5, %v734_v34  ;;  %v603_v53 = vpop.xlane.xlu2 %602  ;;  %v830_v2 = vmul.f32 %v5122_v15, %v810_v44 }
 0x1a5   : > { %v623_v21 = vmul.f32 %v603_v53, %v4964_v20  ;;  %v756_v3 = vsub.f32 1.5, %v755_v26  ;;  %v5285_v34 = vpop.f32.mrf.mxu0 }
 0x1a6   : > { %v736_v54 = vsub.f32 1.5, %v735_v38  ;;  %v850_v14 = vadd.f32 %v5144_v33, %v830_v2 }
 0x1a7   : > { %v4490_v0 = vpop.eup %4489  ;;  %v639_v55 = vadd.f32 1e-05, %v623_v21  ;;  %v757_v16 = vmul.f32 %v5250_v47, %v756_v3 }
 0x1a8   : > { %v737_v59 = vmul.f32 %v4488_v22, %v736_v54  ;;  %v743_v60 = vmul.f32 %v4490_v0, %v636_v36  ;;  %vm749_vm3 = vweird.f32 %v4490_v0  ;;  %v4492_v10 = vpop.eup %4491 }
 0x1a9   : > { %4493 = vrsqrt.f32 %v639_v55  ;;  %vm750_vm6 = vmor %vm748_vm2, %vm749_vm3  ;;  %v763_v39 = vmul.f32 %v4492_v10, %v638_v49  ;;  %v761_v17 = vsel %vm760_vm7, %v5250_v47, %v757_v16  ;;  %vm778_vm8 = vweird.f32 %v639_v55  ;;  %v5299_v16 = vld [vmem:[%s7505_s4] ss:$0 sm:$0xff] }
 0x1aa   : > { %v741_v61 = vsel %vm740_vm1, %v4488_v22, %v737_v59  ;;  %v744_v62 = vmul.f32 %v4490_v0, %v743_v60  ;;  %v813_v28 = vmul.f32 %v761_v17, %v5096_v7  ;;  %vm769_vm11 = vweird.f32 %v4492_v10 }
 0x1ab   : > { %v811_v1 = vmul.f32 %v741_v61, %v5110_v11  ;;  %v764_v35 = vmul.f32 %v4492_v10, %v763_v39  ;;  %vm770_vm13 = vmor %vm768_vm10, %vm769_vm11  ;;  %v606_v52 = vpop.xlane.xlu0 %605  ;;  %vm2588_vm7 = vcmask 130048  }
 0x1ac   : > { %v745_v5 = vmul.f32 0.5, %v744_v62  ;;  %v833_v12 = vmul.f32 %v5122_v15, %v813_v28 }
 0x1ad   : > { %v831_v13 = vmul.f32 %v5122_v15, %v811_v1  ;;  %v765_v58 = vmul.f32 0.5, %v764_v35  ;;  %v5287_v49 = vpop.f32.mrf.mxu0 }
 0x1ae   : > { %v746_v40 = vsub.f32 1.5, %v745_v5 }
 0x1af   : > { %v4494_v56 = vpop.eup %4493  ;;  %v851_v11 = vadd.f32 %v5144_v33, %v831_v13  ;;  %v766_v6 = vsub.f32 1.5, %v765_v58 }
 0x1b0   : > { %v747_v57 = vmul.f32 %v4490_v0, %v746_v40  ;;  %v773_v18 = vmul.f32 %v4494_v56, %v639_v55  ;;  %vm779_vm9 = vweird.f32 %v4494_v56 }
 0x1b1   : > { %v862_v19 = vpack.c.bf16 %v851_v11, %v850_v14  ;;  %vm780_vm12 = vmor %vm778_vm8, %vm779_vm9  ;;  %v767_v31 = vmul.f32 %v4492_v10, %v766_v6  ;;  %vm2605_vm8 = vcmask 195584  }
 0x1b2   : > { %v751_v4 = vsel %vm750_vm6, %v4490_v0, %v747_v57  ;;  %v774_v23 = vmul.f32 %v4494_v56, %v773_v18 }
 0x1b3   : > { %4169 = vmatmul.msk.bf16.gmra.mxu0 %vm458_vm0, %v862_v19  ;;  %v812_v24 = vmul.f32 %v751_v4, %v5158_v50  ;;  %v853_v50 = vadd.f32 %v5144_v33, %v833_v12  ;;  %v771_v37 = vsel %vm770_vm13, %v4492_v10, %v767_v31 }
 0x1b4   : > { %v775_v27 = vmul.f32 0.5, %v774_v23  ;;  %v814_v36 = vmul.f32 %v771_v37, %v5152_v46 }
 0x1b5   : > { %v832_v8 = vmul.f32 %v5122_v15, %v812_v24  ;;  %v924_v38 = vpop.f32.mrf.mxu0 }
 0x1b6   : > { %v776_v29 = vsub.f32 1.5, %v775_v27  ;;  %v834_v45 = vmul.f32 %v5122_v15, %v814_v36  ;;  %v922_v36 = vadd.f32 %v5299_v16, %v5287_v49 }
 0x1b7   : > { %v852_v30 = vadd.f32 %v5144_v33, %v832_v8 }
 0x1b8   : > { %v777_v47 = vmul.f32 %v4494_v56, %v776_v29  ;;  %v854_v43 = vadd.f32 %v5144_v33, %v834_v45 }
 0x1b9   : > { %v863_v7 = vpack.c.bf16 %v853_v50, %v852_v30  ;;  %v925_v50 = vadd.f32 %v5299_v16, %v924_v38 }
 0x1ba   : > { %v781_v32 = vsel %vm780_vm12, %v4494_v56, %v777_v47 }
 0x1bb   : > { %v815_v22 = vmul.f32 %v781_v32, %v5192_v9  ;;  %v624_v9 = vmul.f32 %v606_v52, %v4964_v20 }
 0x1bd   : > { %v835_v41 = vmul.f32 %v5122_v15, %v815_v22  ;;  %v640_v46 = vadd.f32 1e-05, %v624_v9  ;;  %v926_v63 = vpop.f32.mrf.mxu0 }
 0x1be   : > { %v927_v30 = vadd.f32 %v5299_v16, %v926_v63 }
 0x1bf   : > { %v855_v48 = vadd.f32 %v5144_v33, %v835_v41  ;;  %4495 = vrsqrt.f32 %v640_v46  ;;  %vm788_vm14 = vweird.f32 %v640_v46  ;;  %v920_v41 = vadd.f32 %v5299_v16, %v5285_v34 }
 0x1c0   : > { %v5327_v31 = vpack.c.bf16 %v927_v30, %v925_v50 }
 0x1c1   : > { %v864_v51 = vpack.c.bf16 %v855_v48, %v854_v43  ;;  %v5343_v45 = vpack.c.bf16 %v922_v36, %v920_v41 }
 0x1c3   : > { %4170 = vmatmul.msk.bf16.gmra.mxu0 %vm458_vm0, %v863_v7  ;;  %7530 = vst [vmem:[#allocation3_spill] sm:$0xff] %v5343_v45 }
 0x1c5   : > { %v4496_v53 = vpop.eup %4495  ;;  %v5290_v54 = vpop.f32.mrf.mxu0 }
 0x1c6   : > { %v783_v21 = vmul.f32 %v4496_v53, %v640_v46  ;;  %vm789_vm15 = vweird.f32 %v4496_v53  ;;  %v930_v43 = vadd.f32 %v5299_v16, %v5290_v54 }
 0x1c7   : > { %vm790_vm1 = vmor %vm788_vm14, %vm789_vm15 }
 0x1c8   : > { %v784_v0 = vmul.f32 %v4496_v53, %v783_v21 }
 0x1ca   : > { %v785_v26 = vmul.f32 0.5, %v784_v0 }
 0x1cc   : > { %v786_v60 = vsub.f32 1.5, %v785_v26 }
 0x1cd   : > { %v5293_v61 = vpop.f32.mrf.mxu0 }
 0x1ce   : > { %v787_v1 = vmul.f32 %v4496_v53, %v786_v60  ;;  %v932_v48 = vadd.f32 %v5299_v16, %v5293_v61 }
 0x1d0   : > { %v791_v5 = vsel %vm790_vm1, %v4496_v53, %v787_v1 }
 0x1d1   : > { %v816_v56 = vmul.f32 %v791_v5, %v5204_v42 }
 0x1d3   : > { %4171 = vmatmul.msk.bf16.gmra.mxu0 %vm458_vm0, %v864_v51  ;;  %v836_v39 = vmul.f32 %v5122_v15, %v816_v56  ;;  %v5361_v51 = vpack.c.bf16 %v932_v48, %v930_v43 }
 0x1d5   : > { %v856_v17 = vadd.f32 %v5144_v33, %v836_v39 }
 0x20e   : > { %v609_v55 = vpop.xlane.xlu1 %608 }
 0x20f   : > { %v625_v44 = vmul.f32 %v609_v55, %v4964_v20 }
 0x211   : > { %v641_v59 = vadd.f32 1e-05, %v625_v44 }
 0x213   : > { %4497 = vrsqrt.f32 %v641_v59  ;;  %vm798_vm3 = vweird.f32 %v641_v59 }
 0x219   : > { %v4498_v62 = vpop.eup %4497 }
 0x21a   : > { %v793_v2 = vmul.f32 %v4498_v62, %v641_v59  ;;  %vm799_vm2 = vweird.f32 %v4498_v62 }
 0x21b   : > { %vm800_vm4 = vmor %vm798_vm3, %vm799_vm2 }
 0x21c   : > { %v794_v3 = vmul.f32 %v4498_v62, %v793_v2 }
 0x21e   : > { %v795_v10 = vmul.f32 0.5, %v794_v3 }
 0x21f   : > { %v934_v13 = vpop.f32.mrf.mxu0 }
 0x220   : > { %v796_v40 = vsub.f32 1.5, %v795_v10  ;;  %v935_v19 = vadd.f32 %v5299_v16, %v934_v13 }
 0x222   : > { %v797_v14 = vmul.f32 %v4498_v62, %v796_v40 }
 0x224   : > { %v801_v11 = vsel %vm800_vm4, %v4498_v62, %v797_v14 }
 0x225   : > { %v817_v57 = vmul.f32 %v801_v11, %v5240_v25 }
 0x227   : > { %v936_v18 = vpop.f32.mrf.mxu0  ;;  %v837_v42 = vmul.f32 %v5122_v15, %v817_v57 }
 0x228   : > { %v937_v4 = vadd.f32 %v5299_v16, %v936_v18 }
 0x229   : > { %v857_v35 = vadd.f32 %v5144_v33, %v837_v42 }
 0x22a   : > { %v5306_v23 = vpack.c.bf16 %v937_v4, %v935_v19 }
 0x22b   : > { %v865_v25 = vpack.c.bf16 %v857_v35, %v856_v17 }
 0x22c   : > { %985 = vrot.lane.b32.xlu0 %v5306_v23, %s4847_s24 }
 0x22d   : > { %4172 = vmatmul.msk.bf16.gmra.mxu0 %vm458_vm0, %v865_v25 }
 0x230   : > { %v939_v24 = vpop.f32.mrf.mxu0 }
 0x231   : > { %v940_v28 = vadd.f32 %v5299_v16, %v939_v24 }
 0x238   : > { %v941_v27 = vpop.f32.mrf.mxu0 }
 0x239   : > { %v942_v58 = vadd.f32 %v5299_v16, %v941_v27 }
 0x23b   : > { %v5315_v15 = vpack.c.bf16 %v942_v58, %v940_v28 }
 0x23d   : > { %987 = vrot.lane.b32.xlu2 %v5315_v15, %s4847_s24 }
 0x240   : > { %v944_v8 = vpop.f32.mrf.mxu0 }
 0x241   : > { %v945_v29 = vadd.f32 %v5299_v16, %v944_v8 }
 0x248   : > { %v946_v33 = vpop.f32.mrf.mxu0 }
 0x249   : > { %v947_v12 = vadd.f32 %v5299_v16, %v946_v33 }
 0x24b   : > { %v5321_v6 = vpack.c.bf16 %v947_v12, %v945_v29 }
 0x24d   : > { %989 = vrot.lane.b32.xlu1 %v5321_v6, %s4847_s24 }
 0x250   : > { %v949_v47 = vpop.f32.mrf.mxu0 }
 0x251   : > { %v950_v32 = vadd.f32 %v5299_v16, %v949_v47 }
 0x255   : > { %981 = vrot.lane.b32.xlu1 %v5327_v31, %s4847_s24 }
 0x258   : > { %v951_v7 = vpop.f32.mrf.mxu0 }
 0x259   : > { %v952_v37 = vadd.f32 %v5299_v16, %v951_v7 }
 0x25b   : > { %v5333_v22 = vpack.c.bf16 %v952_v37, %v950_v32 }
 0x25d   : > { %991 = vrot.lane.b32.xlu0 %v5333_v22, %s4847_s24  ;;  %1346 = vrot.lane.b32.xlu1 %v5333_v22, %s4848_s28 }
 0x265   : > { %979 = vrot.lane.b32.xlu0 %v5343_v45, %s4847_s24  ;;  %1239 = vrot.lane.b32.xlu1 %v5321_v6, %s4849_s29 }
 0x26d   : > { %1344 = vrot.lane.b32.xlu0 %v5321_v6, %s4848_s28  ;;  %1235 = vrot.lane.b32.xlu1 %v5306_v23, %s4849_s29 }
 0x275   : > { %1340 = vrot.lane.b32.xlu0 %v5306_v23, %s4848_s28  ;;  %1700 = vrot.lane.b32.xlu1 %v5333_v22, %s4850_s14 }
 0x27d   : > { %1338 = vrot.lane.b32.xlu0 %v5361_v51, %s4848_s28  ;;  %2054 = vrot.lane.b32.xlu1 %v5333_v22, %s4851_s15 }
 0x285   : > { %1336 = vrot.lane.b32.xlu0 %v5327_v31, %s4848_s28  ;;  %1698 = vrot.lane.b32.xlu1 %v5321_v6, %s4850_s14 }
 0x28d   : > { %1233 = vrot.lane.b32.xlu0 %v5361_v51, %s4849_s29  ;;  %2052 = vrot.lane.b32.xlu1 %v5321_v6, %s4851_s15 }
 0x295   : > { %1231 = vrot.lane.b32.xlu0 %v5327_v31, %s4849_s29  ;;  %1330 = vrot.lane.b32.xlu1 %v5333_v22, %s4852_s16 }
 0x297   : > { %v988_v40 = vpop.permute.xlu2 %987 }
 0x298   : > { %v1033_v28 = vsel %vm995_vm5, %v988_v40, 0 }
 0x29d   : > { %1334 = vrot.lane.b32.xlu0 %v5343_v45, %s4848_s28  ;;  %2046 = vrot.lane.b32.xlu1 %v5361_v51, %s4851_s15 }
 0x29e   : > { %v5413_v63 = vpop.permute.xlu0 %985 }
 0x29f   : > { %v1030_v29 = vsel %vm995_vm5, %v5413_v63, 0 }
 0x2a5   : > { %1229 = vrot.lane.b32.xlu0 %v5343_v45, %s4849_s29  ;;  %1690 = vrot.lane.b32.xlu1 %v5327_v31, %s4850_s14 }
 0x2aa   : > { %v954_v34 = vpop.f32.mrf.mxu0 }
 0x2ab   : > { %v955_v52 = vadd.f32 %v5299_v16, %v954_v34 }
 0x2ad   : > { %1318 = vrot.lane.b32.xlu0 %v5343_v45, %s4852_s16  ;;  %2044 = vrot.lane.b32.xlu1 %v5327_v31, %s4851_s15 }
 0x2b2   : > { %v956_v49 = vpop.f32.mrf.mxu0 }
 0x2b3   : > { %v957_v38 = vadd.f32 %v5299_v16, %v956_v49 }
 0x2b5   : > { %1320 = vrot.lane.b32.xlu0 %v5327_v31, %s4852_s16  ;;  %2042 = vrot.lane.b32.xlu1 %v5343_v45, %s4851_s15  ;;  %v5397_v9 = vpack.c.bf16 %v957_v38, %v955_v52 }
 0x2b7   : > { %993 = vrot.lane.b32.xlu2 %v5397_v9, %s4847_s24 }
 0x2bd   : > { %1322 = vrot.lane.b32.xlu0 %v5361_v51, %s4852_s16  ;;  %1674 = vrot.lane.b32.xlu1 %v5327_v31, %s4853_s17 }
 0x2bf   : > { %v5405_v46 = vpop.permute.xlu1 %989  ;;  %983 = vrot.lane.b32.xlu2 %v5361_v51, %s4847_s24 }
 0x2c0   : > { %v1036_v35 = vsel %vm995_vm5, %v5405_v46, 0 }
 0x2c5   : > { %1324 = vrot.lane.b32.xlu0 %v5306_v23, %s4852_s16  ;;  %1676 = vrot.lane.b32.xlu1 %v5361_v51, %s4853_s17 }
 0x2c7   : > { %v5415_v53 = vpop.permute.xlu1 %981  ;;  %1342 = vrot.lane.b32.xlu2 %v5315_v15, %s4848_s28 }
 0x2c8   : > { %v1024_v36 = vsel %vm995_vm5, %v5415_v53, 0 }
 0x2cd   : > { %1328 = vrot.lane.b32.xlu0 %v5321_v6, %s4852_s16  ;;  %1678 = vrot.lane.b32.xlu1 %v5306_v23, %s4853_s17 }
 0x2cf   : > { %v5423_v21 = vpop.permute.xlu1 %1346  ;;  %v992_v54 = vpop.permute.xlu0 %991  ;;  %1241 = vrot.lane.b32.xlu2 %v5333_v22, %s4849_s29 }
 0x2d0   : > { %v1039_v19 = vsel %vm995_vm5, %v992_v54, 0 }
 0x2d5   : > { %1692 = vrot.lane.b32.xlu0 %v5361_v51, %s4850_s14  ;;  %1589 = vrot.lane.b32.xlu1 %v5306_v23, %s4854_s18 }
 0x2d7   : > { %v5431_v0 = vpop.permute.xlu1 %1239  ;;  %v5433_v55 = vpop.permute.xlu0 %979  ;;  %1237 = vrot.lane.b32.xlu2 %v5315_v15, %s4849_s29 }
 0x2d8   : > { %v1021_v34 = vsel %vm995_vm5, %v5433_v55, 0 }
 0x2dd   : > { %1688 = vrot.lane.b32.xlu0 %v5343_v45, %s4850_s14  ;;  %1587 = vrot.lane.b32.xlu1 %v5361_v51, %s4854_s18 }
 0x2df   : > { %v5441_v44 = vpop.permute.xlu1 %1235  ;;  %v5443_v59 = vpop.permute.xlu0 %1344  ;;  %1326 = vrot.lane.b32.xlu2 %v5315_v15, %s4852_s16 }
 0x2e5   : > { %1672 = vrot.lane.b32.xlu0 %v5343_v45, %s4853_s17  ;;  %1585 = vrot.lane.b32.xlu1 %v5327_v31, %s4854_s18 }
 0x2e7   : > { %v5451_v26 = vpop.permute.xlu1 %1700  ;;  %v5453_v60 = vpop.permute.xlu0 %1340  ;;  %1696 = vrot.lane.b32.xlu2 %v5315_v15, %s4850_s14 }
 0x2ed   : > { %2028 = vrot.lane.b32.xlu0 %v5327_v31, %s4855_s19  ;;  %1680 = vrot.lane.b32.xlu1 %v5315_v15, %s4853_s17 }
 0x2ef   : > { %v5461_v61 = vpop.permute.xlu1 %2054  ;;  %v5463_v62 = vpop.permute.xlu0 %1338  ;;  %2050 = vrot.lane.b32.xlu2 %v5315_v15, %s4851_s15 }
 0x2f5   : > { %2030 = vrot.lane.b32.xlu0 %v5361_v51, %s4855_s19  ;;  %1583 = vrot.lane.b32.xlu1 %v5343_v45, %s4854_s18 }
 0x2f7   : > { %v5471_v1 = vpop.permute.xlu1 %1698  ;;  %v5473_v2 = vpop.permute.xlu0 %1336  ;;  %1694 = vrot.lane.b32.xlu2 %v5306_v23, %s4850_s14 }
 0x2fd   : > { %1595 = vrot.lane.b32.xlu0 %v5333_v22, %s4854_s18  ;;  %2034 = vrot.lane.b32.xlu1 %v5315_v15, %s4855_s19 }
 0x2ff   : > { %v5481_v3 = vpop.permute.xlu1 %2052  ;;  %v5483_v5 = vpop.permute.xlu0 %1233  ;;  %2048 = vrot.lane.b32.xlu2 %v5306_v23, %s4851_s15 }
 0x305   : > { %1591 = vrot.lane.b32.xlu0 %v5315_v15, %s4854_s18  ;;  %1682 = vrot.lane.b32.xlu1 %v5321_v6, %s4853_s17 }
 0x307   : > { %v5491_v10 = vpop.permute.xlu1 %1330  ;;  %v5493_v13 = vpop.permute.xlu0 %1231  ;;  %2026 = vrot.lane.b32.xlu2 %v5343_v45, %s4855_s19 }
 0x30d   : > { %2036 = vrot.lane.b32.xlu0 %v5321_v6, %s4855_s19  ;;  %1949 = vrot.lane.b32.xlu1 %v5333_v22, %s4856_s20 }
 0x30f   : > { %v5501_v56 = vpop.permute.xlu1 %2046  ;;  %v5503_v14 = vpop.permute.xlu0 %1334  ;;  %1593 = vrot.lane.b32.xlu2 %v5321_v6, %s4854_s18 }
 0x311   : > { %v994_v11 = vpop.permute.xlu2 %993 }
 0x312   : > { %v1042_v16 = vsel %vm995_vm5, %v994_v11, 0 }
 0x313   : > { %1044 = vmatpush.bf16.xpose.msra.mxu1 %v1042_v16 }
 0x315   : > { %2038 = vrot.lane.b32.xlu0 %v5333_v22, %s4855_s19  ;;  %1947 = vrot.lane.b32.xlu1 %v5321_v6, %s4856_s20 }
 0x317   : > { %v5512_v57 = vpop.permute.xlu1 %1690  ;;  %v5514_v39 = vpop.permute.xlu0 %1229  ;;  %2032 = vrot.lane.b32.xlu2 %v5306_v23, %s4855_s19 }
 0x319   : > { %v984_v18 = vpop.permute.xlu2 %983 }
 0x31a   : > { %v1027_v50 = vsel %vm995_vm5, %v984_v18, 0 }
 0x31b   : > { %1045 = vmatpush.bf16.xpose.msra.mxu1 %v1039_v19 }
 0x31d   : > { %2303 = vrot.lane.b32.xlu0 %v5333_v22, %s4857_s21  ;;  %2301 = vrot.lane.b32.xlu1 %v5321_v6, %s4857_s21 }
 0x31f   : > { %v5523_v4 = vpop.permute.xlu1 %2044  ;;  %v5525_v42 = vpop.permute.xlu0 %1318  ;;  %1684 = vrot.lane.b32.xlu2 %v5333_v22, %s4853_s17 }
 0x321   : > { %v5529_v17 = vpop.permute.xlu2 %1342 }
 0x323   : > { %1046 = vmatpush.bf16.xpose.msra.mxu1 %v1036_v35 }
 0x325   : > { %1945 = vrot.lane.b32.xlu0 %v5315_v15, %s4856_s20  ;;  %2299 = vrot.lane.b32.xlu1 %v5315_v15, %s4857_s21 }
 0x327   : > { %v5537_v25 = vpop.permute.xlu1 %2042  ;;  %v5539_v24 = vpop.permute.xlu0 %1320  ;;  %1941 = vrot.lane.b32.xlu2 %v5361_v51, %s4856_s20 }
 0x329   : > { %v5543_v27 = vpop.permute.xlu2 %1241 }
 0x32b   : > { %1047 = vmatpush.bf16.xpose.msra.mxu1 %v1033_v28 }
 0x32d   : > { %1943 = vrot.lane.b32.xlu0 %v5306_v23, %s4856_s20  ;;  %1939 = vrot.lane.b32.xlu1 %v5327_v31, %s4856_s20 }
 0x32f   : > { %v5550_v58 = vpop.permute.xlu1 %1674  ;;  %v5552_v8 = vpop.permute.xlu0 %1322  ;;  %2295 = vrot.lane.b32.xlu2 %v5361_v51, %s4857_s21 }
 0x330   : > { %7531 = vst [vmem:[#allocation4_spill] sm:$0xff] %v5550_v58 }
 0x331   : > { %v5556_v33 = vpop.permute.xlu2 %1237 }
 0x333   : > { %1048 = vmatpush.bf16.xpose.msra.mxu1 %v1030_v29 }
 0x335   : > { %2297 = vrot.lane.b32.xlu0 %v5306_v23, %s4857_s21  ;;  %1243 = vrot.lane.b32.xlu1 %v5397_v9, %s4849_s29  ;;  %s4861_s29 = smov 16  }
 0x337   : > { %v5564_v12 = vpop.permute.xlu1 %1676  ;;  %v5566_v30 = vpop.permute.xlu0 %1324  ;;  %2293 = vrot.lane.b32.xlu2 %v5327_v31, %s4857_s21 }
 0x338   : > { %7532 = vst [vmem:[#allocation5_spill] sm:$0xff] %v5564_v12 }
 0x339   : > { %v5570_v47 = vpop.permute.xlu2 %1326 }
 0x33b   : > { %1049 = vmatpush.bf16.xpose.msra.mxu1 %v1027_v50 }
 0x33d   : > { %1702 = vrot.lane.b32.xlu0 %v5397_v9, %s4850_s14  ;;  %2056 = vrot.lane.b32.xlu1 %v5397_v9, %s4851_s15 }
 0x33f   : > { %v5577_v7 = vpop.permute.xlu1 %1678  ;;  %v5579_v32 = vpop.permute.xlu0 %1328  ;;  %1348 = vrot.lane.b32.xlu2 %v5397_v9, %s4848_s28  ;;  %s7272_s28 = scalar_lea.vmem %s7514_s13, %s4287_s27 }
 0x340   : > { %7533 = vst [vmem:[#allocation6_spill] sm:$0xff] %v5577_v7 }
 0x341   : > { %v5583_v37 = vpop.permute.xlu2 %1696 }
 0x343   : > { %1050 = vmatpush.bf16.xpose.msra.mxu1 %v1024_v36 }
 0x345   : > { %1332 = vrot.lane.b32.xlu0 %v5397_v9, %s4852_s16  ;;  %1597 = vrot.lane.b32.xlu1 %v5397_v9, %s4854_s18 }
 0x347   : > { %v5591_v41 = vpop.permute.xlu1 %1589  ;;  %v5593_v48 = vpop.permute.xlu0 %1692  ;;  %1951 = vrot.lane.b32.xlu2 %v5397_v9, %s4856_s20 }
 0x349   : > { %v5597_v43 = vpop.permute.xlu2 %2050 }
 0x34b   : > { %1051 = vmatpush.bf16.xpose.msra.mxu1 %v1021_v34 }
 0x34d   : > { %2040 = vrot.lane.b32.xlu0 %v5397_v9, %s4855_s19  ;;  %1686 = vrot.lane.b32.xlu1 %v5397_v9, %s4853_s17 }
 0x34f   : > { %v5605_v49 = vpop.permute.xlu1 %1587  ;;  %v5607_v52 = vpop.permute.xlu0 %1688 }
 0x351   : > { %v5609_v38 = vpop.permute.xlu2 %1694 }
 0x352   : > { %4173 = vmatmul.msk.bf16.vlgmr.msra.gmra.mxu1 %vm995_vm5, %v5343_v45 }
 0x355   : > { %2305 = vrot.lane.b32.xlu1 %v5397_v9, %s4857_s21 }
 0x357   : > { %v5615_v46 = vpop.permute.xlu1 %1585  ;;  %v5617_v63 = vpop.permute.xlu0 %1672 }
 0x358   : > { %7534 = vst [vmem:[#allocation7_spill] sm:$0xff] %v5617_v63 }
 0x359   : > { %v5619_v53 = vpop.permute.xlu2 %2048 }
 0x35f   : > { %v5621_v54 = vpop.permute.xlu1 %1680  ;;  %v5623_v55 = vpop.permute.xlu0 %2028 }
 0x360   : > { %7535 = vst [vmem:[#allocation8_spill] sm:$0xff] %v5621_v54 }
 0x361   : > { %v5625_v40 = vpop.permute.xlu2 %2026 }
 0x362   : > { %4174 = vmatmul.msk.bf16.gmra.mxu1 %vm995_vm5, %v5327_v31 }
 0x367   : > { %v5629_v11 = vpop.permute.xlu1 %1583  ;;  %v5631_v16 = vpop.permute.xlu0 %2030 }
 0x369   : > { %v1594_v18 = vpop.permute.xlu2 %1593 }
 0x36f   : > { %v5633_v19 = vpop.permute.xlu1 %2034  ;;  %v1596_v35 = vpop.permute.xlu0 %1595 }
 0x370   : > { %7536 = vst [vmem:[#allocation9_spill] sm:$0xff] %v5633_v19 }
 0x371   : > { %v5635_v28 = vpop.permute.xlu2 %2032 }
 0x372   : > { %7537 = vst [vmem:[#allocation10_spill] sm:$0xff] %v5635_v28  ;;  %4175 = vmatmul.msk.bf16.gmra.mxu1 %vm995_vm5, %v5361_v51 }
 0x377   : > { %v5639_v29 = vpop.permute.xlu1 %1682  ;;  %v1592_v36 = vpop.permute.xlu0 %1591 }
 0x378   : > { %7538 = vst [vmem:[#allocation11_spill] sm:$0xff] %v5639_v29 }
 0x379   : > { %v5641_v50 = vpop.permute.xlu2 %1684 }
 0x37a   : > { %7539 = vst [vmem:[#allocation12_spill] sm:$0xff] %v5641_v50 }
 0x37f   : > { %v1950_v34 = vpop.permute.xlu1 %1949  ;;  %v5645_v20 = vpop.permute.xlu0 %2036 }
 0x380   : > { %7540 = vst [vmem:[#allocation13_spill] sm:$0xff] %v5645_v20 }
 0x381   : > { %v1942_v31 = vpop.permute.xlu2 %1941 }
 0x382   : > { %4176 = vmatmul.msk.bf16.gmra.mxu1 %vm995_vm5, %v5306_v23 }
 0x387   : > { %v1948_v54 = vpop.permute.xlu1 %1947  ;;  %v5651_v58 = vpop.permute.xlu0 %2038 }
 0x388   : > { %7541 = vst [vmem:[#allocation14_spill] sm:$0xff] %v5651_v58  ;;  %v1393_v58 = vsel %vm995_vm5, %v5423_v21, 0 }
 0x389   : > { %v5647_v7 = vpop.permute.xlu2 %2295 }
 0x38f   : > { %v5649_v12 = vpop.permute.xlu1 %2301  ;;  %v5659_v29 = vpop.permute.xlu0 %2303 }
 0x391   : > { %v5653_v51 = vpop.permute.xlu2 %2293 }
 0x392   : > { %4177 = vmatmul.msk.bf16.gmra.mxu1 %vm995_vm5, %v5315_v15 }
 0x397   : > { %v5657_v50 = vpop.permute.xlu1 %2299  ;;  %v1946_v19 = vpop.permute.xlu0 %1945 }
 0x399   : > { %v1349_v63 = vpop.permute.xlu2 %1348 }
 0x39a   : > { %v1396_v23 = vsel %vm995_vm5, %v1349_v63, 0  ;;  %v1390_v63 = vsel %vm995_vm5, %v5443_v59, 0  ;;  %v959_v59 = vlaneseq }
 0x39b   : > { %1398 = vmatpush.bf16.xpose.msra.mxu3 %v1396_v23 }
 0x39f   : > { %v1940_v45 = vpop.permute.xlu1 %1939  ;;  %v1944_v23 = vpop.permute.xlu0 %1943 }
 0x3a1   : > { %v1952_v20 = vpop.permute.xlu2 %1951 }
 0x3a2   : > { %4178 = vmatmul.msk.bf16.gmra.mxu1 %vm995_vm5, %v5321_v6 }
 0x3a3   : > { %1961 = vmatpush.bf16.msrb.mxu1 %v1952_v20  ;;  %1399 = vmatpush.bf16.xpose.msra.mxu3 %v1393_v58  ;;  %v1387_v20 = vsel %vm995_vm5, %v5529_v17, 0 }
 0x3a7   : > { %v1244_v15 = vpop.permute.xlu1 %1243  ;;  %1962 = vmatpush.bf16.msrb.mxu1 %v1950_v34  ;;  %v2298_v21 = vpop.permute.xlu0 %2297 }
 0x3a8   : > { %1253 = vmatpush.bf16.msra.mxu2 %v1244_v15 }
 0x3ab   : > { %1963 = vmatpush.bf16.msrb.mxu1 %v1948_v54  ;;  %1400 = vmatpush.bf16.xpose.msra.mxu3 %v1390_v63  ;;  %v1738_v54 = vsel %vm995_vm5, %v5609_v38, 0  ;;  %v1732_v38 = vsel %vm995_vm5, %v5512_v57, 0  ;;  %v2089_v57 = vsel %vm995_vm5, %v5501_v56, 0 }
 0x3ac   : > { %1254 = vmatpush.bf16.msra.mxu2 %v5543_v27 }
 0x3af   : > { %v2057_v28 = vpop.permute.xlu1 %2056  ;;  %1964 = vmatpush.bf16.msrb.mxu1 %v1946_v19 }
 0x3b0   : > { %1255 = vmatpush.bf16.msra.mxu2 %v5431_v0  ;;  %v1384_v0 = vsel %vm995_vm5, %v5453_v60, 0  ;;  %v960_v60 = vand.u32 127, %v959_v59  ;;  %v2104_v58 = vsel %vm995_vm5, %v2057_v28, 0 }
 0x3b2   : > { %4179 = vmatmul.msk.bf16.gmra.mxu1 %vm995_vm5, %v5333_v22  ;;  %v1703_v22 = vpop.permute.xlu0 %1702  ;;  %vm961_vm6 = vcmp.lt.s32.totalorder %v960_v60, 8 }
 0x3b3   : > { %1965 = vmatpush.bf16.msrb.mxu1 %v1944_v23  ;;  %1401 = vmatpush.bf16.xpose.msra.mxu3 %v1387_v20 }
 0x3b4   : > { %1256 = vmatpush.bf16.msra.mxu2 %v5556_v33 }
 0x3b7   : > { %v1598_v6 = vpop.permute.xlu1 %1597  ;;  %1966 = vmatpush.bf16.msrb.mxu1 %v1942_v31 }
 0x3b8   : > { %1257 = vmatpush.bf16.msra.mxu2 %v5441_v44  ;;  %1607 = vmatpush.bf16.msrb.mxu0 %v1598_v6  ;;  %v1750_v44 = vsel %vm995_vm5, %v1703_v22, 0 }
 0x3bb   : > { %1967 = vmatpush.bf16.msrb.mxu1 %v1940_v45  ;;  %1402 = vmatpush.bf16.xpose.msra.mxu3 %v1384_v0  ;;  %v1381_v45 = vsel %vm995_vm5, %v5463_v62, 0  ;;  %v1747_v62 = vsel %vm995_vm5, %v5451_v26, 0  ;;  %v1744_v26 = vsel %vm995_vm5, %v5471_v1, 0  ;;  %v2101_v1 = vsel %vm995_vm5, %v5461_v61, 0 }
 0x3bc   : > { %1258 = vmatpush.bf16.msra.mxu2 %v5483_v5  ;;  %1608 = vmatpush.bf16.msrb.mxu0 %v1596_v35  ;;  %v1735_v61 = vsel %vm995_vm5, %v5593_v48, 0  ;;  %v1729_v48 = vsel %vm995_vm5, %v5607_v52, 0 }
 0x3bf   : > { %v5687_v5 = vpop.permute.xlu1 %1686 }
 0x3c0   : > { %1259 = vmatpush.bf16.msra.mxu2 %v5493_v13  ;;  %1609 = vmatpush.bf16.msrb.mxu0 %v1594_v18  ;;  %v4858_v13 = vmov -1e+30  }
 0x3c2   : > { %4180 = vmatmul.msk.bf16.gmra.mxu1 %vm995_vm5, %v5397_v9  ;;  %v1378_v9 = vsel %vm995_vm5, %v5473_v2, 0  ;;  %v1375_v2 = vsel %vm995_vm5, %v5503_v14, 0  ;;  %v1741_v14 = vsel %vm995_vm5, %v5583_v37, 0 }
 0x3c3   : > { %1403 = vmatpush.bf16.xpose.msra.mxu3 %v1381_v45 }
 0x3c4   : > { %1260 = vmatpush.bf16.msra.mxu2 %v5514_v39  ;;  %1610 = vmatpush.bf16.msrb.mxu0 %v1592_v36  ;;  %v5694_v39 = vsel %vm961_vm6, 0.0, %v4858_v13 }
 0x3c7   : > { %v2306_v33 = vpop.permute.xlu1 %2305 }
 0x3c8   : > { %1752 = vmatpush.bf16.xpose.msrb.mxu2 %v1750_v44  ;;  %1611 = vmatpush.bf16.msrb.mxu0 %v5591_v41 }
 0x3cb   : > { %1404 = vmatpush.bf16.xpose.msra.mxu3 %v1378_v9 }
 0x3cc   : > { %1612 = vmatpush.bf16.msrb.mxu0 %v5605_v49 }
 0x3cf   : > { %v1053_v17 = vpop.f32.mrf.mxu1 }
 0x3d0   : > { %1753 = vmatpush.bf16.xpose.msrb.mxu2 %v1747_v62  ;;  %v5697_v27 = vadd.f32 %v1053_v17, %v5694_v39  ;;  %1613 = vmatpush.bf16.msrb.mxu0 %v5615_v46 }
 0x3d2   : > { %1093 = vmax.xlane.f32.xlu2 %v5697_v27 }
 0x3d3   : > { %1405 = vmatpush.bf16.xpose.msra.mxu3 %v1375_v2 }
 0x3d4   : > { %1614 = vmatpush.bf16.msrb.mxu0 %v5629_v11  ;;  %v2098_v11 = vsel %vm995_vm5, %v5481_v3, 0  ;;  %v2095_v3 = vsel %vm995_vm5, %v5597_v43, 0  ;;  %v2086_v43 = vsel %vm995_vm5, %v5523_v4, 0 }
 0x3d7   : > { %v1055_v41 = vpop.f32.mrf.mxu1 }
 0x3d8   : > { %1754 = vmatpush.bf16.xpose.msrb.mxu2 %v1744_v26  ;;  %2315 = vmatpush.bf16.msra.mxu0 %v2306_v33  ;;  %v1056_v49 = vadd.f32 %v1055_v41, %v5694_v39 }
 0x3da   : > { %1095 = vmax.xlane.f32.xlu1 %v1056_v49  ;;  %4181 = vmatmul.msk.bf16.vlgmr.msra.gmra.mxu3 %vm995_vm5, %v5525_v42 }
 0x3db   : > { %2106 = vmatpush.bf16.xpose.msrb.mxu3 %v2104_v58 }
 0x3dc   : > { %2316 = vmatpush.bf16.msra.mxu0 %v5659_v29 }
 0x3df   : > { %v1058_v46 = vpop.f32.mrf.mxu1 }
 0x3e0   : > { %1755 = vmatpush.bf16.xpose.msrb.mxu2 %v1741_v14  ;;  %2317 = vmatpush.bf16.msra.mxu0 %v5649_v12 }
 0x3e3   : > { %2107 = vmatpush.bf16.xpose.msrb.mxu3 %v2101_v1  ;;  %v7544_v1 = vld [vmem:[#allocation13_spill] sm:$0xff] }
 0x3e4   : > { %2318 = vmatpush.bf16.msra.mxu0 %v5657_v50 }
 0x3e7   : > { %v1060_v42 = vpop.f32.mrf.mxu1 }
 0x3e8   : > { %1756 = vmatpush.bf16.xpose.msrb.mxu2 %v1738_v54  ;;  %2319 = vmatpush.bf16.msra.mxu0 %v2298_v21  ;;  %v5722_v37 = vadd.f32 %v1060_v42, %v5694_v39 }
 0x3ea   : > { %1099 = vmax.xlane.f32.xlu1 %v5722_v37  ;;  %4182 = vmatmul.msk.bf16.gmra.mxu3 %vm995_vm5, %v5539_v24 }
 0x3eb   : > { %2108 = vmatpush.bf16.xpose.msrb.mxu3 %v2098_v11 }
 0x3ec   : > { %2320 = vmatpush.bf16.msra.mxu0 %v5647_v7  ;;  %v2092_v7 = vsel %vm995_vm5, %v5619_v53, 0  ;;  %v2083_v53 = vsel %vm995_vm5, %v5537_v25, 0 }
 0x3ef   : > { %v1063_v12 = vpop.f32.mrf.mxu1 }
 0x3f0   : > { %1757 = vmatpush.bf16.xpose.msrb.mxu2 %v1735_v61  ;;  %2321 = vmatpush.bf16.msra.mxu0 %v5653_v51  ;;  %v5794_v23 = vadd.f32 %v1063_v12, %v5694_v39 }
 0x3f3   : > { %2109 = vmatpush.bf16.xpose.msrb.mxu3 %v2095_v3 }
 0x3f7   : > { %v1065_v24 = vpop.f32.mrf.mxu1 }
 0x3f8   : > { %1758 = vmatpush.bf16.xpose.msrb.mxu2 %v1732_v38  ;;  %v5738_v18 = vadd.f32 %v1065_v24, %v5694_v39 }
 0x3fa   : > { %1103 = vmax.xlane.f32.xlu1 %v5738_v18  ;;  %4183 = vmatmul.msk.bf16.gmra.mxu3 %vm995_vm5, %v5552_v8  ;;  %v1333_v8 = vpop.permute.xlu0 %1332 }
 0x3fb   : > { %2110 = vmatpush.bf16.xpose.msrb.mxu3 %v2092_v7  ;;  %v7545_v7 = vld [vmem:[#allocation14_spill] sm:$0xff] }
 0x3ff   : > { %v1068_v36 = vpop.f32.mrf.mxu1 }
 0x400   : > { %1759 = vmatpush.bf16.xpose.msrb.mxu2 %v1729_v48  ;;  %v5808_v45 = vadd.f32 %v1068_v36, %v5694_v39  ;;  %v7546_v36 = vld [vmem:[#allocation3_spill] sm:$0xff] }
 0x403   : > { %2111 = vmatpush.bf16.xpose.msrb.mxu3 %v2089_v57 }
 0x407   : > { %v1070_v15 = vpop.f32.mrf.mxu1 }
 0x408   : > { %v5811_v44 = vadd.f32 %v1070_v15, %v5694_v39 }
 0x40a   : > { %4184 = vmatmul.msk.bf16.gmra.mxu3 %vm995_vm5, %v5566_v30 }
 0x40b   : > { %2112 = vmatpush.bf16.xpose.msrb.mxu3 %v2086_v43 }
 0x40f   : > { %v1073_v20 = vpop.f32.mrf.mxu1 }
 0x410   : > { %v5830_v26 = vadd.f32 %v1073_v20, %v5694_v39 }
 0x413   : > { %2113 = vmatpush.bf16.xpose.msrb.mxu3 %v2083_v53 }
 0x417   : > { %v1075_v22 = vpop.f32.mrf.mxu1 }
 0x41a   : > { %4185 = vmatmul.msk.bf16.gmra.mxu3 %vm995_vm5, %v5570_v47 }
 0x41f   : > { %v1078_v9 = vpop.f32.mrf.mxu1 }
 0x420   : > { %v5823_v17 = vadd.f32 %v1078_v9, %v5694_v39 }
 0x427   : > { %v1080_v33 = vpop.f32.mrf.mxu1 }
 0x428   : > { %v5859_v12 = vadd.f32 %v1080_v33, %v5694_v39 }
 0x42a   : > { %4186 = vmatmul.msk.bf16.gmra.mxu3 %vm995_vm5, %v5579_v32 }
 0x43a   : > { %4187 = vmatmul.msk.bf16.gmra.mxu3 %vm995_vm5, %v5491_v10 }
 0x445   : > { %v1094_v56 = vpop.xlane.xlu2 %1093 }
 0x446   : > { %v1125_v4 = vsub.f32 %v5697_v27, %v1094_v56  ;;  %v7543_v27 = vld [vmem:[#allocation9_spill] sm:$0xff] }
 0x448   : > { %v1141_v30 = vmul.f32 1.442695, %v1125_v4 }
 0x44a   : > { %4188 = vmatmul.msk.bf16.gmra.mxu3 %vm995_vm5, %v1333_v8  ;;  %4499 = vpow2.f32 %v1141_v30  ;;  %v2041_v8 = vpop.permute.xlu0 %2040 }
 0x44d   : > { %v1096_v52 = vpop.xlane.xlu1 %1095 }
 0x44e   : > { %v1126_v19 = vsub.f32 %v1056_v49, %v1096_v52  ;;  %v5838_v49 = vadd.f32 %v1075_v22, %v5694_v39 }
 0x450   : > { %v1143_v25 = vmul.f32 1.442695, %v1126_v19  ;;  %v5761_v35 = vpop.eup %4499 }
 0x452   : > { %4501 = vpow2.f32 %v1143_v25 }
 0x458   : > { %v5763_v47 = vpop.eup %4501 }
 0x459   : > { %v1221_v32 = vpack.c.bf16 %v5763_v47, %v5761_v35 }
 0x45a   : > { %4197 = vmatmul.msk.bf16.vlgmr.msrb.gmra.mxu3 %vm995_vm5, %v5625_v40  ;;  %v5780_v40 = vadd.f32 %v1058_v46, %v5694_v39  ;;  %v1083_v46 = vpop.f32.mrf.mxu1 }
 0x45b   : > { %1261 = vmatmul.bf16.vlgmr.msra.gmra.mxu2 %v1221_v32  ;;  %v5848_v11 = vadd.f32 %v1083_v46, %v5694_v39 }
 0x45d   : > { %v1407_v10 = vpop.f32.mrf.mxu3 }
 0x45e   : > { %v5770_v28 = vadd.f32 %v1407_v10, %v5694_v39  ;;  %v1100_v10 = vpop.xlane.xlu1 %1099 }
 0x460   : > { %1447 = vmax.xlane.f32.xlu0 %v5770_v28 }
 0x462   : > { %v1085_v38 = vpop.f32.mrf.mxu1 }
 0x463   : > { %v5870_v57 = vadd.f32 %v1085_v38, %v5694_v39 }
 0x465   : > { %v1409_v29 = vpop.f32.mrf.mxu3 }
 0x466   : > { %v5774_v50 = vadd.f32 %v1409_v29, %v5694_v39 }
 0x468   : > { %1449 = vmax.xlane.f32.xlu2 %v5774_v50 }
 0x46a   : > { %4198 = vmatmul.msk.bf16.gmra.mxu3 %vm995_vm5, %v5623_v55  ;;  %v1088_v43 = vpop.f32.mrf.mxu1 }
 0x46b   : > { %v5875_v56 = vadd.f32 %v1088_v43, %v5694_v39 }
 0x46d   : > { %v1412_v34 = vpop.f32.mrf.mxu3 }
 0x46e   : > { %v5783_v31 = vadd.f32 %v1412_v34, %v5694_v39 }
 0x470   : > { %1097 = vmax.xlane.f32.xlu2 %v5780_v40  ;;  %1451 = vmax.xlane.f32.xlu0 %v5783_v31 }
 0x475   : > { %v1414_v51 = vpop.f32.mrf.mxu3 }
 0x476   : > { %v5788_v63 = vadd.f32 %v1414_v51, %v5694_v39 }
 0x478   : > { %1453 = vmax.xlane.f32.xlu2 %v5788_v63 }
 0x47a   : > { %4199 = vmatmul.msk.bf16.gmra.mxu3 %vm995_vm5, %v5631_v16  ;;  %v7542_v16 = vld [vmem:[#allocation10_spill] sm:$0xff] }
 0x47d   : > { %v1417_v55 = vpop.f32.mrf.mxu3 }
 0x47e   : > { %v5798_v21 = vadd.f32 %v1417_v55, %v5694_v39  ;;  %v1128_v55 = vsub.f32 %v5722_v37, %v1100_v10 }
 0x480   : > { %1101 = vmax.xlane.f32.xlu2 %v5794_v23 }
 0x485   : > { %v1419_v6 = vpop.f32.mrf.mxu3 }
 0x486   : > { %v5801_v0 = vadd.f32 %v1419_v6, %v5694_v39 }
 0x488   : > { %1457 = vmax.xlane.f32.xlu1 %v5801_v0  ;;  %1455 = vmax.xlane.f32.xlu2 %v5798_v21 }
 0x48a   : > { %4200 = vmatmul.msk.bf16.gmra.mxu3 %vm995_vm5, %v7542_v16 }
 0x48d   : > { %v1422_v59 = vpop.f32.mrf.mxu3 }
 0x48e   : > { %v5814_v60 = vadd.f32 %v1422_v59, %v5694_v39 }
 0x490   : > { %1107 = vmax.xlane.f32.xlu1 %v5811_v44  ;;  %1105 = vmax.xlane.f32.xlu2 %v5808_v45 }
 0x491   : > { %1459 = vmax.xlane.f32.xlu0 %v5814_v60 }
 0x495   : > { %v1424_v62 = vpop.f32.mrf.mxu3 }
 0x496   : > { %v5820_v13 = vadd.f32 %v1424_v62, %v5694_v39 }
 0x498   : > { %1461 = vmax.xlane.f32.xlu2 %v5820_v13 }
 0x499   : > { %1113 = vmax.xlane.f32.xlu0 %v5823_v17 }
 0x49a   : > { %4201 = vmatmul.msk.bf16.gmra.mxu3 %vm995_vm5, %v7543_v27 }
 0x49d   : > { %v1427_v2 = vpop.f32.mrf.mxu3 }
 0x49e   : > { %v5833_v58 = vadd.f32 %v1427_v2, %v5694_v39  ;;  %v1104_v2 = vpop.xlane.xlu1 %1103 }
 0x4a0   : > { %1463 = vmax.xlane.f32.xlu1 %v5833_v58  ;;  %1109 = vmax.xlane.f32.xlu2 %v5830_v26 }
 0x4a5   : > { %v1429_v41 = vpop.f32.mrf.mxu3 }
 0x4a6   : > { %v5841_v14 = vadd.f32 %v1429_v41, %v5694_v39 }
 0x4a8   : > { %1111 = vmax.xlane.f32.xlu1 %v5838_v49  ;;  %1465 = vmax.xlane.f32.xlu2 %v5841_v14 }
 0x4aa   : > { %4202 = vmatmul.msk.bf16.gmra.mxu3 %vm995_vm5, %v7544_v1 }
 0x4ad   : > { %v1432_v54 = vpop.f32.mrf.mxu3 }
 0x4ae   : > { %v5851_v42 = vadd.f32 %v1432_v54, %v5694_v39  ;;  %v1130_v54 = vsub.f32 %v5738_v18, %v1104_v2 }
 0x4b0   : > { %1117 = vmax.xlane.f32.xlu1 %v5848_v11  ;;  %1467 = vmax.xlane.f32.xlu2 %v5851_v42 }
 0x4b5   : > { %v1434_v61 = vpop.f32.mrf.mxu3 }
 0x4b6   : > { %v5856_v3 = vadd.f32 %v1434_v61, %v5694_v39  ;;  %v1151_v61 = vmul.f32 1.442695, %v1130_v54 }
 0x4b8   : > { %1173 = vadd.xlane.f32.xlu1 %v5761_v35  ;;  %1469 = vmax.xlane.f32.xlu0 %v5856_v3 }
 0x4b9   : > { %1115 = vmax.xlane.f32.xlu2 %v5859_v12 }
 0x4ba   : > { %4203 = vmatmul.msk.bf16.gmra.mxu3 %vm995_vm5, %v7545_v7 }
 0x4bd   : > { %v1437_v24 = vpop.f32.mrf.mxu3 }
 0x4be   : > { %v5867_v48 = vadd.f32 %v1437_v24, %v5694_v39 }
 0x4c0   : > { %1119 = vmax.xlane.f32.xlu0 %v5870_v57 }
 0x4c1   : > { %1471 = vmax.xlane.f32.xlu2 %v5867_v48 }
 0x4c5   : > { %v1439_v53 = vpop.f32.mrf.mxu3 }
 0x4c6   : > { %v5878_v4 = vadd.f32 %v1439_v53, %v5694_v39 }
 0x4c8   : > { %1121 = vmax.xlane.f32.xlu0 %v5875_v56 }
 0x4c9   : > { %1473 = vmax.xlane.f32.xlu2 %v5878_v4 }
 0x4ca   : > { %4204 = vmatmul.msk.bf16.gmra.mxu3 %vm995_vm5, %v2041_v8 }
 0x4cd   : > { %v5883_v30 = vpop.f32.mrf.mxu3 }
 0x4d3   : > { %v1448_v52 = vpop.xlane.xlu0 %1447 }
 0x4d4   : > { %v1479_v19 = vsub.f32 %v5770_v28, %v1448_v52  ;;  %v1147_v28 = vmul.f32 1.442695, %v1128_v55 }
 0x4d5   : > { %v5886_v25 = vpop.f32.mrf.mxu3 }
 0x4d6   : > { %v1495_v35 = vmul.f32 1.442695, %v1479_v19 }
 0x4d8   : > { %4503 = vpow2.f32 %v1495_v35 }
 0x4db   : > { %v1450_v32 = vpop.xlane.xlu2 %1449 }
 0x4dc   : > { %v1480_v29 = vsub.f32 %v5774_v50, %v1450_v32  ;;  %1937 = vrot.lane.b32.xlu0 %v7546_v36, %s4856_s20 }
 0x4dd   : > { %v5891_v34 = vpop.f32.mrf.mxu3 }
 0x4de   : > { %v4504_v51 = vpop.eup %4503  ;;  %v1497_v15 = vmul.f32 1.442695, %v1480_v29 }
 0x4df   : > { %1527 = vadd.xlane.f32.xlu1 %v4504_v51 }
 0x4e0   : > { %4505 = vpow2.f32 %v1497_v15 }
 0x4e1   : > { %2291 = vrot.lane.b32.xlu2 %v7546_v36, %s4857_s21  ;;  %4507 = vpow2.f32 %v1147_v28 }
 0x4e3   : > { %v1098_v20 = vpop.xlane.xlu2 %1097  ;;  %v1452_v22 = vpop.xlane.xlu0 %1451 }
 0x4e4   : > { %v1127_v6 = vsub.f32 %v5780_v40, %v1098_v20  ;;  %v1481_v9 = vsub.f32 %v5783_v31, %v1452_v22 }
 0x4e5   : > { %v5897_v50 = vpop.f32.mrf.mxu3 }
 0x4e6   : > { %v5899_v16 = vpop.eup %4505  ;;  %v1145_v59 = vmul.f32 1.442695, %v1127_v6  ;;  %v1499_v62 = vmul.f32 1.442695, %v1481_v9  ;;  %v5944_v2 = vadd.f32 %v5897_v50, %v5694_v39 }
 0x4e7   : > { %v1575_v37 = vpack.c.bf16 %v5899_v16, %v4504_v51  ;;  %v5904_v41 = vpop.eup %4507 }
 0x4e8   : > { %4509 = vpow2.f32 %v1145_v59 }
 0x4e9   : > { %1615 = vmatmul.bf16.vlgmr.msrb.gmra.mxu0 %v1575_v37  ;;  %4511 = vpow2.f32 %v1499_v62 }
 0x4eb   : > { %v1454_v27 = vpop.xlane.xlu2 %1453 }
 0x4ec   : > { %v1482_v33 = vsub.f32 %v5788_v63, %v1454_v27  ;;  %v5938_v27 = vadd.f32 %v5883_v30, %v5694_v39 }
 0x4ed   : > { %v5906_v40 = vpop.f32.mrf.mxu3 }
 0x4ee   : > { %v4510_v1 = vpop.eup %4509  ;;  %v1501_v46 = vmul.f32 1.442695, %v1482_v33  ;;  %v1090_v33 = vpop.f32.mrf.mxu1 }
 0x4ef   : > { %1177 = vadd.xlane.f32.xlu1 %v4510_v1  ;;  %v1222_v31 = vpack.c.bf16 %v5904_v41, %v4510_v1  ;;  %v4512_v24 = vpop.eup %4511 }
 0x4f0   : > { %4513 = vpow2.f32 %v1501_v46 }
 0x4f1   : > { %1266 = vmatmul.bf16.gmra.mxu2 %v1222_v31  ;;  %4515 = vpow2.f32 %v1151_v61  ;;  %v5956_v61 = vadd.f32 %v1090_v33, %v5694_v39 }
 0x4f3   : > { %v1102_v38 = vpop.xlane.xlu2 %1101 }
 0x4f4   : > { %v1129_v7 = vsub.f32 %v5794_v23, %v1102_v38 }
 0x4f5   : > { %v5911_v63 = vpop.f32.mrf.mxu3 }
 0x4f6   : > { %v5913_v43 = vpop.eup %4513  ;;  %v1149_v53 = vmul.f32 1.442695, %v1129_v7  ;;  %v5961_v7 = vadd.f32 %v5906_v40, %v5694_v39 }
 0x4f7   : > { %1531 = vadd.xlane.f32.xlu1 %v4512_v24  ;;  %v1576_v18 = vpack.c.bf16 %v5913_v43, %v4512_v24  ;;  %v5918_v32 = vpop.eup %4515 }
 0x4f8   : > { %4517 = vpow2.f32 %v1149_v53 }
 0x4f9   : > { %1620 = vmatmul.bf16.gmra.mxu0 %v1576_v18 }
 0x4fb   : > { %v1458_v8 = vpop.xlane.xlu1 %1457  ;;  %v1456_v52 = vpop.xlane.xlu2 %1455 }
 0x4fc   : > { %v1484_v19 = vsub.f32 %v5801_v0, %v1458_v8  ;;  %v1483_v35 = vsub.f32 %v5798_v21, %v1456_v52  ;;  %v5928_v0 = vadd.f32 %v5886_v25, %v5694_v39 }
 0x4fd   : > { %v5920_v23 = vpop.f32.mrf.mxu3 }
 0x4fe   : > { %v5922_v10 = vpop.eup %4517  ;;  %v1505_v29 = vmul.f32 1.442695, %v1484_v19  ;;  %v1503_v36 = vmul.f32 1.442695, %v1483_v35  ;;  %v5973_v35 = vadd.f32 %v5891_v34, %v5694_v39 }
 0x4ff   : > { %v1223_v51 = vpack.c.bf16 %v5918_v32, %v5922_v10 }
 0x500   : > { %4519 = vpow2.f32 %v1505_v29 }
 0x501   : > { %4521 = vpow2.f32 %v1503_v36  ;;  %1271 = vmatmul.bf16.gmra.mxu2 %v1223_v51 }
 0x503   : > { %v1108_v15 = vpop.xlane.xlu1 %1107  ;;  %v1106_v55 = vpop.xlane.xlu2 %1105 }
 0x504   : > { %v1132_v21 = vsub.f32 %v5811_v44, %v1108_v15  ;;  %v1131_v28 = vsub.f32 %v5808_v45, %v1106_v55  ;;  %v1460_v20 = vpop.xlane.xlu0 %1459 }
 0x505   : > { %v2127_v6 = vpop.f32.mrf.mxu3  ;;  %v1485_v62 = vsub.f32 %v5814_v60, %v1460_v20  ;;  %v5990_v20 = vadd.f32 %v5920_v23, %v5694_v39 }
 0x506   : > { %v5932_v22 = vpop.eup %4519  ;;  %v1155_v59 = vmul.f32 1.442695, %v1132_v21  ;;  %v1153_v9 = vmul.f32 1.442695, %v1131_v28  ;;  %1477 = vmax.xlane.f32.xlu0 %v5928_v0  ;;  %v5950_v46 = vadd.f32 %v2127_v6, %v5694_v39 }
 0x507   : > { %v4522_v37 = vpop.eup %4521  ;;  %v1507_v45 = vmul.f32 1.442695, %v1485_v62 }
 0x508   : > { %4523 = vpow2.f32 %v1155_v59  ;;  %1535 = vadd.xlane.f32.xlu1 %v4522_v37  ;;  %v1577_v44 = vpack.c.bf16 %v5932_v22, %v4522_v37 }
 0x509   : > { %4525 = vpow2.f32 %v1153_v9 }
 0x50a   : > { %1475 = vmax.xlane.f32.xlu2 %v5938_v27  ;;  %1625 = vmatmul.bf16.gmra.mxu0 %v1577_v44  ;;  %4527 = vpow2.f32 %v1507_v45 }
 0x50b   : > { %v1462_v25 = vpop.xlane.xlu2 %1461 }
 0x50c   : > { %v1486_v60 = vsub.f32 %v5820_v13, %v1462_v25 }
 0x50d   : > { %v2130_v1 = vpop.f32.mrf.mxu3 }
 0x50e   : > { %v5947_v30 = vpop.eup %4523  ;;  %v1509_v54 = vmul.f32 1.442695, %v1486_v60  ;;  %2157 = vmax.xlane.f32.xlu0 %v5944_v2 }
 0x50f   : > { %v4526_v31 = vpop.eup %4525 }
 0x510   : > { %4529 = vpow2.f32 %v1509_v54  ;;  %2165 = vmax.xlane.f32.xlu1 %v5950_v46  ;;  %v1224_v50 = vpack.c.bf16 %v5947_v30, %v4526_v31  ;;  %v5963_v24 = vpop.eup %4527 }
 0x512   : > { %1276 = vmatmul.bf16.gmra.mxu2 %v1224_v50  ;;  %1123 = vmax.xlane.f32.xlu2 %v5956_v61 }
 0x513   : > { %v1464_v13 = vpop.xlane.xlu1 %1463  ;;  %v1110_v38 = vpop.xlane.xlu2 %1109 }
 0x514   : > { %v1487_v8 = vsub.f32 %v5833_v58, %v1464_v13  ;;  %v1133_v52 = vsub.f32 %v5830_v26, %v1110_v38  ;;  %v5981_v26 = vadd.f32 %v2130_v1, %v5694_v39 }
 0x515   : > { %v5965_v53 = vpop.f32.mrf.mxu3 }
 0x516   : > { %v4530_v18 = vpop.eup %4529  ;;  %2159 = vmax.xlane.f32.xlu0 %v5961_v7  ;;  %v1511_v40 = vmul.f32 1.442695, %v1487_v8  ;;  %v1157_v29 = vmul.f32 1.442695, %v1133_v52 }
 0x517   : > { %v1578_v19 = vpack.c.bf16 %v4530_v18, %v5963_v24 }
 0x518   : > { %1185 = vadd.xlane.f32.xlu1 %v4526_v31  ;;  %4531 = vpow2.f32 %v1511_v40 }
 0x519   : > { %4533 = vpow2.f32 %v1157_v29 }
 0x51a   : > { %2155 = vmax.xlane.f32.xlu2 %v5973_v35  ;;  %1630 = vmatmul.bf16.gmra.mxu0 %v1578_v19 }
 0x51b   : > { %v1112_v36 = vpop.xlane.xlu1 %1111  ;;  %v1466_v51 = vpop.xlane.xlu2 %1465 }
 0x51c   : > { %v1134_v58 = vsub.f32 %v5838_v49, %v1112_v36  ;;  %v1488_v15 = vsub.f32 %v5841_v14, %v1466_v51  ;;  %v1114_v49 = vpop.xlane.xlu0 %1113 }
 0x51d   : > { %v5978_v55 = vpop.f32.mrf.mxu3 }
 0x51e   : > { %v1159_v34 = vmul.f32 1.442695, %v1134_v58  ;;  %v1513_v21 = vmul.f32 1.442695, %v1488_v15  ;;  %1179 = vadd.xlane.f32.xlu0 %v5904_v41  ;;  %v5986_v14 = vpop.eup %4531  ;;  %v1135_v41 = vsub.f32 %v5823_v17, %v1114_v49 }
 0x51f   : > { %v5992_v6 = vpop.eup %4533 }
 0x520   : > { %4535 = vpow2.f32 %v1159_v34  ;;  %2167 = vmax.xlane.f32.xlu1 %v5981_v26  ;;  %v1161_v23 = vmul.f32 1.442695, %v1135_v41 }
 0x521   : > { %4537 = vpow2.f32 %v1513_v21 }
 0x522   : > { %1175 = vadd.xlane.f32.xlu2 %v5763_v47  ;;  %4539 = vpow2.f32 %v1161_v23 }
 0x523   : > { %v1468_v28 = vpop.xlane.xlu2 %1467 }
 0x524   : > { %v1489_v47 = vsub.f32 %v5851_v42, %v1468_v28 }
 0x525   : > { %v2137_v59 = vpop.f32.mrf.mxu3 }
 0x526   : > { %v5994_v9 = vpop.eup %4535  ;;  %2163 = vmax.xlane.f32.xlu0 %v5990_v20  ;;  %v1515_v45 = vmul.f32 1.442695, %v1489_v47 }
 0x527   : > { %v4538_v37 = vpop.eup %4537  ;;  %v1225_v62 = vpack.c.bf16 %v5994_v9, %v5992_v6 }
 0x528   : > { %1541 = vadd.xlane.f32.xlu1 %v4530_v18  ;;  %v1579_v44 = vpack.c.bf16 %v4538_v37, %v5986_v14  ;;  %4541 = vpow2.f32 %v1515_v45  ;;  %v6007_v31 = vpop.eup %4539 }
 0x529   : > { %1281 = vmatmul.bf16.gmra.mxu2 %v1225_v62 }
 0x52a   : > { %1529 = vadd.xlane.f32.xlu2 %v5899_v16  ;;  %1635 = vmatmul.bf16.gmra.mxu0 %v1579_v44  ;;  %v1118_v16 = vpop.xlane.xlu1 %1117 }
 0x52b   : > { %v1470_v25 = vpop.xlane.xlu0 %1469  ;;  %v1137_v18 = vsub.f32 %v5848_v11, %v1118_v16 }
 0x52c   : > { %v1116_v60 = vpop.xlane.xlu2 %1115  ;;  %v1490_v17 = vsub.f32 %v5856_v3, %v1470_v25  ;;  %v6056_v25 = vadd.f32 %v5965_v53, %v5694_v39 }
 0x52d   : > { %v1136_v33 = vsub.f32 %v5859_v12, %v1116_v60  ;;  %v2140_v1 = vpop.f32.mrf.mxu3  ;;  %v1165_v29 = vmul.f32 1.442695, %v1137_v18 }
 0x52e   : > { %v1517_v42 = vmul.f32 1.442695, %v1490_v17  ;;  %1183 = vadd.xlane.f32.xlu0 %v5918_v32  ;;  %v4542_v3 = vpop.eup %4541  ;;  %v6038_v34 = vadd.f32 %v2140_v1, %v5694_v39  ;;  %v6064_v17 = vpop.f32.mrf.mxu2 }
 0x52f   : > { %v1163_v54 = vmul.f32 1.442695, %v1136_v33  ;;  %v6071_v33 = vadd.f32 %v5978_v55, %v5694_v39 }
 0x530   : > { %4543 = vpow2.f32 %v1517_v42  ;;  %1545 = vadd.xlane.f32.xlu1 %v4538_v37 }
 0x531   : > { %4545 = vpow2.f32 %v1163_v54 }
 0x532   : > { %1533 = vadd.xlane.f32.xlu2 %v5913_v43  ;;  %v6019_v43 = vadd.f32 %v5911_v63, %v5694_v39  ;;  %4547 = vpow2.f32 %v1165_v29 }
 0x533   : > { %v1120_v13 = vpop.xlane.xlu0 %1119 }
 0x534   : > { %v1472_v50 = vpop.xlane.xlu2 %1471  ;;  %v1138_v8 = vsub.f32 %v5870_v57, %v1120_v13  ;;  %v6026_v57 = vadd.f32 %v2137_v59, %v5694_v39 }
 0x535   : > { %v2142_v38 = vpop.f32.mrf.mxu3  ;;  %v1491_v19 = vsub.f32 %v5867_v48, %v1472_v50 }
 0x536   : > { %v6009_v12 = vpop.eup %4543  ;;  %1539 = vadd.xlane.f32.xlu0 %v5963_v24  ;;  %v1167_v11 = vmul.f32 1.442695, %v1138_v8  ;;  %v6030_v48 = vadd.f32 %v2142_v38, %v5694_v39  ;;  %v6074_v1 = vpop.f32.mrf.mxu2 }
 0x537   : > { %v6013_v32 = vpop.eup %4545  ;;  %v1580_v52 = vpack.c.bf16 %v6009_v12, %v4542_v3  ;;  %v1519_v24 = vmul.f32 1.442695, %v1491_v19 }
 0x538   : > { %1547 = vadd.xlane.f32.xlu1 %v4542_v3  ;;  %v1226_v40 = vpack.c.bf16 %v6013_v32, %v6007_v31  ;;  %4549 = vpow2.f32 %v1167_v11  ;;  %v6035_v15 = vpop.eup %4547 }
 0x539   : > { %4551 = vpow2.f32 %v1519_v24 }
 0x53a   : > { %2161 = vmax.xlane.f32.xlu2 %v6019_v43  ;;  %1286 = vmatmul.bf16.gmra.mxu2 %v1226_v40 }
 0x53b   : > { %1640 = vmatmul.bf16.gmra.mxu0 %v1580_v52  ;;  %v1122_v59 = vpop.xlane.xlu0 %1121 }
 0x53c   : > { %v1474_v36 = vpop.xlane.xlu2 %1473  ;;  %v1139_v24 = vsub.f32 %v5875_v56, %v1122_v59 }
 0x53d   : > { %v1492_v63 = vsub.f32 %v5878_v4, %v1474_v36  ;;  %v2145_v51 = vpop.f32.mrf.mxu3 }
 0x53e   : > { %2173 = vmax.xlane.f32.xlu0 %v6026_v57  ;;  %v6040_v21 = vpop.eup %4549  ;;  %v6043_v41 = vadd.f32 %v2145_v51, %v5694_v39 }
 0x53f   : > { %v1521_v58 = vmul.f32 1.442695, %v1492_v63  ;;  %v4552_v28 = vpop.eup %4551 }
 0x540   : > { %2177 = vmax.xlane.f32.xlu1 %v6030_v48 }
 0x541   : > { %4553 = vpow2.f32 %v1521_v58 }
 0x542   : > { %1181 = vadd.xlane.f32.xlu2 %v5922_v10  ;;  %v1227_v10 = vpack.c.bf16 %v6040_v21, %v6035_v15 }
 0x544   : > { %v2292_v4 = vpop.permute.xlu2 %2291 }
 0x545   : > { %2322 = vmatpush.bf16.msra.mxu0 %v2292_v4  ;;  %v2147_v49 = vpop.f32.mrf.mxu3 }
 0x546   : > { %2175 = vmax.xlane.f32.xlu0 %v6038_v34  ;;  %v6086_v55 = vadd.f32 %v2147_v49, %v5694_v39 }
 0x547   : > { %v4554_v37 = vpop.eup %4553 }
 0x548   : > { %2179 = vmax.xlane.f32.xlu1 %v6043_v41  ;;  %v1581_v47 = vpack.c.bf16 %v4554_v37, %v4552_v28 }
 0x54a   : > { %1537 = vadd.xlane.f32.xlu2 %v5932_v22  ;;  %1291 = vmatmul.bf16.gmra.mxu2 %v1227_v10  ;;  %v6059_v22 = vpop.xlane.xlu1 %1173 }
 0x54b   : > { %1645 = vmatmul.bf16.gmra.mxu0 %v1581_v47 }
 0x54d   : > { %v2150_v62 = vpop.f32.mrf.mxu3 }
 0x54e   : > { %1551 = vadd.xlane.f32.xlu0 %v4552_v28  ;;  %v1938_v44 = vpop.permute.xlu0 %1937  ;;  %v6098_v29 = vadd.f32 %v2150_v62, %v5694_v39 }
 0x54f   : > { %1968 = vmatpush.bf16.msrb.mxu1 %v1938_v44 }
 0x550   : > { %1553 = vadd.xlane.f32.xlu1 %v4554_v37 }
 0x552   : > { %1187 = vadd.xlane.f32.xlu2 %v5947_v30  ;;  %v6062_v60 = vpop.xlane.xlu1 %1527 }
 0x555   : > { %v2152_v23 = vpop.f32.mrf.mxu3 }
 0x556   : > { %v6052_v45 = vadd.f32 %v2152_v23, %v5694_v39 }
 0x558   : > { %2185 = vmax.xlane.f32.xlu0 %v6052_v45 }
 0x55a   : > { %2169 = vmax.xlane.f32.xlu2 %v6056_v25 }
 0x562   : > { %1543 = vadd.xlane.f32.xlu2 %v5986_v14  ;;  %v1178_v53 = vpop.xlane.xlu1 %1177 }
 0x563   : > { %4555 = vrcp.f32 %v1178_v53 }
 0x566   : > { %v6067_v30 = vpop.f32.mrf.mxu0 }
 0x569   : > { %v4556_v16 = vpop.eup %4555 }
 0x56a   : > { %2171 = vmax.xlane.f32.xlu2 %v6071_v33  ;;  %v6079_v54 = vpop.xlane.xlu1 %1531 }
 0x56e   : > { %v6076_v42 = vpop.f32.mrf.mxu0 }
 0x572   : > { %1549 = vadd.xlane.f32.xlu2 %v6009_v12 }
 0x574   : > { %v1267_v14 = vpop.f32.mrf.mxu2 }
 0x575   : > { %v6081_v50 = vmul.f32 %v4556_v16, %v1267_v14 }
 0x576   : > { %v6083_v13 = vpop.f32.mrf.mxu0 }
 0x579   : > { %v1478_v3 = vpop.xlane.xlu0 %1477 }
 0x57a   : > { %2181 = vmax.xlane.f32.xlu2 %v6086_v55  ;;  %v1494_v38 = vsub.f32 %v5928_v0, %v1478_v3 }
 0x57b   : > { %v6090_v18 = vpop.xlane.xlu1 %1535 }
 0x57c   : > { %v6092_v8 = vpop.f32.mrf.mxu2  ;;  %v1525_v12 = vmul.f32 1.442695, %v1494_v38 }
 0x57d   : > { %v1476_v52 = vpop.xlane.xlu2 %1475 }
 0x57e   : > { %v1493_v19 = vsub.f32 %v5938_v27, %v1476_v52  ;;  %v6095_v40 = vpop.f32.mrf.mxu0  ;;  %4557 = vpow2.f32 %v1525_v12  ;;  %v1169_v27 = vmul.f32 1.442695, %v1139_v24 }
 0x580   : > { %v1523_v11 = vmul.f32 1.442695, %v1493_v19 }
 0x581   : > { %v2158_v36 = vpop.xlane.xlu0 %2157 }
 0x582   : > { %4559 = vpow2.f32 %v1523_v11  ;;  %2183 = vmax.xlane.f32.xlu2 %v6098_v29  ;;  %v2188_v0 = vsub.f32 %v5944_v2, %v2158_v36 }
 0x583   : > { %v6103_v63 = vpop.xlane.xlu1 %2165 }
 0x584   : > { %v2205_v51 = vmul.f32 1.442695, %v2188_v0  ;;  %v6105_v58 = vpop.f32.mrf.mxu2  ;;  %v6108_v28 = vpop.eup %4557 }
 0x585   : > { %v1124_v4 = vpop.xlane.xlu2 %1123 }
 0x586   : > { %4561 = vpow2.f32 %v2205_v51  ;;  %v1140_v49 = vsub.f32 %v5956_v61, %v1124_v4 }
 0x587   : > { %v6110_v56 = vpop.f32.mrf.mxu0  ;;  %4563 = vpow2.f32 %v1169_v27 }
 0x588   : > { %v6112_v59 = vpop.eup %4559  ;;  %v1171_v37 = vmul.f32 1.442695, %v1140_v49 }
 0x589   : > { %v2160_v10 = vpop.xlane.xlu0 %2159  ;;  %v1582_v2 = vpack.c.bf16 %v6108_v28, %v6112_v59 }
 0x58a   : > { %4565 = vpow2.f32 %v1171_v37  ;;  %v2189_v52 = vsub.f32 %v5961_v7, %v2160_v10 }
 0x58b   : > { %v1186_v47 = vpop.xlane.xlu1 %1185  ;;  %1650 = vmatmul.bf16.gmra.mxu0 %v1582_v2 }
 0x58c   : > { %v4562_v62 = vpop.eup %4561  ;;  %v6116_v44 = vpop.f32.mrf.mxu2  ;;  %4567 = vrcp.f32 %v1186_v47  ;;  %v2207_v36 = vmul.f32 1.442695, %v2189_v52 }
 0x58d   : > { %v2156_v23 = vpop.xlane.xlu2 %2155  ;;  %2237 = vadd.xlane.f32.xlu0 %v4562_v62  ;;  %v6119_v53 = vpop.eup %4563 }
 0x58e   : > { %v2187_v61 = vsub.f32 %v5973_v35, %v2156_v23 }
 0x58f   : > { %v6121_v16 = vpop.f32.mrf.mxu0 }
 0x590   : > { %v6123_v14 = vpop.eup %4565  ;;  %v2203_v3 = vmul.f32 1.442695, %v2187_v61 }
 0x591   : > { %v6125_v38 = vpop.xlane.xlu0 %1179  ;;  %v1228_v12 = vpack.c.bf16 %v6123_v14, %v6119_v53 }
 0x592   : > { %4569 = vpow2.f32 %v2203_v3  ;;  %v4568_v35 = vpop.eup %4567 }
 0x593   : > { %v6130_v19 = vpop.xlane.xlu1 %2167  ;;  %1296 = vmatmul.bf16.gmra.mxu2 %v1228_v12  ;;  %4571 = vpow2.f32 %v2207_v36 }
 0x594   : > { %4573 = vrcp.f32 %v6062_v60 }
 0x595   : > { %v1277_v11 = vpop.f32.mrf.mxu2  ;;  %v6132_v24 = vpop.xlane.xlu2 %1175 }
 0x596   : > { %v6134_v0 = vmul.f32 %v4568_v35, %v1277_v11 }
 0x597   : > { %v1631_v51 = vpop.f32.mrf.mxu0 }
 0x598   : > { %v4570_v27 = vpop.eup %4569 }
 0x599   : > { %v2283_v4 = vpack.c.bf16 %v4562_v62, %v4570_v27  ;;  %2235 = vadd.xlane.f32.xlu2 %v4570_v27  ;;  %v2164_v49 = vpop.xlane.xlu0 %2163  ;;  %v4572_v23 = vpop.eup %4571  ;;  %v7547_v62 = vld [vmem:[#allocation7_spill] sm:$0xff] }
 0x59a   : > { %v2191_v37 = vsub.f32 %v5990_v20, %v2164_v49  ;;  %v4574_v12 = vpop.eup %4573 }
 0x59b   : > { %v1542_v7 = vpop.xlane.xlu1 %1541  ;;  %2323 = vmatmul.bf16.vlgmr.msra.gmra.mxu0 %v2283_v4  ;;  %v1656_v35 = vmul.f32 %v4574_v12, %v6067_v30 }
 0x59c   : > { %v2211_v2 = vmul.f32 1.442695, %v2191_v37 }
 0x59d   : > { %v1530_v10 = vpop.xlane.xlu2 %1529 }
 0x59e   : > { %4575 = vrcp.f32 %v1530_v10 }
 0x59f   : > { %v1633_v47 = vpop.f32.mrf.mxu0  ;;  %4577 = vpow2.f32 %v2211_v2 }
 0x5a0   : > { %4579 = vrcp.f32 %v1542_v7 }
 0x5a1   : > { %2239 = vadd.xlane.f32.xlu2 %v4572_v23  ;;  %v6138_v61 = vpop.xlane.xlu0 %1183 }
 0x5a3   : > { %v6140_v3 = vpop.xlane.xlu1 %1545  ;;  %4189 = vmatmul.msk.bf16.vlgmr.msrb.gmra.mxu2 %vm995_vm5, %v7547_v62 }
 0x5a4   : > { %v4576_v20 = vpop.eup %4575 }
 0x5a5   : > { %v1534_v52 = vpop.xlane.xlu2 %1533  ;;  %v1657_v60 = vmul.f32 %v4576_v20, %v6076_v42  ;;  %v6148_v36 = vpop.eup %4577 }
 0x5a6   : > { %v4580_v10 = vpop.eup %4579 }
 0x5a7   : > { %v6146_v11 = vpop.f32.mrf.mxu0  ;;  %v4337_v27 = vpack.i.bf16 %v1657_v60, %v1656_v35  ;;  %v6155_v12 = vmul.f32 %v4580_v10, %v1633_v47  ;;  %v2192_v35 = vsub.f32 %v5950_v46, %v6103_v63 }
 0x5a9   : > { %2243 = vadd.xlane.f32.xlu2 %v6148_v36  ;;  %v1540_v4 = vpop.xlane.xlu0 %1539  ;;  %4338 = vrot.lane.b32.xlu1 %v4337_v27, %s4859_s22  ;;  %v7548_v27 = vld [vmem:[#allocation4_spill] sm:$0xff] }
 0x5aa   : > { %4581 = vrcp.f32 %v1540_v4 }
 0x5ab   : > { %v1548_v49 = vpop.xlane.xlu1 %1547  ;;  %4583 = vrcp.f32 %v1534_v52 }
 0x5ac   : > { %4585 = vrcp.f32 %v1548_v49 }
 0x5ad   : > { %v2162_v37 = vpop.xlane.xlu2 %2161 }
 0x5ae   : > { %v2190_v30 = vsub.f32 %v6019_v43, %v2162_v37 }
 0x5af   : > { %v6153_v2 = vpop.f32.mrf.mxu0 }
 0x5b0   : > { %v4582_v42 = vpop.eup %4581  ;;  %v2209_v62 = vmul.f32 1.442695, %v2190_v30 }
 0x5b1   : > { %v6157_v7 = vmul.f32 %v4582_v42, %v1631_v51  ;;  %v6159_v20 = vpop.xlane.xlu0 %2173  ;;  %v4584_v47 = vpop.eup %4583  ;;  %v2213_v51 = vmul.f32 1.442695, %v2192_v35 }
 0x5b2   : > { %4587 = vpow2.f32 %v2209_v62  ;;  %v4586_v4 = vpop.eup %4585  ;;  %v1659_v30 = vmul.f32 %v4584_v47, %v6095_v40  ;;  %v7549_v47 = vld [vmem:[#allocation5_spill] sm:$0xff] }
 0x5b3   : > { %v6163_v60 = vpop.xlane.xlu1 %2177  ;;  %4190 = vmatmul.msk.bf16.gmra.mxu2 %vm995_vm5, %v7548_v27  ;;  %4589 = vrcp.f32 %v6079_v54 }
 0x5b5   : > { %v1182_v52 = vpop.xlane.xlu2 %1181 }
 0x5b6   : > { %4591 = vrcp.f32 %v1182_v52 }
 0x5b7   : > { %4593 = vpow2.f32 %v2213_v51 }
 0x5b8   : > { %v4588_v49 = vpop.eup %4587  ;;  %v1641_v37 = vpop.f32.mrf.mxu0  ;;  %4595 = vrcp.f32 %v6090_v18 }
 0x5b9   : > { %v6170_v10 = vmul.f32 %v4586_v4, %v1641_v37  ;;  %2241 = vadd.xlane.f32.xlu0 %v4588_v49  ;;  %v6172_v46 = vpop.xlane.xlu0 %2175  ;;  %v2284_v63 = vpack.c.bf16 %v4588_v49, %v4572_v23  ;;  %v4590_v42 = vpop.eup %4589 }
 0x5ba   : > { %v1658_v27 = vmul.f32 %v4590_v42, %v6083_v13 }
 0x5bb   : > { %2328 = vmatmul.bf16.gmra.mxu0 %v2284_v63  ;;  %v6176_v54 = vpop.xlane.xlu1 %2179 }
 0x5bc   : > { %v4592_v62 = vpop.eup %4591  ;;  %v4342_v4 = vpack.i.bf16 %v1659_v30, %v1658_v27  ;;  %v2193_v27 = vsub.f32 %v5981_v26, %v6130_v19  ;;  %v2196_v26 = vsub.f32 %v6026_v57, %v6159_v20 }
 0x5bd   : > { %v1538_v35 = vpop.xlane.xlu2 %1537  ;;  %v6180_v52 = vmul.f32 %v4592_v62, %v6105_v58  ;;  %v4594_v37 = vpop.eup %4593 }
 0x5be   : > { %4597 = vrcp.f32 %v1538_v35  ;;  %v4596_v13 = vpop.eup %4595 }
 0x5bf   : > { %v1660_v18 = vmul.f32 %v4596_v13, %v6110_v56 }
 0x5c0   : > { %v6182_v23 = vpop.f32.mrf.mxu0 }
 0x5c1   : > { %2245 = vadd.xlane.f32.xlu0 %v4594_v37  ;;  %4343 = vrot.lane.b32.xlu2 %v4342_v4, %s4859_s22  ;;  %v1552_v40 = vpop.xlane.xlu0 %1551  ;;  %v2285_v4 = vpack.c.bf16 %v4594_v37, %v6148_v36  ;;  %v7550_v36 = vld [vmem:[#allocation6_spill] sm:$0xff]  ;;  %v6206_v37 = vpop.f32.mrf.mxu2 }
 0x5c2   : > { %4599 = vrcp.f32 %v1552_v40  ;;  %v2215_v40 = vmul.f32 1.442695, %v2193_v27 }
 0x5c3   : > { %4191 = vmatmul.msk.bf16.gmra.mxu2 %vm995_vm5, %v7549_v47  ;;  %v1554_v63 = vpop.xlane.xlu1 %1553 }
 0x5c4   : > { %v4598_v51 = vpop.eup %4597  ;;  %4601 = vrcp.f32 %v1554_v63 }
 0x5c5   : > { %v6187_v49 = vpop.xlane.xlu2 %1187  ;;  %v1661_v58 = vmul.f32 %v4598_v51, %v6121_v16  ;;  %4603 = vpow2.f32 %v2215_v40 }
 0x5c7   : > { %v4347_v62 = vpack.i.bf16 %v1661_v58, %v1660_v18  ;;  %v2221_v58 = vmul.f32 1.442695, %v2196_v26 }
 0x5c8   : > { %v4600_v30 = vpop.eup %4599  ;;  %v1646_v42 = vpop.f32.mrf.mxu0 }
 0x5c9   : > { %v6193_v35 = vmul.f32 %v4600_v30, %v1646_v42  ;;  %4348 = vrot.lane.b32.xlu1 %v4347_v62, %s4859_s22  ;;  %v2198_v42 = vsub.f32 %v6030_v48, %v6163_v60  ;;  %v6211_v27 = vpop.f32.mrf.mxu2 }
 0x5ca   : > { %v4602_v16 = vpop.eup %4601 }
 0x5cb   : > { %2333 = vmatmul.bf16.gmra.mxu0 %v2285_v4  ;;  %v4604_v63 = vpop.eup %4603 }
 0x5cd   : > { %v2170_v47 = vpop.xlane.xlu2 %2169 }
 0x5ce   : > { %v2194_v56 = vsub.f32 %v6056_v25, %v2170_v47 }
 0x5d0   : > { %v2217_v13 = vmul.f32 1.442695, %v2194_v56  ;;  %v1648_v51 = vpop.f32.mrf.mxu0 }
 0x5d1   : > { %v6198_v18 = vmul.f32 %v4602_v16, %v1648_v51 }
 0x5d2   : > { %4605 = vpow2.f32 %v2217_v13  ;;  %v2197_v13 = vsub.f32 %v6038_v34, %v6172_v46 }
 0x5d3   : > { %4192 = vmatmul.msk.bf16.gmra.mxu2 %vm995_vm5, %v7550_v36  ;;  %4607 = vrcp.f32 %v6140_v3  ;;  %v2225_v3 = vmul.f32 1.442695, %v2198_v42 }
 0x5d5   : > { %v1544_v25 = vpop.xlane.xlu2 %1543 }
 0x5d6   : > { %4609 = vrcp.f32 %v1544_v25 }
 0x5d7   : > { %4611 = vpow2.f32 %v2221_v58 }
 0x5d8   : > { %v4606_v30 = vpop.eup %4605  ;;  %4613 = vpow2.f32 %v2225_v3  ;;  %v2199_v3 = vsub.f32 %v6043_v41, %v6176_v54 }
 0x5d9   : > { %2249 = vadd.xlane.f32.xlu0 %v4606_v30  ;;  %v2286_v57 = vpack.c.bf16 %v4606_v30, %v4604_v63  ;;  %v4608_v20 = vpop.eup %4607 }
 0x5da   : > { %v6214_v4 = vmul.f32 %v4608_v20, %v6153_v2  ;;  %v7551_v2 = vld [vmem:[#allocation8_spill] sm:$0xff] }
 0x5db   : > { %2338 = vmatmul.bf16.gmra.mxu0 %v2286_v57  ;;  %v7552_v57 = vld [vmem:[#allocation11_spill] sm:$0xff] }
 0x5dc   : > { %v4610_v62 = vpop.eup %4609 }
 0x5dd   : > { %v6217_v40 = vmul.f32 %v4610_v62, %v6146_v11  ;;  %v2172_v47 = vpop.xlane.xlu2 %2171  ;;  %v4612_v60 = vpop.eup %4611 }
 0x5de   : > { %v2195_v56 = vsub.f32 %v6071_v33, %v2172_v47  ;;  %v6226_v11 = vpop.f32.mrf.mxu2  ;;  %v4614_v26 = vpop.eup %4613  ;;  %v2223_v33 = vmul.f32 1.442695, %v2197_v13 }
 0x5e0   : > { %v2219_v16 = vmul.f32 1.442695, %v2195_v56  ;;  %v2227_v56 = vmul.f32 1.442695, %v2199_v3 }
 0x5e1   : > { %2253 = vadd.xlane.f32.xlu0 %v4612_v60 }
 0x5e2   : > { %4615 = vpow2.f32 %v2219_v16 }
 0x5e3   : > { %4193 = vmatmul.msk.bf16.gmra.mxu2 %vm995_vm5, %v7551_v2 }
 0x5e5   : > { %v1550_v51 = vpop.xlane.xlu2 %1549 }
 0x5e6   : > { %4617 = vrcp.f32 %v1550_v51  ;;  %v6233_v46 = vpop.f32.mrf.mxu2 }
 0x5e7   : > { %4619 = vpow2.f32 %v2223_v33 }
 0x5e8   : > { %v4616_v36 = vpop.eup %4615 }
 0x5e9   : > { %2257 = vadd.xlane.f32.xlu0 %v4614_v26  ;;  %v2287_v25 = vpack.c.bf16 %v4612_v60, %v4616_v36  ;;  %v7553_v60 = vld [vmem:[#allocation12_spill] sm:$0xff] }
 0x5ea   : > { %2247 = vadd.xlane.f32.xlu2 %v4604_v63 }
 0x5eb   : > { %2343 = vmatmul.bf16.gmra.mxu0 %v2287_v25 }
 0x5ec   : > { %v4618_v58 = vpop.eup %4617 }
 0x5ed   : > { %v6229_v30 = vmul.f32 %v4618_v58, %v6182_v23  ;;  %v4620_v42 = vpop.eup %4619  ;;  %v2182_v20 = vpop.xlane.xlu2 %2181 }
 0x5ee   : > { %v2200_v63 = vsub.f32 %v6086_v55, %v2182_v20  ;;  %v2288_v62 = vpack.c.bf16 %v4614_v26, %v4620_v42  ;;  %v6240_v23 = vpop.f32.mrf.mxu2  ;;  %v2186_v55 = vpop.xlane.xlu0 %2185 }
 0x5ef   : > { %v2202_v33 = vsub.f32 %v6052_v45, %v2186_v55 }
 0x5f0   : > { %v2229_v47 = vmul.f32 1.442695, %v2200_v63 }
 0x5f1   : > { %v2233_v58 = vmul.f32 1.442695, %v2202_v33 }
 0x5f2   : > { %2255 = vadd.xlane.f32.xlu2 %v4620_v42  ;;  %4621 = vpow2.f32 %v2229_v47 }
 0x5f3   : > { %4194 = vmatmul.msk.bf16.gmra.mxu2 %vm995_vm5, %v7552_v57  ;;  %2251 = vadd.xlane.f32.xlu1 %v4616_v36  ;;  %4623 = vpow2.f32 %v2227_v56 }
 0x5f5   : > { %v2184_v13 = vpop.xlane.xlu2 %2183 }
 0x5f6   : > { %v6244_v16 = vpop.f32.mrf.mxu2  ;;  %v2201_v41 = vsub.f32 %v6098_v29, %v2184_v13 }
 0x5f7   : > { %7554 = vst [vmem:[#allocation10_spill] sm:$0xff] %v6244_v16 }
 0x5f8   : > { %v6246_v2 = vpop.eup %4621  ;;  %v2231_v36 = vmul.f32 1.442695, %v2201_v41 }
 0x5f9   : > { %v6248_v51 = vpop.eup %4623 }
 0x5fa   : > { %v2289_v26 = vpack.c.bf16 %v6246_v2, %v6248_v51  ;;  %4625 = vpow2.f32 %v2231_v36 }
 0x5fb   : > { %2348 = vmatmul.bf16.gmra.mxu0 %v2288_v62  ;;  %4627 = vpow2.f32 %v2233_v58 }
 0x5fc   : > { %4629 = vrcp.f32 %v6059_v22 }
 0x5fe   : > { %v6256_v42 = vpop.f32.mrf.mxu2 }
 0x600   : > { %v6263_v20 = vpop.eup %4625  ;;  %v2238_v63 = vpop.xlane.xlu0 %2237 }
 0x601   : > { %v6267_v62 = vpop.eup %4627  ;;  %4631 = vrcp.f32 %v2238_v63 }
 0x602   : > { %v2290_v47 = vpack.c.bf16 %v6267_v62, %v6263_v20  ;;  %v4630_v56 = vpop.eup %4629 }
 0x603   : > { %4195 = vmatmul.msk.bf16.gmra.mxu2 %vm995_vm5, %v7553_v60  ;;  %v1302_v60 = vmul.f32 %v4630_v56, %v6064_v17 }
 0x607   : > { %v4632_v41 = vpop.eup %4631 }
 0x608   : > { %v6251_v54 = vpop.f32.mrf.mxu0 }
 0x60b   : > { %2353 = vmatmul.bf16.gmra.mxu0 %v2289_v26 }
 0x60c   : > { %v2236_v25 = vpop.xlane.xlu2 %2235 }
 0x60d   : > { %4633 = vrcp.f32 %v2236_v25 }
 0x60e   : > { %4635 = vrcp.f32 %v6125_v38 }
 0x60f   : > { %4637 = vrcp.f32 %v6138_v61 }
 0x610   : > { %v6258_v57 = vpop.f32.mrf.mxu0 }
 0x613   : > { %4196 = vmatmul.msk.bf16.gmra.mxu2 %vm995_vm5, %v5687_v5  ;;  %v4634_v33 = vpop.eup %4633 }
 0x614   : > { %v2240_v29 = vpop.xlane.xlu2 %2239  ;;  %v4636_v63 = vpop.eup %4635 }
 0x615   : > { %v1305_v19 = vmul.f32 %v4636_v63, %v6092_v8  ;;  %4639 = vrcp.f32 %v2240_v29 }
 0x616   : > { %v6265_v45 = vpop.f32.mrf.mxu2 }
 0x617   : > { %7555 = vst [vmem:[#allocation9_spill] sm:$0xff] %v6265_v45 }
 0x618   : > { %v2324_v3 = vpop.f32.mrf.mxu0 }
 0x619   : > { %v2364_v58 = vmul.f32 %v4634_v33, %v2324_v3 }
 0x61b   : > { %2358 = vmatmul.bf16.gmra.mxu0 %v2290_v47  ;;  %v6272_v5 = vpop.permute.xlu1 %4338 }
 0x61c   : > { %v2244_v22 = vpop.xlane.xlu2 %2243  ;;  %v4340_v13 = vunpack.i.l.bf16 %v6272_v5 }
 0x61e   : > { %v6276_v55 = vpop.f32.mrf.mxu2  ;;  %v6279_v26 = vsel %vm995_vm5, %v1302_v60, %v4340_v13 }
 0x61f   : > { %7556 = vst [vmem:[#allocation13_spill] sm:$0xff] %v6276_v55 }
 0x620   : > { %v2326_v36 = vpop.f32.mrf.mxu0 }
 0x621   : > { %v2365_v25 = vmul.f32 %v4632_v41, %v2326_v36 }
 0x623   : > { %v4352_v47 = vpack.i.bf16 %v2365_v25, %v2364_v58 }
 0x624   : > { %v4344_v38 = vpop.permute.xlu2 %4343 }
 0x625   : > { %v4346_v34 = vunpack.i.h.bf16 %v4344_v38  ;;  %v4345_v48 = vunpack.i.l.bf16 %v4344_v38  ;;  %4353 = vrot.lane.b32.xlu0 %v4352_v47, %s4860_s23 }
 0x626   : > { %v1761_v17 = vpop.f32.mrf.mxu2 }
 0x627   : > { %v6284_v56 = vsel %vm995_vm5, %v1305_v19, %v4346_v34  ;;  %v6288_v60 = vsel %vm995_vm5, %v6081_v50, %v4345_v48  ;;  %v6291_v3 = vadd.f32 %v1761_v17, %v5694_v39  ;;  %v4638_v48 = vpop.eup %4637 }
 0x628   : > { %v1307_v36 = vmul.f32 %v4638_v48, %v6116_v44  ;;  %v4640_v47 = vpop.eup %4639 }
 0x629   : > { %1801 = vmax.xlane.f32.xlu1 %v6291_v3 }
 0x62c   : > { %v2242_v19 = vpop.xlane.xlu0 %2241 }
 0x62d   : > { %4641 = vrcp.f32 %v2242_v19 }
 0x62e   : > { %v1763_v13 = vpop.f32.mrf.mxu2  ;;  %4643 = vrcp.f32 %v2244_v22 }
 0x62f   : > { %v6295_v8 = vadd.f32 %v1763_v13, %v5694_v39 }
 0x631   : > { %1803 = vmax.xlane.f32.xlu2 %v6295_v8 }
 0x633   : > { %v4642_v17 = vpop.eup %4641 }
 0x636   : > { %v1766_v41 = vpop.f32.mrf.mxu2 }
 0x637   : > { %v6300_v34 = vadd.f32 %v1766_v41, %v5694_v39 }
 0x638   : > { %v2329_v50 = vpop.f32.mrf.mxu0 }
 0x639   : > { %1805 = vmax.xlane.f32.xlu2 %v6300_v34  ;;  %v2366_v41 = vmul.f32 %v4640_v47, %v2329_v50 }
 0x63b   : > { %v4349_v33 = vpop.permute.xlu1 %4348 }
 0x63c   : > { %v4351_v58 = vunpack.i.h.bf16 %v4349_v33  ;;  %v4350_v25 = vunpack.i.l.bf16 %v4349_v33  ;;  %v2246_v33 = vpop.xlane.xlu0 %2245 }
 0x63d   : > { %4645 = vrcp.f32 %v2246_v33 }
 0x63e   : > { %v1768_v63 = vpop.f32.mrf.mxu2  ;;  %v6306_v61 = vsel %vm995_vm5, %v6180_v52, %v4350_v25  ;;  %v6309_v38 = vsel %vm995_vm5, %v1307_v36, %v4351_v58  ;;  %v4644_v58 = vpop.eup %4643 }
 0x63f   : > { %v6312_v29 = vadd.f32 %v1768_v63, %v5694_v39 }
 0x640   : > { %v2331_v13 = vpop.f32.mrf.mxu0 }
 0x641   : > { %v2367_v19 = vmul.f32 %v4642_v17, %v2331_v13  ;;  %1807 = vmax.xlane.f32.xlu1 %v6312_v29 }
 0x643   : > { %v4357_v44 = vpack.i.bf16 %v2367_v19, %v2366_v41  ;;  %v4646_v63 = vpop.eup %4645 }
 0x645   : > { %4358 = vrot.lane.b32.xlu0 %v4357_v44, %s4860_s23 }
 0x646   : > { %v1771_v48 = vpop.f32.mrf.mxu2 }
 0x647   : > { %v6317_v52 = vadd.f32 %v1771_v48, %v5694_v39 }
 0x648   : > { %v2334_v25 = vpop.f32.mrf.mxu0 }
 0x649   : > { %1809 = vmax.xlane.f32.xlu1 %v6317_v52  ;;  %v2368_v17 = vmul.f32 %v4644_v58, %v2334_v25 }
 0x64c   : > { %v2250_v48 = vpop.xlane.xlu0 %2249 }
 0x64d   : > { %4647 = vrcp.f32 %v2250_v48 }
 0x64e   : > { %v1773_v36 = vpop.f32.mrf.mxu2 }
 0x64f   : > { %v6321_v50 = vadd.f32 %v1773_v36, %v5694_v39 }
 0x650   : > { %v2336_v47 = vpop.f32.mrf.mxu0 }
 0x651   : > { %v2369_v13 = vmul.f32 %v4646_v63, %v2336_v47  ;;  %2261 = vadd.xlane.f32.xlu1 %v6246_v2  ;;  %1811 = vmax.xlane.f32.xlu2 %v6321_v50 }
 0x653   : > { %v4362_v41 = vpack.i.bf16 %v2369_v13, %v2368_v17  ;;  %v4648_v2 = vpop.eup %4647 }
 0x654   : > { %v2254_v13 = vpop.xlane.xlu0 %2253 }
 0x655   : > { %4363 = vrot.lane.b32.xlu0 %v4362_v41, %s4860_s23 }
 0x656   : > { %v1776_v22 = vpop.f32.mrf.mxu2 }
 0x657   : > { %v6327_v19 = vadd.f32 %v1776_v22, %v5694_v39 }
 0x658   : > { %v2339_v44 = vpop.f32.mrf.mxu0 }
 0x659   : > { %1813 = vmax.xlane.f32.xlu2 %v6327_v19 }
 0x65d   : > { %v2248_v33 = vpop.xlane.xlu2 %2247 }
 0x65e   : > { %4649 = vrcp.f32 %v2248_v33  ;;  %v1778_v25 = vpop.f32.mrf.mxu2 }
 0x660   : > { %v2341_v36 = vpop.f32.mrf.mxu0 }
 0x661   : > { %2259 = vadd.xlane.f32.xlu2 %v6248_v51  ;;  %v2371_v47 = vmul.f32 %v4648_v2, %v2341_v36  ;;  %v2258_v36 = vpop.xlane.xlu0 %2257 }
 0x664   : > { %v4650_v58 = vpop.eup %4649 }
 0x665   : > { %v2370_v63 = vmul.f32 %v4650_v58, %v2339_v44  ;;  %v2256_v58 = vpop.xlane.xlu2 %2255 }
 0x666   : > { %v1781_v17 = vpop.f32.mrf.mxu2  ;;  %v2252_v22 = vpop.xlane.xlu1 %2251 }
 0x667   : > { %v4372_v41 = vpack.i.bf16 %v2371_v47, %v2370_v63  ;;  %4651 = vrcp.f32 %v2252_v22 }
 0x668   : > { %v2344_v43 = vpop.f32.mrf.mxu0  ;;  %4653 = vrcp.f32 %v2254_v13 }
 0x669   : > { %1191 = vadd.xlane.f32.xlu2 %v5994_v9  ;;  %4655 = vrcp.f32 %v2258_v36  ;;  %v6340_v9 = vadd.f32 %v1778_v25, %v5694_v39  ;;  %v6354_v25 = vadd.f32 %v1781_v17, %v5694_v39 }
 0x66a   : > { %4373 = vrot.lane.b32.xlu1 %v4372_v41, %s4860_s23  ;;  %4657 = vrcp.f32 %v2256_v58 }
 0x66d   : > { %v4652_v48 = vpop.eup %4651 }
 0x66e   : > { %v1783_v33 = vpop.f32.mrf.mxu2  ;;  %v4654_v55 = vpop.eup %4653  ;;  %v6333_v51 = vmul.f32 %v4652_v48, %v2344_v43 }
 0x66f   : > { %v4656_v13 = vpop.eup %4655 }
 0x670   : > { %v2346_v45 = vpop.f32.mrf.mxu0  ;;  %v4658_v43 = vpop.eup %4657 }
 0x671   : > { %v6335_v16 = vmul.f32 %v4654_v55, %v2346_v45 }
 0x676   : > { %v1786_v2 = vpop.f32.mrf.mxu2 }
 0x678   : > { %v2349_v63 = vpop.f32.mrf.mxu0 }
 0x679   : > { %v6346_v55 = vmul.f32 %v4658_v43, %v2349_v63  ;;  %v6363_v63 = vadd.f32 %v1783_v33, %v5694_v39 }
 0x67e   : > { %v1788_v47 = vpop.f32.mrf.mxu2 }
 0x67f   : > { %v6343_v41 = vadd.f32 %v1788_v47, %v5694_v39  ;;  %1815 = vmax.xlane.f32.xlu0 %v6340_v9 }
 0x680   : > { %v2351_v45 = vpop.f32.mrf.mxu0 }
 0x681   : > { %v6348_v22 = vmul.f32 %v4656_v13, %v2351_v45  ;;  %1823 = vmax.xlane.f32.xlu2 %v6343_v41  ;;  %v7557_v13 = vpack.i.bf16 %v6155_v12, %v6157_v7  ;;  %v7558_v45 = vpack.i.bf16 %v6214_v4, %v6217_v40 }
 0x686   : > { %v1791_v36 = vpop.f32.mrf.mxu2 }
 0x687   : > { %v6357_v58 = vadd.f32 %v1791_v36, %v5694_v39  ;;  %1817 = vmax.xlane.f32.xlu0 %v6354_v25 }
 0x689   : > { %1825 = vmax.xlane.f32.xlu2 %v6357_v58 }
 0x68e   : > { %v1793_v47 = vpop.f32.mrf.mxu2 }
 0x694   : > { %1555 = vadd.xlane.f32.xlu1 %v6112_v59  ;;  %v6376_v59 = vadd.f32 %v1786_v2, %v5694_v39 }
 0x696   : > { %v6379_v48 = vpop.f32.mrf.mxu2 }
 0x69b   : > { %4368 = vrot.lane.b32.xlu0 %v7557_v13, %s4859_s22 }
 0x69c   : > { %1819 = vmax.xlane.f32.xlu1 %v6363_v63  ;;  %v1802_v17 = vpop.xlane.xlu1 %1801 }
 0x69d   : > { %v1833_v43 = vsub.f32 %v6291_v3, %v1802_v17 }
 0x69e   : > { %v1798_v40 = vpop.f32.mrf.mxu2 }
 0x69f   : > { %v1849_v33 = vmul.f32 1.442695, %v1833_v43  ;;  %v6385_v43 = vadd.f32 %v1798_v40, %v5694_v39 }
 0x6a1   : > { %4378 = vrot.lane.b32.xlu2 %v7558_v45, %s4859_s22  ;;  %4659 = vpow2.f32 %v1849_v33 }
 0x6a4   : > { %v1804_v36 = vpop.xlane.xlu2 %1803  ;;  %1821 = vmax.xlane.f32.xlu1 %v6376_v59 }
 0x6a5   : > { %v1834_v12 = vsub.f32 %v6295_v8, %v1804_v36 }
 0x6a7   : > { %v1851_v7 = vmul.f32 1.442695, %v1834_v12  ;;  %v4660_v13 = vpop.eup %4659 }
 0x6a9   : > { %4661 = vpow2.f32 %v1851_v7 }
 0x6ac   : > { %2263 = vadd.xlane.f32.xlu1 %v6263_v20  ;;  %v1806_v3 = vpop.xlane.xlu2 %1805 }
 0x6ad   : > { %v1835_v2 = vsub.f32 %v6300_v34, %v1806_v3 }
 0x6af   : > { %v4662_v4 = vpop.eup %4661  ;;  %v1853_v45 = vmul.f32 1.442695, %v1835_v2 }
 0x6b0   : > { %v1929_v17 = vpack.c.bf16 %v4662_v4, %v4660_v13 }
 0x6b1   : > { %4663 = vpow2.f32 %v1853_v45 }
 0x6b2   : > { %1969 = vmatmul.bf16.vlgmr.msrb.gmra.mxu1 %v1929_v17 }
 0x6b4   : > { %v1808_v44 = vpop.xlane.xlu1 %1807  ;;  %1831 = vmax.xlane.f32.xlu1 %v6385_v43 }
 0x6b5   : > { %v1836_v8 = vsub.f32 %v6312_v29, %v1808_v44 }
 0x6b7   : > { %v1855_v33 = vmul.f32 1.442695, %v1836_v8  ;;  %v4664_v36 = vpop.eup %4663 }
 0x6b9   : > { %4665 = vpow2.f32 %v1855_v33 }
 0x6bc   : > { %1883 = vadd.xlane.f32.xlu1 %v4662_v4  ;;  %v1810_v20 = vpop.xlane.xlu1 %1809 }
 0x6bd   : > { %v1837_v34 = vsub.f32 %v6317_v52, %v1810_v20  ;;  %v2354_v20 = vpop.f32.mrf.mxu0 }
 0x6bf   : > { %v4666_v12 = vpop.eup %4665  ;;  %v1857_v3 = vmul.f32 1.442695, %v1837_v34 }
 0x6c0   : > { %v1930_v7 = vpack.c.bf16 %v4666_v12, %v4664_v36 }
 0x6c1   : > { %4667 = vpow2.f32 %v1857_v3 }
 0x6c2   : > { %1974 = vmatmul.bf16.gmra.mxu1 %v1930_v7 }
 0x6c4   : > { %v1812_v40 = vpop.xlane.xlu2 %1811  ;;  %1887 = vadd.xlane.f32.xlu1 %v4666_v12  ;;  %v2262_v8 = vpop.xlane.xlu1 %2261 }
 0x6c5   : > { %v1838_v2 = vsub.f32 %v6321_v50, %v1812_v40  ;;  %1189 = vadd.xlane.f32.xlu0 %v5992_v6  ;;  %v6395_v50 = vadd.f32 %v1793_v47, %v5694_v39  ;;  %v6398_v12 = vpop.permute.xlu0 %4353  ;;  %v2356_v7 = vpop.f32.mrf.mxu0 }
 0x6c7   : > { %v1859_v17 = vmul.f32 1.442695, %v1838_v2  ;;  %v4668_v4 = vpop.eup %4667 }
 0x6c9   : > { %4669 = vpow2.f32 %v1859_v17  ;;  %v6412_v17 = vadd.f32 %v6379_v48, %v5694_v39 }
 0x6cc   : > { %v1814_v29 = vpop.xlane.xlu2 %1813 }
 0x6cd   : > { %v1839_v44 = vsub.f32 %v6327_v19, %v1814_v29  ;;  %1557 = vadd.xlane.f32.xlu0 %v6108_v28  ;;  %v6408_v2 = vpop.permute.xlu0 %4358 }
 0x6cf   : > { %v4670_v45 = vpop.eup %4669  ;;  %v1861_v52 = vmul.f32 1.442695, %v1839_v44 }
 0x6d0   : > { %1891 = vadd.xlane.f32.xlu1 %v4670_v45  ;;  %v1931_v33 = vpack.c.bf16 %v4670_v45, %v4668_v4 }
 0x6d1   : > { %4671 = vpow2.f32 %v1861_v52 }
 0x6d2   : > { %1979 = vmatmul.bf16.gmra.mxu1 %v1931_v33  ;;  %4673 = vrcp.f32 %v2262_v8 }
 0x6d4   : > { %v2260_v6 = vpop.xlane.xlu2 %2259 }
 0x6d5   : > { %4675 = vrcp.f32 %v2260_v6  ;;  %1827 = vmax.xlane.f32.xlu0 %v6395_v50  ;;  %v6415_v29 = vpop.permute.xlu0 %4363 }
 0x6d7   : > { %v4672_v19 = vpop.eup %4671 }
 0x6d8   : > { %1893 = vadd.xlane.f32.xlu2 %v4672_v19  ;;  %v4674_v28 = vpop.eup %4673 }
 0x6d9   : > { %v6400_v3 = vmul.f32 %v4674_v28, %v2356_v7 }
 0x6db   : > { %v4676_v34 = vpop.eup %4675 }
 0x6dc   : > { %v6402_v40 = vmul.f32 %v4676_v34, %v2354_v20  ;;  %v6419_v39 = vpop.permute.xlu1 %4373 }
 0x6dd   : > { %2265 = vadd.xlane.f32.xlu0 %v6267_v62 }
 0x6de   : > { %v4437_v47 = vpack.i.bf16 %v6400_v3, %v6402_v40 }
 0x6e0   : > { %1193 = vadd.xlane.f32.xlu2 %v6007_v31 }
 0x6e5   : > { %1829 = vmax.xlane.f32.xlu0 %v6412_v17 }
 0x6ed   : > { %1881 = vadd.xlane.f32.xlu0 %v4660_v13 }
 0x6f2   : > { %v1816_v44 = vpop.xlane.xlu0 %1815 }
 0x6f3   : > { %v1840_v45 = vsub.f32 %v6340_v9, %v1816_v44  ;;  %v6422_v9 = vpop.xlane.xlu2 %1191 }
 0x6f5   : > { %v1863_v62 = vmul.f32 1.442695, %v1840_v45  ;;  %1885 = vadd.xlane.f32.xlu0 %v4664_v36 }
 0x6f7   : > { %4677 = vpow2.f32 %v1863_v62 }
 0x6fa   : > { %v1818_v52 = vpop.xlane.xlu0 %1817 }
 0x6fb   : > { %v1841_v31 = vsub.f32 %v6354_v25, %v1818_v52 }
 0x6fd   : > { %v4678_v8 = vpop.eup %4677  ;;  %v1865_v33 = vmul.f32 1.442695, %v1841_v31  ;;  %1889 = vadd.xlane.f32.xlu0 %v4668_v4  ;;  %v1824_v4 = vpop.xlane.xlu2 %1823 }
 0x6fe   : > { %v1932_v20 = vpack.c.bf16 %v4678_v8, %v4672_v19 }
 0x6ff   : > { %4679 = vpow2.f32 %v1865_v33 }
 0x700   : > { %1984 = vmatmul.bf16.gmra.mxu1 %v1932_v20  ;;  %4681 = vrcp.f32 %v6187_v49  ;;  %v1844_v20 = vsub.f32 %v6343_v41, %v1824_v4 }
 0x705   : > { %v4680_v48 = vpop.eup %4679  ;;  %1895 = vadd.xlane.f32.xlu0 %v4678_v8  ;;  %v1826_v31 = vpop.xlane.xlu2 %1825 }
 0x706   : > { %1897 = vadd.xlane.f32.xlu1 %v4680_v48  ;;  %v4682_v36 = vpop.eup %4681 }
 0x707   : > { %v1556_v13 = vpop.xlane.xlu1 %1555  ;;  %v1309_v25 = vmul.f32 %v4682_v36, %v6206_v37  ;;  %v7559_v37 = vpack.i.bf16 %v6335_v16, %v6333_v51  ;;  %v7561_v16 = vpack.i.bf16 %v6348_v22, %v6346_v55 }
 0x70d   : > { %v4369_v6 = vpop.permute.xlu0 %4368 }
 0x70e   : > { %v4371_v28 = vunpack.i.h.bf16 %v4369_v6  ;;  %v4370_v34 = vunpack.i.l.bf16 %v4369_v6 }
 0x70f   : > { %v1820_v19 = vpop.xlane.xlu1 %1819 }
 0x710   : > { %v6426_v7 = vsel %vm995_vm5, %v1309_v25, %v4371_v28  ;;  %v6430_v44 = vsel %vm995_vm5, %v6134_v0, %v4370_v34  ;;  %v1842_v49 = vsub.f32 %v6363_v63, %v1820_v19  ;;  %v1845_v0 = vsub.f32 %v6357_v58, %v1826_v31 }
 0x711   : > { %v1871_v63 = vmul.f32 1.442695, %v1844_v20 }
 0x712   : > { %v1867_v45 = vmul.f32 1.442695, %v1842_v49  ;;  %v1873_v6 = vmul.f32 1.442695, %v1845_v0 }
 0x714   : > { %4683 = vpow2.f32 %v1867_v45 }
 0x717   : > { %v1822_v62 = vpop.xlane.xlu1 %1821 }
 0x718   : > { %v1843_v52 = vsub.f32 %v6376_v59, %v1822_v62  ;;  %v7560_v59 = vpack.i.bf16 %v6229_v30, %v6170_v10  ;;  %v4292_v10 = vld [vmem:[%s7506_s5 + $0x8] sm:$0xff] }
 0x719   : > { %4383 = vrot.lane.b32.xlu0 %v7559_v37, %s4860_s23  ;;  %2680 = vmatpush.bf16.msra.mxu2 %v4292_v10 }
 0x71a   : > { %v4684_v8 = vpop.eup %4683  ;;  %v1869_v33 = vmul.f32 1.442695, %v1843_v52  ;;  %v2359_v52 = vpop.f32.mrf.mxu0 }
 0x71b   : > { %v1933_v36 = vpack.c.bf16 %v4684_v8, %v4680_v48 }
 0x71c   : > { %4685 = vpow2.f32 %v1869_v33 }
 0x71d   : > { %1989 = vmatmul.bf16.gmra.mxu1 %v1933_v36  ;;  %4687 = vpow2.f32 %v1871_v63 }
 0x71e   : > { %4689 = vpow2.f32 %v1873_v6 }
 0x71f   : > { %4388 = vrot.lane.b32.xlu1 %v7560_v59, %s4859_s22  ;;  %4691 = vrcp.f32 %v1556_v13  ;;  %v2264_v22 = vpop.xlane.xlu1 %2263 }
 0x722   : > { %v4686_v25 = vpop.eup %4685  ;;  %v2361_v36 = vpop.f32.mrf.mxu0 }
 0x723   : > { %1901 = vadd.xlane.f32.xlu2 %v4686_v25  ;;  %v4688_v51 = vpop.eup %4687 }
 0x724   : > { %v4690_v41 = vpop.eup %4689  ;;  %v1934_v58 = vpack.c.bf16 %v4688_v51, %v4686_v25 }
 0x725   : > { %v4692_v34 = vpop.eup %4691 }
 0x726   : > { %v6454_v4 = vmul.f32 %v4692_v34, %v6251_v54 }
 0x727   : > { %4393 = vrot.lane.b32.xlu1 %v7561_v16, %s4860_s23 }
 0x72b   : > { %1905 = vadd.xlane.f32.xlu2 %v4690_v41 }
 0x72d   : > { %1994 = vmatmul.bf16.gmra.mxu1 %v1934_v58 }
 0x72f   : > { %v1970_v28 = vpop.f32.mrf.mxu1 }
 0x737   : > { %v1972_v31 = vpop.f32.mrf.mxu1 }
 0x738   : > { %v6451_v30 = vpop.xlane.xlu0 %1189 }
 0x73f   : > { %v1975_v0 = vpop.f32.mrf.mxu1 }
 0x740   : > { %v1558_v48 = vpop.xlane.xlu0 %1557 }
 0x741   : > { %4693 = vrcp.f32 %v1558_v48 }
 0x743   : > { %1899 = vadd.xlane.f32.xlu0 %v4684_v8  ;;  %v1832_v8 = vpop.xlane.xlu1 %1831 }
 0x747   : > { %v4694_v55 = vpop.eup %4693  ;;  %v1977_v58 = vpop.f32.mrf.mxu1 }
 0x748   : > { %v6457_v19 = vmul.f32 %v4694_v55, %v6258_v57  ;;  %v1828_v49 = vpop.xlane.xlu0 %1827  ;;  %v1848_v57 = vsub.f32 %v6385_v43, %v1832_v8  ;;  %v4291_v8 = vld [vmem:[%s7506_s5] sm:$0xff] }
 0x749   : > { %v1846_v45 = vsub.f32 %v6395_v50, %v1828_v49  ;;  %2681 = vmatpush.bf16.msra.mxu2 %v4291_v8 }
 0x74a   : > { %v4442_v62 = vpack.i.bf16 %v6457_v19, %v6454_v4 }
 0x74b   : > { %v1875_v13 = vmul.f32 1.442695, %v1846_v45  ;;  %1195 = vadd.xlane.f32.xlu0 %v6013_v32  ;;  %v1879_v32 = vmul.f32 1.442695, %v1848_v57 }
 0x74d   : > { %4695 = vpow2.f32 %v1875_v13 }
 0x74e   : > { %4697 = vrcp.f32 %v2264_v22 }
 0x750   : > { %v2266_v37 = vpop.xlane.xlu0 %2265 }
 0x751   : > { %4699 = vrcp.f32 %v2266_v37  ;;  %v1980_v37 = vpop.f32.mrf.mxu1 }
 0x752   : > { %4701 = vpow2.f32 %v1879_v32 }
 0x753   : > { %v4696_v54 = vpop.eup %4695  ;;  %1903 = vadd.xlane.f32.xlu0 %v4688_v51  ;;  %v1884_v51 = vpop.xlane.xlu1 %1883 }
 0x754   : > { %1907 = vadd.xlane.f32.xlu1 %v4696_v54  ;;  %v1935_v33 = vpack.c.bf16 %v4696_v54, %v4690_v41  ;;  %v4698_v50 = vpop.eup %4697 }
 0x755   : > { %v6464_v63 = vmul.f32 %v4698_v50, %v2359_v52 }
 0x756   : > { %1999 = vmatmul.bf16.gmra.mxu1 %v1935_v33 }
 0x757   : > { %v4700_v20 = vpop.eup %4699 }
 0x758   : > { %v6466_v59 = vmul.f32 %v4700_v20, %v2361_v36  ;;  %v1830_v6 = vpop.xlane.xlu0 %1829  ;;  %v4702_v10 = vpop.eup %4701 }
 0x759   : > { %v1847_v25 = vsub.f32 %v6412_v17, %v1830_v6  ;;  %v6475_v36 = vpop.permute.xlu2 %4378  ;;  %v1982_v32 = vpop.f32.mrf.mxu1 }
 0x75a   : > { %v4452_v16 = vpack.i.bf16 %v6466_v59, %v6464_v63 }
 0x75b   : > { %v1877_v43 = vmul.f32 1.442695, %v1847_v25  ;;  %v1888_v22 = vpop.xlane.xlu1 %1887 }
 0x75d   : > { %4703 = vpow2.f32 %v1877_v43 }
 0x75e   : > { %4705 = vrcp.f32 %v1884_v51 }
 0x760   : > { %v1882_v41 = vpop.xlane.xlu0 %1881 }
 0x761   : > { %4707 = vrcp.f32 %v1882_v41 }
 0x762   : > { %4709 = vrcp.f32 %v1888_v22 }
 0x763   : > { %v4704_v48 = vpop.eup %4703  ;;  %v1892_v54 = vpop.xlane.xlu1 %1891 }
 0x764   : > { %1909 = vadd.xlane.f32.xlu0 %v4704_v48  ;;  %v1936_v34 = vpack.c.bf16 %v4702_v10, %v4704_v48  ;;  %v4706_v55 = vpop.eup %4705 }
 0x765   : > { %v2011_v17 = vmul.f32 %v4706_v55, %v1972_v31 }
 0x766   : > { %2004 = vmatmul.bf16.gmra.mxu1 %v1936_v34 }
 0x767   : > { %v4708_v49 = vpop.eup %4707 }
 0x768   : > { %v2010_v45 = vmul.f32 %v4708_v49, %v1970_v28  ;;  %v1886_v13 = vpop.xlane.xlu0 %1885  ;;  %v4710_v57 = vpop.eup %4709 }
 0x769   : > { %4711 = vrcp.f32 %v1886_v13  ;;  %v2013_v31 = vmul.f32 %v4710_v57, %v1977_v58 }
 0x76a   : > { %v4397_v52 = vpack.i.bf16 %v2011_v17, %v2010_v45  ;;  %4713 = vrcp.f32 %v1892_v54 }
 0x76c   : > { %1911 = vadd.xlane.f32.xlu0 %v4702_v10  ;;  %4398 = vrot.lane.b32.xlu2 %v4397_v52, %s4861_s29  ;;  %v1894_v10 = vpop.xlane.xlu2 %1893 }
 0x76f   : > { %v4712_v33 = vpop.eup %4711 }
 0x770   : > { %v2012_v50 = vmul.f32 %v4712_v33, %v1975_v0  ;;  %v1890_v28 = vpop.xlane.xlu0 %1889  ;;  %v4714_v6 = vpop.eup %4713 }
 0x771   : > { %4715 = vrcp.f32 %v1890_v28  ;;  %v2015_v51 = vmul.f32 %v4714_v6, %v1982_v32 }
 0x772   : > { %v4402_v20 = vpack.i.bf16 %v2013_v31, %v2012_v50  ;;  %4717 = vrcp.f32 %v1894_v10 }
 0x774   : > { %4403 = vrot.lane.b32.xlu1 %v4402_v20, %s4861_s29  ;;  %v6481_v45 = vpop.xlane.xlu2 %1193 }
 0x777   : > { %v4716_v25 = vpop.eup %4715 }
 0x778   : > { %v2014_v43 = vmul.f32 %v4716_v25, %v1980_v37  ;;  %v1896_v48 = vpop.xlane.xlu0 %1895  ;;  %v4718_v0 = vpop.eup %4717 }
 0x779   : > { %4719 = vrcp.f32 %v1896_v48  ;;  %v1898_v37 = vpop.xlane.xlu1 %1897 }
 0x77a   : > { %v4407_v41 = vpack.i.bf16 %v2015_v51, %v2014_v43  ;;  %4721 = vrcp.f32 %v1898_v37 }
 0x77c   : > { %4408 = vrot.lane.b32.xlu2 %v4407_v41, %s4861_s29 }
 0x77d   : > { %v1985_v34 = vpop.f32.mrf.mxu1 }
 0x77e   : > { %v2016_v22 = vmul.f32 %v4718_v0, %v1985_v34 }
 0x77f   : > { %v4720_v58 = vpop.eup %4719 }
 0x780   : > { %v4722_v33 = vpop.eup %4721 }
 0x785   : > { %v1987_v55 = vpop.f32.mrf.mxu1 }
 0x786   : > { %v2017_v49 = vmul.f32 %v4720_v58, %v1987_v55 }
 0x788   : > { %v4412_v17 = vpack.i.bf16 %v2017_v49, %v2016_v22  ;;  %v4356_v22 = vunpack.i.h.bf16 %v6398_v12 }
 0x78a   : > { %4413 = vrot.lane.b32.xlu2 %v4412_v17, %s4861_s29 }
 0x78b   : > { %v6483_v52 = vpop.permute.xlu0 %4383 }
 0x791   : > { %v6487_v32 = vpop.permute.xlu1 %4388 }
 0x796   : > { %v1902_v8 = vpop.xlane.xlu2 %1901 }
 0x799   : > { %v6503_v17 = vpop.permute.xlu1 %4393 }
 0x79a   : > { %v1990_v13 = vpop.f32.mrf.mxu1 }
 0x79b   : > { %v2018_v50 = vmul.f32 %v4722_v33, %v1990_v13 }
 0x79e   : > { %1197 = vadd.xlane.f32.xlu1 %v6035_v15  ;;  %v1906_v28 = vpop.xlane.xlu2 %1905 }
 0x7a2   : > { %v1992_v57 = vpop.f32.mrf.mxu1 }
 0x7aa   : > { %v1995_v25 = vpop.f32.mrf.mxu1 }
 0x7b3   : > { %1199 = vadd.xlane.f32.xlu2 %v6040_v21  ;;  %v4341_v21 = vunpack.i.h.bf16 %v6272_v5  ;;  %v4355_v5 = vunpack.i.l.bf16 %v6398_v12  ;;  %v7562_v12 = vpack.i.bf16 %v6198_v18, %v6193_v35  ;;  %v4365_v35 = vunpack.i.l.bf16 %v6415_v29 }
 0x7b6   : > { %v1900_v54 = vpop.xlane.xlu0 %1899 }
 0x7b7   : > { %4723 = vrcp.f32 %v1900_v54 }
 0x7b8   : > { %4725 = vrcp.f32 %v6132_v24  ;;  %v4391_v24 = vunpack.i.h.bf16 %v6487_v32 }
 0x7bd   : > { %v4724_v31 = vpop.eup %4723 }
 0x7be   : > { %v2019_v15 = vmul.f32 %v4724_v31, %v1992_v57  ;;  %v1196_v20 = vpop.xlane.xlu0 %1195  ;;  %v4726_v51 = vpop.eup %4725 }
 0x7bf   : > { %4727 = vrcp.f32 %v1196_v20  ;;  %v1303_v41 = vmul.f32 %v4726_v51, %v6074_v1 }
 0x7c0   : > { %v4422_v6 = vpack.i.bf16 %v2019_v15, %v2018_v50  ;;  %4729 = vrcp.f32 %v1902_v8  ;;  %v1997_v8 = vpop.f32.mrf.mxu1 }
 0x7c1   : > { %v2573_v55 = vsel %vm995_vm5, %v1303_v41, %v4341_v21 }
 0x7c2   : > { %4423 = vrot.lane.b32.xlu1 %v4422_v6, %s4861_s29 }
 0x7c5   : > { %v4728_v43 = vpop.eup %4727 }
 0x7c6   : > { %v1313_v10 = vmul.f32 %v4728_v43, %v6240_v23  ;;  %v4399_v48 = vpop.permute.xlu2 %4398  ;;  %v1904_v34 = vpop.xlane.xlu0 %1903  ;;  %v4366_v43 = vunpack.i.h.bf16 %v6415_v29 }
 0x7c7   : > { %v4401_v0 = vunpack.i.h.bf16 %v4399_v48  ;;  %v4400_v58 = vunpack.i.l.bf16 %v4399_v48  ;;  %4731 = vrcp.f32 %v1904_v34  ;;  %v4730_v57 = vpop.eup %4729  ;;  %v1908_v15 = vpop.xlane.xlu1 %1907 }
 0x7c8   : > { %v6498_v1 = vsel %vm995_vm5, %v1313_v10, %v4391_v24  ;;  %v2020_v31 = vmul.f32 %v4730_v57, %v1995_v25  ;;  %4733 = vrcp.f32 %v1906_v28 }
 0x7c9   : > { %v2590_v49 = vsel %vm2588_vm7, %v2573_v55, %v4401_v0  ;;  %v2589_v23 = vsel %vm2588_vm7, %v6279_v26, %v4400_v58  ;;  %4735 = vrcp.f32 %v1908_v15 }
 0x7ca   : > { %v2606_v13 = vsel %vm2605_vm8, %v2589_v23, %v4355_v5  ;;  %v2607_v37 = vsel %vm2605_vm8, %v2590_v49, %v4356_v22 }
 0x7cb   : > { %v2622_v54 = vpack.c.bf16 %v2607_v37, %v2606_v13  ;;  %4418 = vrot.lane.b32.xlu2 %v7562_v12, %s4859_s22  ;;  %v4360_v12 = vunpack.i.l.bf16 %v6408_v2 }
 0x7cd   : > { %v4732_v33 = vpop.eup %4731  ;;  %4213 = vmatmul.msk.bf16.vlgmr.msra.gmra.mxu2 %vm458_vm0, %v2622_v54  ;;  %v4361_v54 = vunpack.i.h.bf16 %v6408_v2 }
 0x7ce   : > { %v2021_v50 = vmul.f32 %v4732_v33, %v1997_v8  ;;  %v4734_v41 = vpop.eup %4733 }
 0x7cf   : > { %v4736_v28 = vpop.eup %4735 }
 0x7d0   : > { %v4427_v26 = vpack.i.bf16 %v2021_v50, %v2020_v31 }
 0x7d2   : > { %4428 = vrot.lane.b32.xlu1 %v4427_v26, %s4861_s29 }
 0x7d3   : > { %v2000_v20 = vpop.f32.mrf.mxu1 }
 0x7d4   : > { %v2022_v0 = vmul.f32 %v4734_v41, %v2000_v20  ;;  %v4380_v20 = vunpack.i.l.bf16 %v6475_v36 }
 0x7d6   : > { %v4409_v6 = vpop.permute.xlu2 %4408 }
 0x7d7   : > { %v4411_v51 = vunpack.i.h.bf16 %v4409_v6  ;;  %v4410_v21 = vunpack.i.l.bf16 %v4409_v6 }
 0x7d9   : > { %v2594_v18 = vsel %vm2588_vm7, %v6309_v38, %v4411_v51  ;;  %v2593_v25 = vsel %vm2588_vm7, %v6306_v61, %v4410_v21  ;;  %v4376_v38 = vunpack.i.h.bf16 %v6419_v39  ;;  %v4375_v61 = vunpack.i.l.bf16 %v6419_v39 }
 0x7da   : > { %v2610_v24 = vsel %vm2605_vm8, %v2593_v25, %v4365_v35  ;;  %v2611_v10 = vsel %vm2605_vm8, %v2594_v18, %v4366_v43 }
 0x7db   : > { %v2002_v48 = vpop.f32.mrf.mxu1  ;;  %v2624_v34 = vpack.c.bf16 %v2611_v10, %v2610_v24  ;;  %v4390_v24 = vunpack.i.l.bf16 %v6487_v32 }
 0x7dc   : > { %v2023_v58 = vmul.f32 %v4736_v28, %v2002_v48 }
 0x7de   : > { %v4432_v55 = vpack.i.bf16 %v2023_v58, %v2022_v0  ;;  %v4396_v0 = vunpack.i.h.bf16 %v6503_v17  ;;  %v4395_v58 = vunpack.i.l.bf16 %v6503_v17 }
 0x7e0   : > { %4433 = vrot.lane.b32.xlu0 %v4432_v55, %s4861_s29 }
 0x7e4   : > { %v4414_v29 = vpop.permute.xlu2 %4413 }
 0x7e5   : > { %v4416_v22 = vunpack.i.h.bf16 %v4414_v29  ;;  %v4415_v5 = vunpack.i.l.bf16 %v4414_v29 }
 0x7e6   : > { %v4404_v49 = vpop.permute.xlu1 %4403 }
 0x7e7   : > { %v2595_v23 = vsel %vm2588_vm7, %v6430_v44, %v4415_v5  ;;  %v2596_v13 = vsel %vm2588_vm7, %v6426_v7, %v4416_v22  ;;  %v4406_v37 = vunpack.i.h.bf16 %v4404_v49  ;;  %v4405_v8 = vunpack.i.l.bf16 %v4404_v49  ;;  %v6586_v5 = vld [vmem:[%s7507_s6] ss:$0 sm:$0xff] }
 0x7e8   : > { %4438 = vrot.lane.b32.xlu0 %v4437_v47, %s4860_s23  ;;  %v2612_v39 = vsel %vm2605_vm8, %v2595_v23, %v4375_v61  ;;  %v2613_v57 = vsel %vm2605_vm8, %v2596_v13, %v4376_v38  ;;  %v4819_v23 = vld [vmem:[%s4948_s30] sm:$0xff] }
 0x7e9   : > { %v2592_v44 = vsel %vm2588_vm7, %v6284_v56, %v4406_v37  ;;  %v2591_v7 = vsel %vm2588_vm7, %v6288_v60, %v4405_v8  ;;  %v2625_v33 = vpack.c.bf16 %v2613_v57, %v2612_v39  ;;  %v1910_v56 = vpop.xlane.xlu0 %1909  ;;  %v2005_v60 = vpop.f32.mrf.mxu1 }
 0x7ea   : > { %v2608_v31 = vsel %vm2605_vm8, %v2591_v7, %v4360_v12  ;;  %v2609_v2 = vsel %vm2605_vm8, %v2592_v44, %v4361_v54 }
 0x7eb   : > { %v2623_v50 = vpack.c.bf16 %v2609_v2, %v2608_v31 }
 0x7ed   : > { %4214 = vmatmul.msk.bf16.gmra.mxu2 %vm458_vm0, %v2623_v50 }
 0x7f0   : > { %4443 = vrot.lane.b32.xlu0 %v4442_v62, %s4859_s22 }
 0x7f1   : > { %v1912_v3 = vpop.xlane.xlu0 %1911  ;;  %v2007_v40 = vpop.f32.mrf.mxu1 }
 0x7f2   : > { %4737 = vrcp.f32 %v1912_v3  ;;  %v4820_v3 = vld [vmem:[%s4948_s30 + $0x8] sm:$0xff] }
 0x7f3   : > { %4739 = vrcp.f32 %v1910_v56 }
 0x7f4   : > { %1201 = vadd.xlane.f32.xlu2 %v6119_v53  ;;  %4741 = vrcp.f32 %v6451_v30  ;;  %v4386_v30 = vunpack.i.h.bf16 %v6483_v52 }
 0x7f5   : > { %4743 = vrcp.f32 %v6422_v9  ;;  %v4385_v9 = vunpack.i.l.bf16 %v6483_v52 }
 0x7f6   : > { %4745 = vrcp.f32 %v6481_v45 }
 0x7f8   : > { %4453 = vrot.lane.b32.xlu0 %v4452_v16, %s4860_s23  ;;  %v4738_v47 = vpop.eup %4737  ;;  %v4381_v16 = vunpack.i.h.bf16 %v6475_v36 }
 0x7f9   : > { %v2025_v4 = vmul.f32 %v4738_v47, %v2007_v40  ;;  %v4740_v53 = vpop.eup %4739 }
 0x7fa   : > { %v2024_v19 = vmul.f32 %v4740_v53, %v2005_v60  ;;  %v4742_v63 = vpop.eup %4741 }
 0x7fb   : > { %v4744_v59 = vpop.eup %4743  ;;  %v1310_v26 = vmul.f32 %v4742_v63, %v6211_v27 }
 0x7fc   : > { %1203 = vadd.xlane.f32.xlu1 %v6123_v14  ;;  %v4447_v62 = vpack.i.bf16 %v2025_v4, %v2024_v19  ;;  %v1311_v15 = vmul.f32 %v4744_v59, %v6226_v11  ;;  %v4746_v41 = vpop.eup %4745 }
 0x7fd   : > { %4215 = vmatmul.msk.bf16.gmra.mxu2 %vm458_vm0, %v2624_v34  ;;  %v2580_v35 = vsel %vm995_vm5, %v1310_v26, %v4380_v20  ;;  %v1312_v52 = vmul.f32 %v4746_v41, %v6233_v46  ;;  %v4821_v26 = vld [vmem:[%s4948_s30 + $0x10] sm:$0xff]  ;;  %v4823_v41 = vld [vmem:[%s4948_s30 + $0x20] sm:$0xff] }
 0x7fe   : > { %v2581_v43 = vsel %vm995_vm5, %v1311_v15, %v4381_v16 }
 0x7ff   : > { %v2582_v34 = vsel %vm995_vm5, %v1312_v52, %v4390_v24  ;;  %v7564_v52 = vld [vmem:[#allocation9_spill] sm:$0xff] }
 0x80d   : > { %4216 = vmatmul.msk.bf16.gmra.mxu2 %vm458_vm0, %v2625_v33  ;;  %v7563_v33 = vld [vmem:[#allocation10_spill] sm:$0xff] }
 0x811   : > { %v1198_v14 = vpop.xlane.xlu1 %1197 }
 0x815   : > { %4448 = vrot.lane.b32.xlu1 %v4447_v62, %s4861_s29 }
 0x826   : > { %v1200_v46 = vpop.xlane.xlu2 %1199 }
 0x827   : > { %4747 = vrcp.f32 %v1200_v46 }
 0x828   : > { %4749 = vrcp.f32 %v1198_v14 }
 0x82d   : > { %v4748_v61 = vpop.eup %4747 }
 0x82e   : > { %v4419_v49 = vpop.permute.xlu2 %4418  ;;  %v4750_v8 = vpop.eup %4749  ;;  %v1315_v54 = vmul.f32 %v4748_v61, %v6256_v42 }
 0x82f   : > { %v4421_v12 = vunpack.i.h.bf16 %v4419_v49  ;;  %v4420_v39 = vunpack.i.l.bf16 %v4419_v49  ;;  %v1314_v31 = vmul.f32 %v4750_v8, %v7563_v33 }
 0x831   : > { %v2585_v50 = vsel %vm995_vm5, %v1315_v54, %v4421_v12  ;;  %v2584_v60 = vsel %vm995_vm5, %v1314_v31, %v4420_v39  ;;  %v4825_v31 = vld [vmem:[%s4948_s30 + $0x38] sm:$0xff] }
 0x834   : > { %v4424_v6 = vpop.permute.xlu1 %4423 }
 0x835   : > { %v4426_v51 = vunpack.i.h.bf16 %v4424_v6  ;;  %v4425_v21 = vunpack.i.l.bf16 %v4424_v6 }
 0x837   : > { %v2598_v18 = vsel %vm2588_vm7, %v2581_v43, %v4426_v51  ;;  %v2597_v25 = vsel %vm2588_vm7, %v2580_v35, %v4425_v21 }
 0x838   : > { %v2614_v27 = vsel %vm2605_vm8, %v2597_v25, %v4385_v9  ;;  %v2615_v11 = vsel %vm2605_vm8, %v2598_v18, %v4386_v30  ;;  %v4822_v9 = vld [vmem:[%s4948_s30 + $0x18] sm:$0xff] }
 0x839   : > { %v2626_v36 = vpack.c.bf16 %v2615_v11, %v2614_v27 }
 0x83b   : > { %4217 = vmatmul.msk.bf16.gmra.mxu2 %vm458_vm0, %v2626_v36 }
 0x844   : > { %v4429_v10 = vpop.permute.xlu1 %4428 }
 0x845   : > { %v4431_v28 = vunpack.i.h.bf16 %v4429_v10  ;;  %v4430_v48 = vunpack.i.l.bf16 %v4429_v10 }
 0x847   : > { %v2600_v45 = vsel %vm2588_vm7, %v6498_v1, %v4431_v28  ;;  %v2599_v55 = vsel %vm2588_vm7, %v2582_v34, %v4430_v48  ;;  %v7565_v48 = vld [vmem:[#allocation13_spill] sm:$0xff] }
 0x848   : > { %v2616_v29 = vsel %vm2605_vm8, %v2599_v55, %v4395_v58  ;;  %v2617_v32 = vsel %vm2605_vm8, %v2600_v45, %v4396_v0 }
 0x849   : > { %v2627_v22 = vpack.c.bf16 %v2617_v32, %v2616_v29 }
 0x84b   : > { %4218 = vmatmul.msk.bf16.gmra.mxu2 %vm458_vm0, %v2627_v22 }
 0x850   : > { %v2683_v17 = vpop.f32.mrf.mxu2 }
 0x851   : > { %v2684_v1 = vadd.f32 %v6586_v5, %v2683_v17 }
 0x852   : > { %v4434_v38 = vpop.permute.xlu0 %4433 }
 0x853   : > { %v6590_v13 = vadd.f32 %v4819_v23, %v2684_v1  ;;  %v4436_v57 = vunpack.i.h.bf16 %v4434_v38  ;;  %v4435_v44 = vunpack.i.l.bf16 %v4434_v38 }
 0x855   : > { %v2739_v37 = vsel %vm458_vm0, %v6590_v13, 0.0  ;;  %v2602_v4 = vsel %vm2588_vm7, %v2585_v50, %v4436_v57  ;;  %v2601_v53 = vsel %vm2588_vm7, %v2584_v60, %v4435_v44 }
 0x856   : > { %2740 = vadd.xlane.f32.xlu0 %v2739_v37  ;;  %v4824_v37 = vld [vmem:[%s4948_s30 + $0x28] sm:$0xff] }
 0x858   : > { %v2685_v7 = vpop.f32.mrf.mxu2 }
 0x859   : > { %v2686_v2 = vadd.f32 %v6586_v5, %v2685_v7 }
 0x85a   : > { %v4439_v56 = vpop.permute.xlu0 %4438 }
 0x85b   : > { %v6600_v40 = vadd.f32 %v4820_v3, %v2686_v2  ;;  %v4441_v42 = vunpack.i.h.bf16 %v4439_v56  ;;  %v4440_v47 = vunpack.i.l.bf16 %v4439_v56  ;;  %v4826_v3 = vld [vmem:[%s4948_s30 + $0x40] sm:$0xff] }
 0x85d   : > { %v2618_v19 = vsel %vm2605_vm8, %v2601_v53, %v4440_v47  ;;  %v2619_v62 = vsel %vm2605_vm8, %v2602_v4, %v4441_v42  ;;  %v2742_v14 = vsel %vm458_vm0, %v6600_v40, 0.0  ;;  %v7566_v53 = vld [vmem:[#allocation2_spill] sm:$0xff] }
 0x85e   : > { %v2628_v63 = vpack.c.bf16 %v2619_v62, %v2618_v19  ;;  %2743 = vadd.xlane.f32.xlu1 %v2742_v14 }
 0x860   : > { %4219 = vmatmul.msk.bf16.gmra.mxu2 %vm458_vm0, %v2628_v63 }
 0x862   : > { %v4444_v30 = vpop.permute.xlu0 %4443 }
 0x863   : > { %v4446_v58 = vunpack.i.h.bf16 %v4444_v30  ;;  %v4445_v45 = vunpack.i.l.bf16 %v4444_v30 }
 0x867   : > { %v1202_v6 = vpop.xlane.xlu2 %1201 }
 0x868   : > { %4751 = vrcp.f32 %v1202_v6 }
 0x86a   : > { %v4454_v28 = vpop.permute.xlu0 %4453 }
 0x86b   : > { %v4456_v29 = vunpack.i.h.bf16 %v4454_v28  ;;  %v4455_v17 = vunpack.i.l.bf16 %v4454_v28 }
 0x86e   : > { %v4752_v27 = vpop.eup %4751 }
 0x86f   : > { %v1204_v21 = vpop.xlane.xlu1 %1203  ;;  %v1316_v10 = vmul.f32 %v4752_v27, %v7564_v52 }
 0x870   : > { %v2688_v59 = vpop.f32.mrf.mxu2  ;;  %4753 = vrcp.f32 %v1204_v21 }
 0x871   : > { %v2689_v16 = vadd.f32 %v6586_v5, %v2688_v59  ;;  %v2586_v1 = vsel %vm995_vm5, %v1316_v10, %v4445_v45 }
 0x873   : > { %v6611_v15 = vadd.f32 %v4821_v26, %v2689_v16 }
 0x875   : > { %v2745_v20 = vsel %vm458_vm0, %v6611_v15, 0.0 }
 0x876   : > { %2746 = vadd.xlane.f32.xlu2 %v2745_v20  ;;  %v4754_v36 = vpop.eup %4753  ;;  %v4827_v20 = vld [vmem:[%s4948_s30 + $0x30] sm:$0xff] }
 0x877   : > { %v1317_v34 = vmul.f32 %v4754_v36, %v7565_v48  ;;  %v4828_v48 = vld [vmem:[%s4948_s30 + $0x48] sm:$0xff] }
 0x878   : > { %v2690_v51 = vpop.f32.mrf.mxu2 }
 0x879   : > { %v2691_v43 = vadd.f32 %v6586_v5, %v2690_v51  ;;  %v2587_v38 = vsel %vm995_vm5, %v1317_v34, %v4446_v58 }
 0x87b   : > { %v6617_v35 = vadd.f32 %v4822_v9, %v2691_v43 }
 0x87d   : > { %v2748_v18 = vsel %vm458_vm0, %v6617_v35, 0.0 }
 0x87e   : > { %2749 = vadd.xlane.f32.xlu2 %v2748_v18 }
 0x880   : > { %v2693_v25 = vpop.f32.mrf.mxu2 }
 0x881   : > { %v2694_v11 = vadd.f32 %v6586_v5, %v2693_v25 }
 0x883   : > { %v6623_v24 = vadd.f32 %v4823_v41, %v2694_v11 }
 0x885   : > { %v2751_v0 = vsel %vm458_vm0, %v6623_v24, 0.0 }
 0x886   : > { %2752 = vadd.xlane.f32.xlu2 %v2751_v0 }
 0x887   : > { %v4449_v55 = vpop.permute.xlu1 %4448 }
 0x888   : > { %v4451_v32 = vunpack.i.h.bf16 %v4449_v55  ;;  %v4450_v46 = vunpack.i.l.bf16 %v4449_v55  ;;  %v2695_v22 = vpop.f32.mrf.mxu2 }
 0x889   : > { %v2696_v61 = vadd.f32 %v6586_v5, %v2695_v22 }
 0x88a   : > { %v2603_v49 = vsel %vm2588_vm7, %v2586_v1, %v4450_v46  ;;  %v2604_v23 = vsel %vm2588_vm7, %v2587_v38, %v4451_v32 }
 0x88b   : > { %v6635_v8 = vadd.f32 %v4824_v37, %v2696_v61  ;;  %v2620_v54 = vsel %vm2605_vm8, %v2603_v49, %v4455_v17  ;;  %v2621_v12 = vsel %vm2605_vm8, %v2604_v23, %v4456_v29  ;;  %v4829_v17 = vld [vmem:[%s4948_s30 + $0x50] sm:$0xff] }
 0x88c   : > { %v2629_v39 = vpack.c.bf16 %v2621_v12, %v2620_v54 }
 0x88d   : > { %v2754_v57 = vsel %vm458_vm0, %v6635_v8, 0.0 }
 0x88e   : > { %4220 = vmatmul.msk.bf16.gmra.mxu2 %vm458_vm0, %v2629_v39  ;;  %2755 = vadd.xlane.f32.xlu2 %v2754_v57  ;;  %v4830_v57 = vld [vmem:[%s4948_s30 + $0x58] sm:$0xff] }
 0x890   : > { %v2698_v44 = vpop.f32.mrf.mxu2 }
 0x891   : > { %v2699_v63 = vadd.f32 %v6586_v5, %v2698_v44 }
 0x893   : > { %v6664_v6 = vadd.f32 %v4827_v20, %v2699_v63 }
 0x895   : > { %v2757_v30 = vsel %vm458_vm0, %v6664_v6, 0.0 }
 0x898   : > { %v2700_v7 = vpop.f32.mrf.mxu2 }
 0x899   : > { %v2701_v33 = vadd.f32 %v6586_v5, %v2700_v7 }
 0x89b   : > { %v6644_v2 = vadd.f32 %v4825_v31, %v2701_v33 }
 0x89d   : > { %v2760_v50 = vsel %vm458_vm0, %v6644_v2, 0.0 }
 0x89e   : > { %2761 = vadd.xlane.f32.xlu1 %v2760_v50 }
 0x8be   : > { %v2703_v56 = vpop.f32.mrf.mxu2 }
 0x8bf   : > { %v2704_v60 = vadd.f32 %v6586_v5, %v2703_v56 }
 0x8c1   : > { %v6650_v42 = vadd.f32 %v4826_v3, %v2704_v60  ;;  %v4831_v3 = vld [vmem:[%s4948_s30 + $0x60] sm:$0xff] }
 0x8c3   : > { %v2763_v47 = vsel %vm458_vm0, %v6650_v42, 0.0 }
 0x8c4   : > { %2764 = vadd.xlane.f32.xlu1 %v2763_v47 }
 0x8c6   : > { %v2705_v9 = vpop.f32.mrf.mxu2 }
 0x8c7   : > { %v2706_v41 = vadd.f32 %v6586_v5, %v2705_v9 }
 0x8c9   : > { %v2741_v4 = vpop.xlane.xlu0 %2740  ;;  %v6684_v34 = vadd.f32 %v4828_v48, %v2706_v41  ;;  %v4294_v41 = vld [vmem:[%s7510_s9 + $0x8] sm:$0xff]  ;;  %v4293_v48 = vld [vmem:[%s7510_s9] sm:$0xff] }
 0x8ca   : > { %v2787_v19 = vmul.f32 %v2741_v4, %v7566_v53  ;;  %3189 = vmatpush.bf16.msra.mxu1 %v4294_v41  ;;  %4303 = vmatpush.bf16.msrb.mxu2 %v4294_v41 }
 0x8cb   : > { %v2766_v29 = vsel %vm458_vm0, %v6684_v34, 0.0 }
 0x8cc   : > { %v6656_v62 = vsub.f32 %v6590_v13, %v2787_v19 }
 0x8ce   : > { %v2819_v14 = vmul.f32 %v6656_v62, %v6656_v62  ;;  %v2708_v11 = vpop.f32.mrf.mxu2  ;;  %3190 = vmatpush.bf16.msra.mxu1 %v4293_v48  ;;  %4304 = vmatpush.bf16.msrb.mxu2 %v4293_v48 }
 0x8cf   : > { %v2709_v55 = vadd.f32 %v6586_v5, %v2708_v11 }
 0x8d0   : > { %v2835_v59 = vsel %vm458_vm0, %v2819_v14, 0.0 }
 0x8d1   : > { %v2744_v16 = vpop.xlane.xlu1 %2743  ;;  %2836 = vadd.xlane.f32.xlu0 %v2835_v59  ;;  %v6697_v1 = vadd.f32 %v4829_v17, %v2709_v55 }
 0x8d2   : > { %v2788_v26 = vmul.f32 %v2744_v16, %v7566_v53 }
 0x8d3   : > { %v2769_v37 = vsel %vm458_vm0, %v6697_v1, 0.0 }
 0x8d4   : > { %v6667_v51 = vsub.f32 %v6600_v40, %v2788_v26 }
 0x8d6   : > { %v2820_v21 = vmul.f32 %v6667_v51, %v6667_v51  ;;  %v2710_v45 = vpop.f32.mrf.mxu2 }
 0x8d7   : > { %v2711_v23 = vadd.f32 %v6586_v5, %v2710_v45 }
 0x8d8   : > { %v2838_v43 = vsel %vm458_vm0, %v2820_v21, 0.0 }
 0x8d9   : > { %2839 = vadd.xlane.f32.xlu2 %v2838_v43  ;;  %2758 = vadd.xlane.f32.xlu0 %v2757_v30  ;;  %v6710_v44 = vadd.f32 %v4830_v57, %v2711_v23  ;;  %v4832_v30 = vld [vmem:[%s4948_s30 + $0x70] sm:$0xff] }
 0x8db   : > { %v2772_v56 = vsel %vm458_vm0, %v6710_v44, 0.0 }
 0x8e3   : > { %v2713_v49 = vpop.f32.mrf.mxu2 }
 0x8e4   : > { %v2714_v31 = vadd.f32 %v6586_v5, %v2713_v49 }
 0x8e6   : > { %v6722_v47 = vadd.f32 %v4831_v3, %v2714_v31 }
 0x8e8   : > { %v2775_v4 = vsel %vm458_vm0, %v6722_v47, 0.0 }
 0x8e9   : > { %v2747_v18 = vpop.xlane.xlu2 %2746 }
 0x8ea   : > { %v2789_v25 = vmul.f32 %v2747_v18, %v7566_v53  ;;  %v4833_v18 = vld [vmem:[%s4948_s30 + $0x78] sm:$0xff] }
 0x8eb   : > { %v2715_v60 = vpop.f32.mrf.mxu2 }
 0x8ec   : > { %v6676_v27 = vsub.f32 %v6611_v15, %v2789_v25  ;;  %v2716_v23 = vadd.f32 %v6586_v5, %v2715_v60 }
 0x8ee   : > { %v2821_v36 = vmul.f32 %v6676_v27, %v6676_v27 }
 0x8f0   : > { %v2841_v52 = vsel %vm458_vm0, %v2821_v36, 0.0 }
 0x8f1   : > { %v2750_v10 = vpop.xlane.xlu2 %2749  ;;  %2842 = vadd.xlane.f32.xlu2 %v2841_v52 }
 0x8f2   : > { %v2790_v28 = vmul.f32 %v2750_v10, %v7566_v53 }
 0x8f4   : > { %v6687_v0 = vsub.f32 %v6617_v35, %v2790_v28 }
 0x8f6   : > { %v2822_v58 = vmul.f32 %v6687_v0, %v6687_v0 }
 0x8f8   : > { %v2844_v32 = vsel %vm458_vm0, %v2822_v58, 0.0 }
 0x8f9   : > { %v2753_v46 = vpop.xlane.xlu2 %2752  ;;  %2767 = vadd.xlane.f32.xlu2 %v2766_v29  ;;  %2845 = vadd.xlane.f32.xlu0 %v2844_v32 }
 0x8fa   : > { %v2791_v22 = vmul.f32 %v2753_v46, %v7566_v53 }
 0x8fc   : > { %v6700_v38 = vsub.f32 %v6623_v24, %v2791_v22 }
 0x8fe   : > { %v2823_v61 = vmul.f32 %v6700_v38, %v6700_v38 }
 0x900   : > { %v2847_v54 = vsel %vm458_vm0, %v2823_v61, 0.0 }
 0x901   : > { %v2756_v12 = vpop.xlane.xlu2 %2755  ;;  %2770 = vadd.xlane.f32.xlu2 %v2769_v37  ;;  %2848 = vadd.xlane.f32.xlu0 %v2847_v54 }
 0x902   : > { %v2792_v39 = vmul.f32 %v2756_v12, %v7566_v53 }
 0x904   : > { %v6713_v7 = vsub.f32 %v6635_v8, %v2792_v39 }
 0x906   : > { %v2824_v33 = vmul.f32 %v6713_v7, %v6713_v7 }
 0x908   : > { %v2850_v50 = vsel %vm458_vm0, %v2824_v33, 0.0  ;;  %v4834_v33 = vld [vmem:[%s4948_s30 + $0x68] sm:$0xff] }
 0x909   : > { %2851 = vadd.xlane.f32.xlu1 %v2850_v50  ;;  %2773 = vadd.xlane.f32.xlu0 %v2772_v56  ;;  %v6762_v31 = vadd.f32 %v4834_v33, %v2716_v23 }
 0x911   : > { %v2718_v19 = vpop.f32.mrf.mxu2  ;;  %v2762_v14 = vpop.xlane.xlu1 %2761  ;;  %2776 = vadd.xlane.f32.xlu0 %v2775_v4 }
 0x912   : > { %v2794_v63 = vmul.f32 %v2762_v14, %v7566_v53  ;;  %v2719_v26 = vadd.f32 %v6586_v5, %v2718_v19 }
 0x914   : > { %v6728_v59 = vsub.f32 %v6644_v2, %v2794_v63  ;;  %v6736_v9 = vadd.f32 %v4832_v30, %v2719_v26  ;;  %v6781_v30 = vld [vmem:[%s7509_s8] ss:$0 sm:$0xff] }
 0x916   : > { %v2826_v16 = vmul.f32 %v6728_v59, %v6728_v59  ;;  %v2781_v36 = vsel %vm458_vm0, %v6736_v9, 0.0 }
 0x918   : > { %v2856_v20 = vsel %vm458_vm0, %v2826_v16, 0.0  ;;  %v6773_v16 = vld [vmem:[%s7508_s7] ss:$0 sm:$0xff] }
 0x919   : > { %v2720_v21 = vpop.f32.mrf.mxu2  ;;  %2857 = vadd.xlane.f32.xlu2 %v2856_v20 }
 0x91a   : > { %v2721_v43 = vadd.f32 %v6586_v5, %v2720_v21  ;;  %v2778_v5 = vsel %vm458_vm0, %v6762_v31, 0.0 }
 0x91c   : > { %v6739_v25 = vadd.f32 %v4833_v18, %v2721_v43 }
 0x91e   : > { %v2784_v11 = vsel %vm458_vm0, %v6739_v25, 0.0 }
 0x91f   : > { %2785 = vadd.xlane.f32.xlu0 %v2784_v11 }
 0x921   : > { %2782 = vadd.xlane.f32.xlu2 %v2781_v36 }
 0x937   : > { %v2765_v54 = vpop.xlane.xlu1 %2764 }
 0x938   : > { %v2795_v50 = vmul.f32 %v2765_v54, %v7566_v53 }
 0x93a   : > { %v6766_v19 = vsub.f32 %v6650_v42, %v2795_v50 }
 0x93c   : > { %v2827_v20 = vmul.f32 %v6766_v19, %v6766_v19 }
 0x93e   : > { %v2859_v36 = vsel %vm458_vm0, %v2827_v20, 0.0 }
 0x944   : > { %v2837_v52 = vpop.xlane.xlu0 %2836 }
 0x945   : > { %v2883_v10 = vmul.f32 %v2837_v52, %v7566_v53 }
 0x947   : > { %v2899_v28 = vadd.f32 1e-05, %v2883_v10 }
 0x949   : > { %4755 = vrsqrt.f32 %v2899_v28  ;;  %vm2921_vm10 = vweird.f32 %v2899_v28 }
 0x94c   : > { %v2840_v58 = vpop.xlane.xlu2 %2839  ;;  %v2759_v45 = vpop.xlane.xlu0 %2758 }
 0x94d   : > { %v2884_v55 = vmul.f32 %v2840_v58, %v7566_v53  ;;  %v2793_v29 = vmul.f32 %v2759_v45, %v7566_v53 }
 0x94f   : > { %v4756_v32 = vpop.eup %4755  ;;  %v2900_v46 = vadd.f32 1e-05, %v2884_v55  ;;  %v6755_v22 = vsub.f32 %v6664_v6, %v2793_v29 }
 0x950   : > { %v2916_v17 = vmul.f32 %v4756_v32, %v2899_v28  ;;  %vm2922_vm9 = vweird.f32 %v4756_v32 }
 0x951   : > { %4757 = vrsqrt.f32 %v2900_v46  ;;  %v2825_v61 = vmul.f32 %v6755_v22, %v6755_v22  ;;  %vm2923_vm11 = vmor %vm2921_vm10, %vm2922_vm9  ;;  %vm2931_vm13 = vweird.f32 %v2900_v46 }
 0x952   : > { %v2917_v49 = vmul.f32 %v4756_v32, %v2916_v17 }
 0x953   : > { %v2853_v37 = vsel %vm458_vm0, %v2825_v61, 0.0 }
 0x954   : > { %v2918_v12 = vmul.f32 0.5, %v2917_v49  ;;  %2854 = vadd.xlane.f32.xlu1 %v2853_v37 }
 0x956   : > { %v2919_v39 = vsub.f32 1.5, %v2918_v12 }
 0x957   : > { %v4758_v57 = vpop.eup %4757 }
 0x958   : > { %v2920_v56 = vmul.f32 %v4756_v32, %v2919_v39  ;;  %v2926_v3 = vmul.f32 %v4758_v57, %v2900_v46  ;;  %vm2932_vm12 = vweird.f32 %v4758_v57 }
 0x959   : > { %vm2933_vm14 = vmor %vm2931_vm13, %vm2932_vm12 }
 0x95a   : > { %v2927_v4 = vmul.f32 %v4758_v57, %v2926_v3  ;;  %v2924_v60 = vsel %vm2923_vm11, %v4756_v32, %v2920_v56 }
 0x95b   : > { %v3075_v26 = vmul.f32 %v2924_v60, %v6656_v62 }
 0x95c   : > { %v2928_v14 = vmul.f32 0.5, %v2927_v4  ;;  %2779 = vadd.xlane.f32.xlu1 %v2778_v5 }
 0x95d   : > { %v3095_v18 = vmul.f32 %v6773_v16, %v3075_v26 }
 0x95e   : > { %v2929_v63 = vsub.f32 1.5, %v2928_v14 }
 0x95f   : > { %v3115_v10 = vadd.f32 %v6781_v30, %v3095_v18 }
 0x960   : > { %v2930_v21 = vmul.f32 %v4758_v57, %v2929_v63 }
 0x962   : > { %v2934_v43 = vsel %vm2933_vm14, %v4758_v57, %v2930_v21 }
 0x963   : > { %v3076_v11 = vmul.f32 %v2934_v43, %v6667_v51 }
 0x964   : > { %v2843_v41 = vpop.xlane.xlu2 %2842  ;;  %2860 = vadd.xlane.f32.xlu1 %v2859_v36 }
 0x965   : > { %v3096_v62 = vmul.f32 %v6773_v16, %v3076_v11  ;;  %v2885_v52 = vmul.f32 %v2843_v41, %v7566_v53 }
 0x967   : > { %v3116_v28 = vadd.f32 %v6781_v30, %v3096_v62  ;;  %v2901_v48 = vadd.f32 1e-05, %v2885_v52 }
 0x969   : > { %v3131_v58 = vpack.c.bf16 %v3116_v28, %v3115_v10  ;;  %4759 = vrsqrt.f32 %v2901_v48  ;;  %vm2941_vm1 = vweird.f32 %v2901_v48 }
 0x96b   : > { %4229 = vmatmul.msk.bf16.vlgmr.msra.gmra.mxu1 %vm458_vm0, %v3131_v58 }
 0x96c   : > { %v2768_v45 = vpop.xlane.xlu2 %2767  ;;  %v2846_v55 = vpop.xlane.xlu0 %2845 }
 0x96d   : > { %v2796_v51 = vmul.f32 %v2768_v45, %v7566_v53  ;;  %v2886_v29 = vmul.f32 %v2846_v55, %v7566_v53 }
 0x96f   : > { %v4760_v32 = vpop.eup %4759  ;;  %v6794_v46 = vsub.f32 %v6684_v34, %v2796_v51  ;;  %v2902_v17 = vadd.f32 1e-05, %v2886_v29 }
 0x970   : > { %v2936_v61 = vmul.f32 %v4760_v32, %v2901_v48  ;;  %vm2942_vm15 = vweird.f32 %v4760_v32 }
 0x971   : > { %4761 = vrsqrt.f32 %v2902_v17  ;;  %v2828_v49 = vmul.f32 %v6794_v46, %v6794_v46  ;;  %vm2943_vm2 = vmor %vm2941_vm1, %vm2942_vm15  ;;  %vm2951_vm4 = vweird.f32 %v2902_v17 }
 0x972   : > { %v2937_v23 = vmul.f32 %v4760_v32, %v2936_v61 }
 0x973   : > { %v2862_v37 = vsel %vm458_vm0, %v2828_v49, 0.0 }
 0x974   : > { %v2938_v54 = vmul.f32 0.5, %v2937_v23  ;;  %v2771_v12 = vpop.xlane.xlu2 %2770  ;;  %2863 = vadd.xlane.f32.xlu2 %v2862_v37  ;;  %v2849_v39 = vpop.xlane.xlu0 %2848 }
 0x975   : > { %v2797_v57 = vmul.f32 %v2771_v12, %v7566_v53  ;;  %v2887_v33 = vmul.f32 %v2849_v39, %v7566_v53 }
 0x976   : > { %v2939_v50 = vsub.f32 1.5, %v2938_v54 }
 0x977   : > { %v4762_v56 = vpop.eup %4761  ;;  %v6802_v3 = vsub.f32 %v6697_v1, %v2797_v57  ;;  %v2903_v4 = vadd.f32 1e-05, %v2887_v33 }
 0x978   : > { %v2940_v5 = vmul.f32 %v4760_v32, %v2939_v50  ;;  %v2946_v60 = vmul.f32 %v4762_v56, %v2902_v17  ;;  %vm2952_vm3 = vweird.f32 %v4762_v56 }
 0x979   : > { %4763 = vrsqrt.f32 %v2903_v4  ;;  %v2829_v14 = vmul.f32 %v6802_v3, %v6802_v3  ;;  %vm2953_vm5 = vmor %vm2951_vm4, %vm2952_vm3  ;;  %vm2961_vm7 = vweird.f32 %v2903_v4 }
 0x97a   : > { %v2947_v63 = vmul.f32 %v4762_v56, %v2946_v60  ;;  %v2944_v20 = vsel %vm2943_vm2, %v4760_v32, %v2940_v5 }
 0x97b   : > { %v2865_v26 = vsel %vm458_vm0, %v2829_v14, 0.0  ;;  %v3077_v52 = vmul.f32 %v2944_v20, %v6676_v27 }
 0x97c   : > { %v2948_v21 = vmul.f32 0.5, %v2947_v63  ;;  %v2852_v43 = vpop.xlane.xlu1 %2851  ;;  %2866 = vadd.xlane.f32.xlu0 %v2865_v26  ;;  %v2774_v18 = vpop.xlane.xlu0 %2773 }
 0x97d   : > { %v2888_v11 = vmul.f32 %v2852_v43, %v7566_v53  ;;  %v2798_v36 = vmul.f32 %v2774_v18, %v7566_v53  ;;  %v3097_v27 = vmul.f32 %v6773_v16, %v3077_v52 }
 0x97e   : > { %v2949_v41 = vsub.f32 1.5, %v2948_v21 }
 0x97f   : > { %v4764_v62 = vpop.eup %4763  ;;  %v2904_v10 = vadd.f32 1e-05, %v2888_v11  ;;  %v6811_v28 = vsub.f32 %v6710_v44, %v2798_v36  ;;  %v3117_v39 = vadd.f32 %v6781_v30, %v3097_v27 }
 0x980   : > { %v2950_v48 = vmul.f32 %v4762_v56, %v2949_v41  ;;  %v2956_v58 = vmul.f32 %v4764_v62, %v2903_v4  ;;  %vm2962_vm6 = vweird.f32 %v4764_v62 }
 0x981   : > { %4765 = vrsqrt.f32 %v2904_v10  ;;  %v2830_v45 = vmul.f32 %v6811_v28, %v6811_v28  ;;  %vm2963_vm8 = vmor %vm2961_vm7, %vm2962_vm6  ;;  %vm2971_vm10 = vweird.f32 %v2904_v10 }
 0x982   : > { %v2954_v55 = vsel %vm2953_vm5, %v4762_v56, %v2950_v48  ;;  %v2957_v51 = vmul.f32 %v4764_v62, %v2956_v58 }
 0x983   : > { %v3078_v29 = vmul.f32 %v2954_v55, %v6687_v0  ;;  %v2868_v32 = vsel %vm458_vm0, %v2830_v45, 0.0 }
 0x984   : > { %v2958_v61 = vmul.f32 0.5, %v2957_v51  ;;  %2869 = vadd.xlane.f32.xlu1 %v2868_v32  ;;  %v2777_v49 = vpop.xlane.xlu0 %2776 }
 0x985   : > { %v2799_v23 = vmul.f32 %v2777_v49, %v7566_v53  ;;  %v3098_v17 = vmul.f32 %v6773_v16, %v3078_v29 }
 0x986   : > { %v2959_v37 = vsub.f32 1.5, %v2958_v61 }
 0x987   : > { %v4766_v54 = vpop.eup %4765  ;;  %v6821_v12 = vsub.f32 %v6722_v47, %v2799_v23  ;;  %v3118_v0 = vadd.f32 %v6781_v30, %v3098_v17 }
 0x988   : > { %v2960_v57 = vmul.f32 %v4764_v62, %v2959_v37  ;;  %v2966_v33 = vmul.f32 %v4766_v54, %v2904_v10  ;;  %vm2972_vm9 = vweird.f32 %v4766_v54 }
 0x989   : > { %v3132_v50 = vpack.c.bf16 %v3118_v0, %v3117_v39  ;;  %v2831_v56 = vmul.f32 %v6821_v12, %v6821_v12  ;;  %vm2973_vm11 = vmor %vm2971_vm10, %vm2972_vm9 }
 0x98a   : > { %v2967_v5 = vmul.f32 %v4766_v54, %v2966_v33  ;;  %v2964_v14 = vsel %vm2963_vm8, %v4764_v62, %v2960_v57 }
 0x98b   : > { %4230 = vmatmul.msk.bf16.gmra.mxu1 %vm458_vm0, %v3132_v50  ;;  %v2871_v60 = vsel %vm458_vm0, %v2831_v56, 0.0  ;;  %v3079_v21 = vmul.f32 %v2964_v14, %v6700_v38 }
 0x98c   : > { %v2968_v63 = vmul.f32 0.5, %v2967_v5  ;;  %v2858_v26 = vpop.xlane.xlu2 %2857  ;;  %2872 = vadd.xlane.f32.xlu2 %v2871_v60 }
 0x98d   : > { %v3099_v41 = vmul.f32 %v6773_v16, %v3079_v21  ;;  %v2890_v27 = vmul.f32 %v2858_v26, %v7566_v53 }
 0x98e   : > { %v2969_v20 = vsub.f32 1.5, %v2968_v63 }
 0x98f   : > { %v2906_v61 = vadd.f32 1e-05, %v2890_v27 }
 0x990   : > { %v2970_v43 = vmul.f32 %v4766_v54, %v2969_v20 }
 0x991   : > { %4767 = vrsqrt.f32 %v2906_v61  ;;  %vm2991_vm13 = vweird.f32 %v2906_v61 }
 0x992   : > { %v2974_v18 = vsel %vm2973_vm11, %v4766_v54, %v2970_v43  ;;  %v2786_v11 = vpop.xlane.xlu0 %2785 }
 0x993   : > { %v3080_v4 = vmul.f32 %v2974_v18, %v6713_v7  ;;  %v2802_v36 = vmul.f32 %v2786_v11, %v7566_v53  ;;  %v3119_v7 = vadd.f32 %v6781_v30, %v3099_v41 }
 0x994   : > { %v2783_v52 = vpop.xlane.xlu2 %2782 }
 0x995   : > { %v6834_v62 = vsub.f32 %v6739_v25, %v2802_v36  ;;  %v2801_v48 = vmul.f32 %v2783_v52, %v7566_v53  ;;  %v3100_v58 = vmul.f32 %v6773_v16, %v3080_v4 }
 0x997   : > { %v6839_v38 = vsub.f32 %v6736_v9, %v2801_v48  ;;  %v2834_v10 = vmul.f32 %v6834_v62, %v6834_v62  ;;  %v3120_v45 = vadd.f32 %v6781_v30, %v3100_v58  ;;  %v4768_v49 = vpop.eup %4767 }
 0x998   : > { %v2986_v23 = vmul.f32 %v4768_v49, %v2906_v61  ;;  %vm2992_vm12 = vweird.f32 %v4768_v49 }
 0x999   : > { %v2880_v55 = vsel %vm458_vm0, %v2834_v10, 0.0  ;;  %v3133_v51 = vpack.c.bf16 %v3120_v45, %v3119_v7  ;;  %v2833_v29 = vmul.f32 %v6839_v38, %v6839_v38  ;;  %vm2993_vm14 = vmor %vm2991_vm13, %vm2992_vm12 }
 0x99a   : > { %2881 = vadd.xlane.f32.xlu2 %v2880_v55  ;;  %v2987_v17 = vmul.f32 %v4768_v49, %v2986_v23 }
 0x99b   : > { %4231 = vmatmul.msk.bf16.gmra.mxu1 %vm458_vm0, %v3133_v51  ;;  %v2877_v32 = vsel %vm458_vm0, %v2833_v29, 0.0 }
 0x99c   : > { %2878 = vadd.xlane.f32.xlu1 %v2877_v32  ;;  %v2988_v0 = vmul.f32 0.5, %v2987_v17  ;;  %v6872_v32 = vld [vmem:[%s7511_s10] ss:$0 sm:$0xff] }
 0x99e   : > { %v2989_v57 = vsub.f32 1.5, %v2988_v0 }
 0x9a0   : > { %v2990_v60 = vmul.f32 %v4768_v49, %v2989_v57 }
 0x9a2   : > { %v2994_v21 = vsel %vm2993_vm14, %v4768_v49, %v2990_v60 }
 0x9a3   : > { %v3082_v36 = vmul.f32 %v2994_v21, %v6728_v59 }
 0x9a5   : > { %v3102_v10 = vmul.f32 %v6773_v16, %v3082_v36 }
 0x9a7   : > { %v3122_v51 = vadd.f32 %v6781_v30, %v3102_v10 }
 0x9c7   : > { %v2855_v37 = vpop.xlane.xlu1 %2854 }
 0x9c8   : > { %v2889_v54 = vmul.f32 %v2855_v37, %v7566_v53 }
 0x9ca   : > { %v2905_v39 = vadd.f32 1e-05, %v2889_v54  ;;  %v4302_v54 = vld [vmem:[%s7512_s11 + $0x38] sm:$0xff] }
 0x9cb   : > { %4012 = vmatpush.bf16.msrb.mxu0 %v4302_v54  ;;  %4305 = vmatpush.bf16.msra.mxu3 %v4302_v54 }
 0x9cc   : > { %4769 = vrsqrt.f32 %v2905_v39  ;;  %vm2981_vm1 = vweird.f32 %v2905_v39 }
 0x9cf   : > { %v2780_v33 = vpop.xlane.xlu1 %2779 }
 0x9d0   : > { %v2800_v50 = vmul.f32 %v2780_v33, %v7566_v53 }
 0x9d2   : > { %v4770_v56 = vpop.eup %4769  ;;  %v6854_v5 = vsub.f32 %v6762_v31, %v2800_v50  ;;  %v4301_v50 = vld [vmem:[%s7512_s11 + $0x30] sm:$0xff] }
 0x9d3   : > { %v2976_v14 = vmul.f32 %v4770_v56, %v2905_v39  ;;  %vm2982_vm15 = vweird.f32 %v4770_v56  ;;  %4013 = vmatpush.bf16.msrb.mxu0 %v4301_v50  ;;  %4306 = vmatpush.bf16.msra.mxu3 %v4301_v50 }
 0x9d4   : > { %v2832_v63 = vmul.f32 %v6854_v5, %v6854_v5  ;;  %vm2983_vm2 = vmor %vm2981_vm1, %vm2982_vm15 }
 0x9d5   : > { %v2977_v26 = vmul.f32 %v4770_v56, %v2976_v14 }
 0x9d6   : > { %v2874_v20 = vsel %vm458_vm0, %v2832_v63, 0.0 }
 0x9d7   : > { %v2978_v43 = vmul.f32 0.5, %v2977_v26  ;;  %2875 = vadd.xlane.f32.xlu0 %v2874_v20  ;;  %v2861_v18 = vpop.xlane.xlu1 %2860 }
 0x9d8   : > { %v2891_v11 = vmul.f32 %v2861_v18, %v7566_v53 }
 0x9d9   : > { %v2979_v4 = vsub.f32 1.5, %v2978_v43 }
 0x9da   : > { %v2907_v41 = vadd.f32 1e-05, %v2891_v11 }
 0x9db   : > { %v2980_v52 = vmul.f32 %v4770_v56, %v2979_v4 }
 0x9dc   : > { %4771 = vrsqrt.f32 %v2907_v41  ;;  %vm3001_vm4 = vweird.f32 %v2907_v41 }
 0x9dd   : > { %v2984_v48 = vsel %vm2983_vm2, %v4770_v56, %v2980_v52 }
 0x9de   : > { %v3081_v58 = vmul.f32 %v2984_v48, %v6755_v22 }
 0x9e0   : > { %v3101_v7 = vmul.f32 %v6773_v16, %v3081_v58 }
 0x9e2   : > { %v6864_v45 = vpop.eup %4771  ;;  %v3121_v55 = vadd.f32 %v6781_v30, %v3101_v7 }
 0x9e3   : > { %v2996_v59 = vmul.f32 %v6864_v45, %v2907_v41  ;;  %vm3002_vm3 = vweird.f32 %v6864_v45  ;;  %v4300_v41 = vld [vmem:[%s7512_s11 + $0x28] sm:$0xff] }
 0x9e4   : > { %v3134_v29 = vpack.c.bf16 %v3122_v51, %v3121_v55  ;;  %vm6911_vm5 = vmor %vm3001_vm4, %vm3002_vm3  ;;  %4014 = vmatpush.bf16.msrb.mxu0 %v4300_v41  ;;  %4307 = vmatpush.bf16.msra.mxu3 %v4300_v41 }
 0x9e5   : > { %v2997_v27 = vmul.f32 %v6864_v45, %v2996_v59 }
 0x9e6   : > { %4232 = vmatmul.msk.bf16.gmra.mxu1 %vm458_vm0, %v3134_v29 }
 0x9e7   : > { %v2864_v22 = vpop.xlane.xlu2 %2863  ;;  %v2998_v39 = vmul.f32 0.5, %v2997_v27 }
 0x9e8   : > { %v2892_v61 = vmul.f32 %v2864_v22, %v7566_v53  ;;  %v3192_v49 = vpop.f32.mrf.mxu1 }
 0x9e9   : > { %v6878_v23 = vadd.f32 %v6872_v32, %v3192_v49  ;;  %v2999_v56 = vsub.f32 1.5, %v2998_v39 }
 0x9ea   : > { %v2908_v17 = vadd.f32 1e-05, %v2892_v61 }
 0x9eb   : > { %v6881_v37 = vmul.f32 0.70710677, %v6878_v23  ;;  %v3000_v36 = vmul.f32 %v6864_v45, %v2999_v56 }
 0x9ec   : > { %4773 = vrsqrt.f32 %v2908_v17  ;;  %vm3011_vm7 = vweird.f32 %v2908_v17 }
 0x9ed   : > { %v3264_v0 = vmul.f32 %v6881_v37, %v6881_v37  ;;  %v3004_v27 = vsel %vm6911_vm5, %v6864_v45, %v3000_v36 }
 0x9ef   : > { %v6888_v57 = vmin.f32 %v3264_v0, 16.0  ;;  %v2867_v33 = vpop.xlane.xlu0 %2866 }
 0x9f0   : > { %v2893_v60 = vmul.f32 %v2867_v33, %v7566_v53  ;;  %v3194_v14 = vpop.f32.mrf.mxu1 }
 0x9f1   : > { %v3266_v63 = vmul.f32 2.1237322e-06, %v6888_v57  ;;  %v3277_v26 = vmul.f32 3.8918573e-05, %v6888_v57  ;;  %v6897_v20 = vadd.f32 %v6872_v32, %v3194_v14 }
 0x9f2   : > { %v4774_v21 = vpop.eup %4773  ;;  %v6899_v43 = vadd.f32 1e-05, %v2893_v60 }
 0x9f3   : > { %v3006_v18 = vmul.f32 %v4774_v21, %v2908_v17  ;;  %v3267_v11 = vadd.f32 0.00028619796, %v3266_v63  ;;  %v3278_v4 = vadd.f32 0.001143296, %v3277_v26  ;;  %v6905_v52 = vmul.f32 0.70710677, %v6897_v20 }
 0x9f4   : > { %4775 = vrsqrt.f32 %v6899_v43  ;;  %vm3012_vm6 = vweird.f32 %v4774_v21  ;;  %v3083_v26 = vmul.f32 %v3004_v27, %v6766_v19  ;;  %vm3021_vm10 = vweird.f32 %v6899_v43 }
 0x9f5   : > { %v3007_v48 = vmul.f32 %v4774_v21, %v3006_v18  ;;  %v3268_v58 = vmul.f32 %v3267_v11, %v6888_v57  ;;  %v3279_v10 = vmul.f32 %v3278_v4, %v6888_v57  ;;  %v3304_v7 = vmul.f32 %v6905_v52, %v6905_v52  ;;  %vm3013_vm8 = vmor %vm3011_vm7, %vm3012_vm6  ;;  %v4299_v4 = vld [vmem:[%s7512_s11 + $0x20] sm:$0xff] }
 0x9f6   : > { %4015 = vmatpush.bf16.msrb.mxu0 %v4299_v4  ;;  %4308 = vmatpush.bf16.msra.mxu3 %v4299_v4 }
 0x9f7   : > { %v3008_v51 = vmul.f32 0.5, %v3007_v48  ;;  %v3269_v59 = vadd.f32 0.0036580483, %v3268_v58  ;;  %v3280_v29 = vadd.f32 0.014752088, %v3279_v10  ;;  %v2870_v22 = vpop.xlane.xlu1 %2869  ;;  %v6918_v61 = vmin.f32 %v3304_v7, 16.0 }
 0x9f8   : > { %v2894_v49 = vmul.f32 %v2870_v22, %v7566_v53 }
 0x9f9   : > { %v3009_v54 = vsub.f32 1.5, %v3008_v51  ;;  %v3270_v39 = vmul.f32 %v3269_v59, %v6888_v57  ;;  %v3281_v0 = vmul.f32 %v3280_v29, %v6888_v57  ;;  %v3306_v50 = vmul.f32 2.1237322e-06, %v6918_v61 }
 0x9fa   : > { %v6926_v33 = vpop.eup %4775  ;;  %v3317_v45 = vmul.f32 3.8918573e-05, %v6918_v61  ;;  %v6930_v56 = vadd.f32 1e-05, %v2894_v49 }
 0x9fb   : > { %v3010_v60 = vmul.f32 %v4774_v21, %v3009_v54  ;;  %v3282_v14 = vadd.f32 0.112945676, %v3281_v0  ;;  %v3016_v63 = vmul.f32 %v6926_v33, %v6899_v43  ;;  %v3307_v18 = vadd.f32 0.00028619796, %v3306_v50 }
 0x9fc   : > { %v3318_v11 = vadd.f32 0.001143296, %v3317_v45  ;;  %4777 = vrsqrt.f32 %v6930_v56  ;;  %v3271_v48 = vadd.f32 0.05243302, %v3270_v39  ;;  %v3103_v54 = vmul.f32 %v6773_v16, %v3083_v26  ;;  %v4298_v39 = vld [vmem:[%s7512_s11 + $0x18] sm:$0xff] }
 0x9fd   : > { %v3014_v36 = vsel %vm3013_vm8, %v4774_v21, %v3010_v60  ;;  %v3283_v58 = vmul.f32 %v3282_v14, %v6888_v57  ;;  %v3017_v17 = vmul.f32 %v6926_v33, %v3016_v63  ;;  %v3308_v7 = vmul.f32 %v3307_v18, %v6918_v61  ;;  %4016 = vmatpush.bf16.msrb.mxu0 %v4298_v39 }
 0x9fe   : > { %v3084_v10 = vmul.f32 %v3014_v36, %v6794_v46  ;;  %v3319_v19 = vmul.f32 %v3318_v11, %v6918_v61  ;;  %v3272_v21 = vmul.f32 %v3271_v48, %v6888_v57  ;;  %4309 = vmatpush.bf16.msra.mxu3 %v4298_v39  ;;  %v3123_v4 = vadd.f32 %v6781_v30, %v3103_v54  ;;  %v4297_v36 = vld [vmem:[%s7512_s11 + $0x10] sm:$0xff] }
 0x9ff   : > { %v3284_v55 = vadd.f32 0.4994258, %v3283_v58  ;;  %v3018_v51 = vmul.f32 0.5, %v3017_v17  ;;  %v3309_v59 = vadd.f32 0.0036580483, %v3308_v7  ;;  %v6961_v26 = vpop.xlane.xlu2 %2872  ;;  %vm3022_vm9 = vweird.f32 %v6926_v33 }
 0xa00   : > { %v3320_v29 = vadd.f32 0.014752088, %v3319_v19  ;;  %v3104_v22 = vmul.f32 %v6773_v16, %v3084_v10  ;;  %v3273_v18 = vadd.f32 0.18741608, %v3272_v21  ;;  %vm6979_vm11 = vmor %vm3021_vm10, %vm3022_vm9  ;;  %vm3031_vm13 = vweird.f32 %v6930_v56 }
 0xa01   : > { %v3285_v27 = vmul.f32 %v3284_v55, %v6888_v57  ;;  %v3310_v46 = vmul.f32 %v3309_v59, %v6918_v61  ;;  %v3019_v45 = vsub.f32 1.5, %v3018_v51  ;;  %4017 = vmatpush.bf16.msrb.mxu0 %v4297_v36 }
 0xa02   : > { %v6947_v49 = vpop.eup %4777  ;;  %v3321_v41 = vmul.f32 %v3320_v29, %v6918_v61  ;;  %v3124_v63 = vadd.f32 %v6781_v30, %v3104_v22  ;;  %4310 = vmatpush.bf16.msra.mxu3 %v4297_v36  ;;  %v3274_v55 = vmul.f32 %v3273_v18, %v6888_v57 }
 0xa03   : > { %v6955_v0 = vadd.f32 1.0, %v3285_v27  ;;  %v3026_v50 = vmul.f32 %v6947_v49, %v6930_v56  ;;  %v3311_v60 = vadd.f32 0.05243302, %v3310_v46  ;;  %v3020_v17 = vmul.f32 %v6926_v33, %v3019_v45 }
 0xa04   : > { %v3322_v14 = vadd.f32 0.112945676, %v3321_v41  ;;  %v3135_v7 = vpack.c.bf16 %v3124_v63, %v3123_v4  ;;  %vm3032_vm12 = vweird.f32 %v6947_v49  ;;  %v3275_v54 = vadd.f32 1.1283791, %v3274_v55 }
 0xa05   : > { %4779 = vrcp.f32 %v6955_v0  ;;  %v3312_v48 = vmul.f32 %v3311_v60, %v6918_v61  ;;  %v3027_v58 = vmul.f32 %v6947_v49, %v3026_v50  ;;  %v3024_v41 = vsel %vm6979_vm11, %v6926_v33, %v3020_v17  ;;  %vm3033_vm14 = vmor %vm3031_vm13, %vm3032_vm12  ;;  %v4296_v33 = vld [vmem:[%s7512_s11 + $0x8] sm:$0xff] }
 0xa06   : > { %v3323_v11 = vmul.f32 %v3322_v14, %v6918_v61  ;;  %4233 = vmatmul.msk.bf16.gmra.mxu1 %vm458_vm0, %v3135_v7  ;;  %v3296_v14 = vand.u32 2147483647, %v6955_v0  ;;  %v3298_v63 = vand.u32 2147483648, %v6955_v0  ;;  %v3085_v18 = vmul.f32 %v3024_v41, %v6802_v3  ;;  %4018 = vmatpush.bf16.msrb.mxu0 %v4296_v33 }
 0xa07   : > { %v3028_v51 = vmul.f32 0.5, %v3027_v58  ;;  %v3313_v27 = vadd.f32 0.18741608, %v3312_v48  ;;  %v3276_v7 = vmul.f32 %v3275_v54, %v6881_v37  ;;  %4311 = vmatpush.bf16.msra.mxu3 %v4296_v33  ;;  %vm3292_vm1 = vweird.f32 %v6955_v0 }
 0xa08   : > { %v3324_v10 = vadd.f32 0.4994258, %v3323_v11  ;;  %v3197_v19 = vpop.f32.mrf.mxu1  ;;  %vm3297_vm3 = vcmp.eq.f32.partialorder %v3296_v14, 8.507059e+37  ;;  %v3233_v14 = vmul.f32 0.5, %v6897_v20 }
 0xa09   : > { %v6974_v59 = vadd.f32 %v6872_v32, %v3197_v19  ;;  %v3029_v46 = vsub.f32 1.5, %v3028_v51  ;;  %v3314_v56 = vmul.f32 %v3313_v27, %v6918_v61  ;;  %v4295_v51 = vld [vmem:[%s7512_s11] sm:$0xff] }
 0xa0a   : > { %v3325_v29 = vmul.f32 %v3324_v10, %v6918_v61  ;;  %v7008_v10 = vmul.f32 0.5, %v6878_v23  ;;  %v3299_v23 = vor.u32 1.1754944e-38, %v3298_v63  ;;  %4019 = vmatpush.bf16.msrb.mxu0 %v4295_v51 }
 0xa0b   : > { %v4780_v22 = vpop.eup %4779  ;;  %v3030_v39 = vmul.f32 %v6947_v49, %v3029_v46  ;;  %v6993_v50 = vmul.f32 0.70710677, %v6974_v59  ;;  %v3315_v27 = vadd.f32 1.1283791, %v3314_v56  ;;  %4312 = vmatpush.bf16.msra.mxu3 %v4295_v51 }
 0xa0c   : > { %v3288_v57 = vmul.f32 %v4780_v22, %v6955_v0  ;;  %v6988_v43 = vadd.f32 1.0, %v3325_v29  ;;  %vm3293_vm15 = vweird.f32 %v4780_v22 }
 0xa0d   : > { %v2882_v45 = vpop.xlane.xlu2 %2881  ;;  %v3034_v11 = vsel %vm3033_vm14, %v6947_v49, %v3030_v39  ;;  %v3344_v48 = vmul.f32 %v6993_v50, %v6993_v50  ;;  %vm3294_vm2 = vmor %vm3292_vm1, %vm3293_vm15  ;;  %v3316_v63 = vmul.f32 %v3315_v27, %v6905_v52 }
 0xa0e   : > { %v3289_v60 = vsub.f32 1.0, %v3288_v57  ;;  %4781 = vrcp.f32 %v6988_v43  ;;  %v2898_v58 = vmul.f32 %v2882_v45, %v7566_v53  ;;  %v3086_v3 = vmul.f32 %v3034_v11, %v6811_v28 }
 0xa0f   : > { %v2879_v4 = vpop.xlane.xlu1 %2878  ;;  %v7014_v19 = vmin.f32 %v3344_v48, 16.0  ;;  %v3105_v28 = vmul.f32 %v6773_v16, %v3085_v18  ;;  %v3336_v39 = vand.u32 2147483647, %v6988_v43  ;;  %v3338_v18 = vand.u32 2147483648, %v6988_v43 }
 0xa10   : > { %v3290_v36 = vmul.f32 %v4780_v22, %v3289_v60  ;;  %v3199_v17 = vpop.f32.mrf.mxu1  ;;  %v2897_v61 = vmul.f32 %v2879_v4, %v7566_v53  ;;  %v7016_v55 = vadd.f32 1e-05, %v2898_v58  ;;  %v3106_v54 = vmul.f32 %v6773_v16, %v3086_v3 }
 0xa11   : > { %v3357_v0 = vmul.f32 3.8918573e-05, %v7014_v19  ;;  %v7029_v41 = vadd.f32 %v6872_v32, %v3199_v17  ;;  %v3346_v45 = vmul.f32 2.1237322e-06, %v7014_v19  ;;  %v3125_v11 = vadd.f32 %v6781_v30, %v3105_v28 }
 0xa12   : > { %v3291_v49 = vadd.f32 %v4780_v22, %v3290_v36  ;;  %v7022_v37 = vadd.f32 1e-05, %v2897_v61  ;;  %4783 = vrsqrt.f32 %v7016_v55  ;;  %v3126_v48 = vadd.f32 %v6781_v30, %v3106_v54 }
 0xa13   : > { %v7041_v36 = vmul.f32 0.70710677, %v7029_v41  ;;  %vm3332_vm5 = vweird.f32 %v6988_v43  ;;  %vm7045_vm6 = vcmp.eq.f32.partialorder %v3336_v39, 8.507059e+37  ;;  %v3347_v52 = vadd.f32 0.00028619796, %v3346_v45 }
 0xa14   : > { %v4782_v29 = vpop.eup %4781  ;;  %v3295_v21 = vsel %vm3294_vm2, %v4780_v22, %v3291_v49  ;;  %v3358_v22 = vadd.f32 0.001143296, %v3357_v0  ;;  %4785 = vrsqrt.f32 %v7022_v37  ;;  %vm3071_vm8 = vweird.f32 %v7016_v55 }
 0xa15   : > { %v3300_v46 = vsel %vm3297_vm3, %v3299_v23, %v3295_v21  ;;  %v3328_v57 = vmul.f32 %v4782_v29, %v6988_v43  ;;  %vm3333_vm4 = vweird.f32 %v4782_v29  ;;  %v3384_v51 = vmul.f32 %v7041_v36, %v7041_v36 }
 0xa16   : > { %v3301_v60 = vmul.f32 %v3300_v46, %v3276_v7  ;;  %v3359_v56 = vmul.f32 %v3358_v22, %v7014_v19  ;;  %vm3334_vm7 = vmor %vm3332_vm5, %vm3333_vm4  ;;  %v3339_v23 = vor.u32 1.1754944e-38, %v3338_v18  ;;  %v3136_v43 = vpack.c.bf16 %v3126_v48, %v3125_v11 }
 0xa17   : > { %v3329_v33 = vsub.f32 1.0, %v3328_v57  ;;  %v7054_v46 = vmin.f32 %v3384_v51, 16.0  ;;  %v3348_v39 = vmul.f32 %v3347_v52, %v7014_v19  ;;  %vm3061_vm10 = vweird.f32 %v7022_v37 }
 0xa18   : > { %v4784_v58 = vpop.eup %4783  ;;  %v3360_v17 = vadd.f32 0.014752088, %v3359_v56  ;;  %v3202_v7 = vpop.f32.mrf.mxu1  ;;  %v4237_v3 = vclamps-f32 %v3301_v60, 1.0  ;;  %4234 = vmatmul.msk.bf16.gmra.mxu1 %vm458_vm0, %v3136_v43 }
 0xa19   : > { %v3330_v4 = vmul.f32 %v4782_v29, %v3329_v33  ;;  %v3066_v49 = vmul.f32 %v4784_v58, %v7016_v55  ;;  %v7057_v57 = vadd.f32 %v6872_v32, %v3202_v7  ;;  %vm3072_vm9 = vweird.f32 %v4784_v58 }
 0xa1a   : > { %v3361_v28 = vmul.f32 %v3360_v17, %v7014_v19  ;;  %v4786_v21 = vpop.eup %4785  ;;  %v3904_v60 = vadd.f32 1.0, %v4237_v3  ;;  %v3349_v7 = vadd.f32 0.0036580483, %v3348_v39  ;;  %vm3073_vm11 = vmor %vm3071_vm8, %vm3072_vm9 }
 0xa1b   : > { %v3331_v61 = vadd.f32 %v4782_v29, %v3330_v4  ;;  %v3067_v0 = vmul.f32 %v4784_v58, %v3066_v49  ;;  %v3056_v22 = vmul.f32 %v4786_v21, %v7022_v37  ;;  %v3397_v4 = vmul.f32 3.8918573e-05, %v7054_v46 }
 0xa1c   : > { %v3362_v45 = vadd.f32 0.112945676, %v3361_v28  ;;  %v7068_v52 = vmul.f32 0.70710677, %v7057_v57  ;;  %v3920_v28 = vmul.f32 %v3904_v60, %v7008_v10  ;;  %vm3062_vm12 = vweird.f32 %v4786_v21 }
 0xa1d   : > { %v3335_v27 = vsel %vm3334_vm7, %v4782_v29, %v3331_v61  ;;  %v3068_v18 = vmul.f32 0.5, %v3067_v0  ;;  %v3386_v29 = vmul.f32 2.1237322e-06, %v7054_v46  ;;  %v3057_v11 = vmul.f32 %v4786_v21, %v3056_v22  ;;  %vm3063_vm13 = vmor %vm3061_vm10, %vm3062_vm12 }
 0xa1e   : > { %v3340_v54 = vsel %vm7045_vm6, %v3339_v23, %v3335_v27  ;;  %v3363_v56 = vmul.f32 %v3362_v45, %v7014_v19  ;;  %v3398_v23 = vadd.f32 0.001143296, %v3397_v4  ;;  %v3424_v0 = vmul.f32 %v7068_v52, %v7068_v52 }
 0xa1f   : > { %v3341_v33 = vmul.f32 %v3340_v54, %v3316_v63  ;;  %v3069_v20 = vsub.f32 1.5, %v3068_v18  ;;  %v3387_v17 = vadd.f32 0.00028619796, %v3386_v29  ;;  %v3058_v49 = vmul.f32 0.5, %v3057_v11 }
 0xa20   : > { %v3364_v61 = vadd.f32 0.4994258, %v3363_v56  ;;  %v3399_v45 = vmul.f32 %v3398_v23, %v7054_v46  ;;  %v3350_v22 = vmul.f32 %v3349_v7, %v7014_v19  ;;  %v3204_v18 = vpop.f32.mrf.mxu1  ;;  %v7084_v11 = vmin.f32 %v3424_v0, 16.0 }
 0xa21   : > { %v4238_v48 = vclamps-f32 %v3341_v33, 1.0  ;;  %v3070_v3 = vmul.f32 %v4784_v58, %v3069_v20  ;;  %v3388_v51 = vmul.f32 %v3387_v17, %v7054_v46  ;;  %v3059_v27 = vsub.f32 1.5, %v3058_v49 }
 0xa22   : > { %v3365_v43 = vmul.f32 %v3364_v61, %v7014_v19  ;;  %v3400_v56 = vadd.f32 0.014752088, %v3399_v45  ;;  %v3351_v4 = vadd.f32 0.05243302, %v3350_v22  ;;  %v3437_v7 = vmul.f32 3.8918573e-05, %v7084_v11 }
 0xa23   : > { %v3905_v63 = vadd.f32 1.0, %v4238_v48  ;;  %v3074_v39 = vsel %vm3073_vm11, %v4784_v58, %v3070_v3  ;;  %v3060_v60 = vmul.f32 %v4786_v21, %v3059_v27  ;;  %v3389_v55 = vadd.f32 0.0036580483, %v3388_v51 }
 0xa24   : > { %v7081_v33 = vadd.f32 1.0, %v3365_v43  ;;  %v3090_v10 = vmul.f32 %v3074_v39, %v6834_v62  ;;  %v7090_v58 = vadd.f32 %v6872_v32, %v3204_v18  ;;  %v3401_v20 = vmul.f32 %v3400_v56, %v7054_v46 }
 0xa25   : > { %v3921_v54 = vmul.f32 %v3905_v63, %v3233_v14  ;;  %v3064_v14 = vsel %vm3063_vm13, %v4786_v21, %v3060_v60  ;;  %v3390_v17 = vmul.f32 %v3389_v55, %v7054_v46  ;;  %v3426_v21 = vmul.f32 2.1237322e-06, %v7084_v11 }
 0xa26   : > { %4787 = vrcp.f32 %v7081_v33  ;;  %v3110_v62 = vmul.f32 %v6773_v16, %v3090_v10  ;;  %v3089_v48 = vmul.f32 %v3064_v14, %v6839_v38  ;;  %v3402_v37 = vadd.f32 0.112945676, %v3401_v20 }
 0xa27   : > { %v3936_v29 = vpack.c.bf16 %v3921_v54, %v3920_v28  ;;  %v3438_v49 = vadd.f32 0.001143296, %v3437_v7  ;;  %v7100_v63 = vmul.f32 0.70710677, %v7090_v58  ;;  %v3352_v51 = vmul.f32 %v3351_v4, %v7014_v19 }
 0xa28   : > { %v3109_v61 = vmul.f32 %v6773_v16, %v3089_v48  ;;  %v3130_v38 = vadd.f32 %v6781_v30, %v3110_v62  ;;  %v3403_v28 = vmul.f32 %v3402_v37, %v7054_v46  ;;  %v3391_v27 = vadd.f32 0.05243302, %v3390_v17 }
 0xa29   : > { %4020 = vmatmul.bf16.vlgmr.msrb.gmra.mxu0 %v3936_v29  ;;  %v3439_v16 = vmul.f32 %v3438_v49, %v7084_v11  ;;  %v3427_v39 = vadd.f32 0.00028619796, %v3426_v21  ;;  %v3464_v45 = vmul.f32 %v7100_v63, %v7100_v63  ;;  %v2895_v22 = vmul.f32 %v6961_v26, %v7566_v53 }
 0xa2a   : > { %v3129_v23 = vadd.f32 %v6781_v30, %v3109_v61  ;;  %v3404_v54 = vadd.f32 0.4994258, %v3403_v28  ;;  %v3353_v18 = vadd.f32 0.18741608, %v3352_v51  ;;  %v3392_v56 = vmul.f32 %v3391_v27, %v7054_v46 }
 0xa2b   : > { %v3440_v60 = vadd.f32 0.014752088, %v3439_v16  ;;  %v7113_v29 = vmin.f32 %v3464_v45, 16.0  ;;  %v3428_v62 = vmul.f32 %v3427_v39, %v7084_v11  ;;  %v7120_v26 = vadd.f32 1e-05, %v2895_v22 }
 0xa2c   : > { %v4788_v3 = vpop.eup %4787  ;;  %v3138_v0 = vpack.c.bf16 %v3130_v38, %v3129_v23  ;;  %v3405_v30 = vmul.f32 %v3404_v54, %v7054_v46  ;;  %v3354_v7 = vmul.f32 %v3353_v18, %v7014_v19  ;;  %v3378_v37 = vand.u32 2147483648, %v7081_v33 }
 0xa2d   : > { %v3368_v43 = vmul.f32 %v4788_v3, %v7081_v33  ;;  %v3441_v14 = vmul.f32 %v3440_v60, %v7084_v11  ;;  %v3466_v48 = vmul.f32 2.1237322e-06, %v7113_v29  ;;  %v3477_v17 = vmul.f32 3.8918573e-05, %v7113_v29 }
 0xa2e   : > { %4236 = vmatmul.msk.bf16.vlgmr.msrb.gmra.mxu2 %vm458_vm0, %v3138_v0  ;;  %v3406_v4 = vadd.f32 1.0, %v3405_v30  ;;  %vm3373_vm14 = vweird.f32 %v4788_v3  ;;  %v3393_v21 = vadd.f32 0.18741608, %v3392_v56  ;;  %vm3372_vm15 = vweird.f32 %v7081_v33 }
 0xa2f   : > { %v3369_v10 = vsub.f32 1.0, %v3368_v43  ;;  %v3442_v20 = vadd.f32 0.112945676, %v3441_v14  ;;  %v3467_v51 = vadd.f32 0.00028619796, %v3466_v48  ;;  %vm3374_vm1 = vmor %vm3372_vm15, %vm3373_vm14  ;;  %v3379_v54 = vor.u32 1.1754944e-38, %v3378_v37 }
 0xa30   : > { %4789 = vrcp.f32 %v3406_v4  ;;  %v3376_v38 = vand.u32 2147483647, %v7081_v33  ;;  %v3429_v23 = vadd.f32 0.0036580483, %v3428_v62  ;;  %v3478_v28 = vadd.f32 0.001143296, %v3477_v17 }
 0xa31   : > { %v3370_v55 = vmul.f32 %v4788_v3, %v3369_v10  ;;  %v3443_v49 = vmul.f32 %v3442_v20, %v7084_v11  ;;  %v3355_v27 = vadd.f32 1.1283791, %v3354_v7  ;;  %v3468_v19 = vmul.f32 %v3467_v51, %v7113_v29 }
 0xa32   : > { %v3479_v0 = vmul.f32 %v3478_v28, %v7113_v29  ;;  %4791 = vrsqrt.f32 %v7120_v26  ;;  %v3394_v39 = vmul.f32 %v3393_v21, %v7054_v46  ;;  %vm3377_vm2 = vcmp.eq.f32.partialorder %v3376_v38, 8.507059e+37 }
 0xa33   : > { %v3371_v61 = vadd.f32 %v4788_v3, %v3370_v55  ;;  %v3444_v43 = vadd.f32 0.4994258, %v3443_v49  ;;  %v3430_v33 = vmul.f32 %v3429_v23, %v7084_v11  ;;  %v3469_v55 = vadd.f32 0.0036580483, %v3468_v19 }
 0xa34   : > { %v3480_v10 = vadd.f32 0.014752088, %v3479_v0  ;;  %v3395_v14 = vadd.f32 1.1283791, %v3394_v39  ;;  %v3418_v46 = vand.u32 2147483648, %v3406_v4  ;;  %vm3412_vm4 = vweird.f32 %v3406_v4 }
 0xa35   : > { %v3375_v16 = vsel %vm3374_vm1, %v4788_v3, %v3371_v61  ;;  %v3445_v45 = vmul.f32 %v3444_v43, %v7084_v11  ;;  %v3356_v3 = vmul.f32 %v3355_v27, %v6993_v50  ;;  %v3431_v20 = vadd.f32 0.05243302, %v3430_v33 }
 0xa36   : > { %v4790_v22 = vpop.eup %4789  ;;  %v3380_v60 = vsel %vm3377_vm2, %v3379_v54, %v3375_v16  ;;  %v3481_v56 = vmul.f32 %v3480_v10, %v7113_v29  ;;  %v3416_v61 = vand.u32 2147483647, %v3406_v4  ;;  %v3470_v50 = vmul.f32 %v3469_v55, %v7113_v29 }
 0xa37   : > { %v3408_v18 = vmul.f32 %v4790_v22, %v3406_v4  ;;  %v7135_v30 = vadd.f32 1.0, %v3445_v45  ;;  %v3381_v48 = vmul.f32 %v3380_v60, %v3356_v3  ;;  %vm3413_vm3 = vweird.f32 %v4790_v22 }
 0xa38   : > { %v7139_v17 = vpop.eup %4791  ;;  %v3482_v37 = vadd.f32 0.112945676, %v3481_v56  ;;  %vm3414_vm5 = vmor %vm3412_vm4, %vm3413_vm3  ;;  %v3419_v23 = vor.u32 1.1754944e-38, %v3418_v46  ;;  %v3432_v28 = vmul.f32 %v3431_v20, %v7084_v11  ;;  %v3396_v43 = vmul.f32 %v3395_v14, %v7041_v36 }
 0xa39   : > { %v3409_v62 = vsub.f32 1.0, %v3408_v18  ;;  %4793 = vrcp.f32 %v7135_v30  ;;  %v3036_v51 = vmul.f32 %v7139_v17, %v7120_v26  ;;  %v4239_v38 = vclamps-f32 %v3381_v48, 1.0 }
 0xa3a   : > { %v3483_v49 = vmul.f32 %v3482_v37, %v7113_v29  ;;  %vm3417_vm6 = vcmp.eq.f32.partialorder %v3416_v61, 8.507059e+37  ;;  %v3471_v54 = vadd.f32 0.05243302, %v3470_v50  ;;  %v3433_v10 = vadd.f32 0.18741608, %v3432_v28 }
 0xa3b   : > { %v3410_v7 = vmul.f32 %v4790_v22, %v3409_v62  ;;  %v3037_v45 = vmul.f32 %v7139_v17, %v3036_v51  ;;  %v3906_v33 = vadd.f32 1.0, %v4239_v38  ;;  %v3234_v55 = vmul.f32 0.5, %v6974_v59 }
 0xa3c   : > { %v3484_v16 = vadd.f32 0.4994258, %v3483_v49  ;;  %v3472_v36 = vmul.f32 %v3471_v54, %v7113_v29  ;;  %v3235_v14 = vmul.f32 0.5, %v7029_v41  ;;  %v3434_v61 = vmul.f32 %v3433_v10, %v7084_v11 }
 0xa3d   : > { %v3411_v21 = vadd.f32 %v4790_v22, %v3410_v7  ;;  %v3038_v20 = vmul.f32 0.5, %v3037_v45  ;;  %v3922_v7 = vmul.f32 %v3906_v33, %v3234_v55  ;;  %v3458_v59 = vand.u32 2147483648, %v7135_v30 }
 0xa3e   : > { %v3485_v60 = vmul.f32 %v3484_v16, %v7113_v29  ;;  %v3473_v49 = vadd.f32 0.18741608, %v3472_v36  ;;  %vm3452_vm8 = vweird.f32 %v7135_v30  ;;  %v3456_v41 = vand.u32 2147483647, %v7135_v30 }
 0xa3f   : > { %v3415_v27 = vsel %vm3414_vm5, %v4790_v22, %v3411_v21  ;;  %v4794_v19 = vpop.eup %4793  ;;  %v3435_v38 = vadd.f32 1.1283791, %v3434_v61  ;;  %v3459_v28 = vor.u32 1.1754944e-38, %v3458_v59  ;;  %vm3042_vm11 = vweird.f32 %v7139_v17  ;;  %v4835_v61 = vld [vmem:[%s7508_s7] ss:$0 sm:$0xff] }
 0xa40   : > { %v3420_v0 = vsel %vm3417_vm6, %v3419_v23, %v3415_v27  ;;  %v3448_v4 = vmul.f32 %v4794_v19, %v7135_v30  ;;  %v3486_v22 = vadd.f32 1.0, %v3485_v60  ;;  %vm3453_vm7 = vweird.f32 %v4794_v19 }
 0xa41   : > { %v3421_v39 = vmul.f32 %v3420_v0, %v3396_v43  ;;  %vm3454_vm9 = vmor %vm3452_vm8, %vm3453_vm7  ;;  %v3474_v43 = vmul.f32 %v3473_v49, %v7113_v29  ;;  %vm3457_vm10 = vcmp.eq.f32.partialorder %v3456_v41, 8.507059e+37  ;;  %v3436_v30 = vmul.f32 %v3435_v38, %v7068_v52 }
 0xa42   : > { %v3449_v3 = vsub.f32 1.0, %v3448_v4  ;;  %4795 = vrcp.f32 %v3486_v22  ;;  %vm3041_vm12 = vweird.f32 %v7120_v26  ;;  %v3496_v29 = vand.u32 2147483647, %v3486_v22 }
 0xa43   : > { %v4240_v18 = vclamps-f32 %v3421_v39, 1.0  ;;  %v3475_v4 = vadd.f32 1.1283791, %v3474_v43  ;;  %vm3043_vm14 = vmor %vm3041_vm12, %vm3042_vm11  ;;  %vm3492_vm15 = vweird.f32 %v3486_v22 }
 0xa44   : > { %v3450_v48 = vmul.f32 %v4794_v19, %v3449_v3  ;;  %vm3497_vm2 = vcmp.eq.f32.partialorder %v3496_v29, 8.507059e+37 }
 0xa45   : > { %v3907_v62 = vadd.f32 1.0, %v4240_v18 }
 0xa46   : > { %v3451_v50 = vadd.f32 %v4794_v19, %v3450_v48 }
 0xa47   : > { %v3923_v37 = vmul.f32 %v3907_v62, %v3235_v14 }
 0xa48   : > { %v3455_v23 = vsel %vm3454_vm9, %v4794_v19, %v3451_v50  ;;  %v4796_v11 = vpop.eup %4795  ;;  %v3498_v19 = vand.u32 2147483648, %v3486_v22  ;;  %v3237_v50 = vmul.f32 0.5, %v7090_v58 }
 0xa49   : > { %v3937_v51 = vpack.c.bf16 %v3923_v37, %v3922_v7  ;;  %v3488_v27 = vmul.f32 %v4796_v11, %v3486_v22  ;;  %v3460_v16 = vsel %vm3457_vm10, %v3459_v28, %v3455_v23  ;;  %vm3493_vm13 = vweird.f32 %v4796_v11  ;;  %v4836_v23 = vld [vmem:[%s7509_s8] ss:$0 sm:$0xff] }
 0xa4a   : > { %v2876_v56 = vpop.xlane.xlu0 %2875  ;;  %v3461_v33 = vmul.f32 %v3460_v16, %v3436_v30  ;;  %vm3494_vm1 = vmor %vm3492_vm15, %vm3493_vm13  ;;  %v3499_v55 = vor.u32 1.1754944e-38, %v3498_v19 }
 0xa4b   : > { %v2896_v46 = vmul.f32 %v2876_v56, %v7566_v53  ;;  %v3039_v53 = vsub.f32 1.5, %v3038_v20  ;;  %4025 = vmatmul.bf16.vlgmr.msra.gmra.mxu3 %v3937_v51  ;;  %v3489_v39 = vsub.f32 1.0, %v3488_v27  ;;  %v3476_v56 = vmul.f32 %v3475_v4, %v7100_v63 }
 0xa4c   : > { %v4241_v52 = vclamps-f32 %v3461_v33, 1.0  ;;  %v3236_v63 = vmul.f32 0.5, %v7057_v57 }
 0xa4d   : > { %v2912_v21 = vadd.f32 1e-05, %v2896_v46  ;;  %v3040_v54 = vmul.f32 %v7139_v17, %v3039_v53  ;;  %v3490_v10 = vmul.f32 %v4796_v11, %v3489_v39 }
 0xa4e   : > { %v3908_v7 = vadd.f32 1.0, %v4241_v52 }
 0xa4f   : > { %4797 = vrsqrt.f32 %v2912_v21  ;;  %v3044_v18 = vsel %vm3043_vm14, %v7139_v17, %v3040_v54  ;;  %v3491_v3 = vadd.f32 %v4796_v11, %v3490_v10  ;;  %vm3051_vm4 = vweird.f32 %v2912_v21 }
 0xa50   : > { %v3087_v14 = vmul.f32 %v3044_v18, %v6821_v12  ;;  %v3924_v49 = vmul.f32 %v3908_v7, %v3236_v63 }
 0xa51   : > { %v3495_v26 = vsel %vm3494_vm1, %v4796_v11, %v3491_v3 }
 0xa52   : > { %v3500_v62 = vsel %vm3497_vm2, %v3499_v55, %v3495_v26  ;;  %v3107_v37 = vmul.f32 %v4835_v61, %v3087_v14 }
 0xa53   : > { %v3501_v46 = vmul.f32 %v3500_v62, %v3476_v56 }
 0xa54   : > { %v3127_v11 = vadd.f32 %v4836_v23, %v3107_v37 }
 0xa55   : > { %v4798_v0 = vpop.eup %4797  ;;  %v4242_v17 = vclamps-f32 %v3501_v46, 1.0 }
 0xa56   : > { %v3046_v45 = vmul.f32 %v4798_v0, %v2912_v21  ;;  %vm3052_vm3 = vweird.f32 %v4798_v0 }
 0xa57   : > { %vm3053_vm5 = vmor %vm3051_vm4, %vm3052_vm3  ;;  %v3909_v12 = vadd.f32 1.0, %v4242_v17 }
 0xa58   : > { %v3047_v60 = vmul.f32 %v4798_v0, %v3046_v45 }
 0xa59   : > { %v3925_v51 = vmul.f32 %v3909_v12, %v3237_v50 }
 0xa5a   : > { %v3048_v36 = vmul.f32 0.5, %v3047_v60 }
 0xa5b   : > { %v3938_v38 = vpack.c.bf16 %v3925_v51, %v3924_v49 }
 0xa5c   : > { %v3049_v48 = vsub.f32 1.5, %v3048_v36 }
 0xa5d   : > { %4030 = vmatmul.bf16.gmra.mxu3 %v3938_v38 }
 0xa5e   : > { %v3050_v20 = vmul.f32 %v4798_v0, %v3049_v48 }
 0xa60   : > { %v3054_v22 = vsel %vm3053_vm5, %v4798_v0, %v3050_v20 }
 0xa61   : > { %v3088_v59 = vmul.f32 %v3054_v22, %v6854_v5 }
 0xa63   : > { %v3207_v41 = vpop.f32.mrf.mxu1  ;;  %v3108_v21 = vmul.f32 %v4835_v61, %v3088_v59 }
 0xa64   : > { %v7173_v53 = vadd.f32 %v6872_v32, %v3207_v41 }
 0xa65   : > { %v3128_v28 = vadd.f32 %v4836_v23, %v3108_v21 }
 0xa66   : > { %v7179_v57 = vmul.f32 0.70710677, %v7173_v53 }
 0xa67   : > { %v3137_v58 = vpack.c.bf16 %v3128_v28, %v3127_v11 }
 0xa68   : > { %v3504_v5 = vmul.f32 %v7179_v57, %v7179_v57 }
 0xa69   : > { %4235 = vmatmul.msk.bf16.gmra.mxu1 %vm458_vm0, %v3137_v58 }
 0xa6a   : > { %v3505_v43 = vmin.f32 %v3504_v5, 16.0 }
 0xa6b   : > { %v3209_v27 = vpop.f32.mrf.mxu1 }
 0xa6c   : > { %v3506_v16 = vmul.f32 2.1237322e-06, %v3505_v43  ;;  %v3517_v0 = vmul.f32 3.8918573e-05, %v3505_v43  ;;  %v7185_v54 = vadd.f32 %v6872_v32, %v3209_v27 }
 0xa6e   : > { %v3507_v30 = vadd.f32 0.00028619796, %v3506_v16  ;;  %v3518_v39 = vadd.f32 0.001143296, %v3517_v0  ;;  %v7188_v4 = vmul.f32 0.70710677, %v7185_v54 }
 0xa70   : > { %v3519_v19 = vmul.f32 %v3518_v39, %v3505_v43  ;;  %v3544_v45 = vmul.f32 %v7188_v4, %v7188_v4  ;;  %v3508_v33 = vmul.f32 %v3507_v30, %v3505_v43 }
 0xa72   : > { %v3520_v10 = vadd.f32 0.014752088, %v3519_v19  ;;  %v3545_v29 = vmin.f32 %v3544_v45, 16.0  ;;  %v3509_v55 = vadd.f32 0.0036580483, %v3508_v33 }
 0xa74   : > { %v3521_v60 = vmul.f32 %v3520_v10, %v3505_v43  ;;  %v3546_v18 = vmul.f32 2.1237322e-06, %v3545_v29  ;;  %v3557_v3 = vmul.f32 3.8918573e-05, %v3545_v29  ;;  %v3510_v48 = vmul.f32 %v3509_v55, %v3505_v43 }
 0xa76   : > { %v3522_v36 = vadd.f32 0.112945676, %v3521_v60  ;;  %v3547_v52 = vadd.f32 0.00028619796, %v3546_v18  ;;  %v3558_v56 = vadd.f32 0.001143296, %v3557_v3 }
 0xa77   : > { %v3511_v61 = vadd.f32 0.05243302, %v3510_v48 }
 0xa78   : > { %v3523_v26 = vmul.f32 %v3522_v36, %v3505_v43  ;;  %v3548_v14 = vmul.f32 %v3547_v52, %v3545_v29  ;;  %v3559_v62 = vmul.f32 %v3558_v56, %v3545_v29 }
 0xa79   : > { %v3512_v59 = vmul.f32 %v3511_v61, %v3505_v43 }
 0xa7a   : > { %v3524_v46 = vadd.f32 0.4994258, %v3523_v26  ;;  %v3549_v20 = vadd.f32 0.0036580483, %v3548_v14  ;;  %v3560_v7 = vadd.f32 0.014752088, %v3559_v62 }
 0xa7b   : > { %v3513_v38 = vadd.f32 0.18741608, %v3512_v59  ;;  %v7207_v62 = vld [vmem:[%s7511_s10] ss:$0 sm:$0xff] }
 0xa7c   : > { %v3525_v17 = vmul.f32 %v3524_v46, %v3505_v43  ;;  %v3561_v22 = vmul.f32 %v3560_v7, %v3545_v29  ;;  %v3550_v63 = vmul.f32 %v3549_v20, %v3545_v29 }
 0xa7d   : > { %v3514_v16 = vmul.f32 %v3513_v38, %v3505_v43 }
 0xa7e   : > { %v3526_v37 = vadd.f32 1.0, %v3525_v17  ;;  %v3562_v50 = vadd.f32 0.112945676, %v3561_v22  ;;  %v3551_v49 = vadd.f32 0.05243302, %v3550_v63 }
 0xa7f   : > { %v3515_v60 = vadd.f32 1.1283791, %v3514_v16 }
 0xa80   : > { %4799 = vrcp.f32 %v3526_v37  ;;  %v3563_v12 = vmul.f32 %v3562_v50, %v3545_v29  ;;  %v3552_v23 = vmul.f32 %v3551_v49, %v3545_v29  ;;  %v3538_v19 = vand.u32 2147483648, %v3526_v37 }
 0xa81   : > { %v3536_v45 = vand.u32 2147483647, %v3526_v37  ;;  %vm3532_vm7 = vweird.f32 %v3526_v37  ;;  %v3516_v48 = vmul.f32 %v3515_v60, %v7179_v57 }
 0xa82   : > { %v3564_v51 = vadd.f32 0.4994258, %v3563_v12  ;;  %v3553_v0 = vadd.f32 0.18741608, %v3552_v23  ;;  %v3539_v55 = vor.u32 1.1754944e-38, %v3538_v19 }
 0xa83   : > { %v3212_v58 = vpop.f32.mrf.mxu1  ;;  %vm3537_vm9 = vcmp.eq.f32.partialorder %v3536_v45, 8.507059e+37 }
 0xa84   : > { %v3565_v41 = vmul.f32 %v3564_v51, %v3545_v29  ;;  %v7193_v5 = vadd.f32 %v6872_v32, %v3212_v58  ;;  %v3554_v32 = vmul.f32 %v3553_v0, %v3545_v29 }
 0xa86   : > { %v4800_v21 = vpop.eup %4799  ;;  %v3566_v28 = vadd.f32 1.0, %v3565_v41  ;;  %v7196_v30 = vmul.f32 0.70710677, %v7193_v5  ;;  %v3555_v46 = vadd.f32 1.1283791, %v3554_v32 }
 0xa87   : > { %v3528_v11 = vmul.f32 %v4800_v21, %v3526_v37  ;;  %vm3533_vm6 = vweird.f32 %v4800_v21 }
 0xa88   : > { %4801 = vrcp.f32 %v3566_v28  ;;  %v3584_v33 = vmul.f32 %v7196_v30, %v7196_v30  ;;  %vm3534_vm8 = vmor %vm3532_vm7, %vm3533_vm6  ;;  %v3578_v17 = vand.u32 2147483648, %v3566_v28  ;;  %v3576_v50 = vand.u32 2147483647, %v3566_v28 }
 0xa89   : > { %v3529_v27 = vsub.f32 1.0, %v3528_v11  ;;  %vm3572_vm11 = vweird.f32 %v3566_v28  ;;  %v3556_v23 = vmul.f32 %v3555_v46, %v7188_v4  ;;  %v3238_v4 = vmul.f32 0.5, %v7173_v53 }
 0xa8a   : > { %v7200_v18 = vmin.f32 %v3584_v33, 16.0  ;;  %v3579_v51 = vor.u32 1.1754944e-38, %v3578_v17  ;;  %vm3577_vm13 = vcmp.eq.f32.partialorder %v3576_v50, 8.507059e+37 }
 0xa8b   : > { %v3530_v39 = vmul.f32 %v4800_v21, %v3529_v27  ;;  %v3214_v36 = vpop.f32.mrf.mxu1 }
 0xa8c   : > { %v3586_v56 = vmul.f32 2.1237322e-06, %v7200_v18  ;;  %v3597_v14 = vmul.f32 3.8918573e-05, %v7200_v18  ;;  %v7210_v29 = vadd.f32 %v7207_v62, %v3214_v36 }
 0xa8d   : > { %v3531_v10 = vadd.f32 %v4800_v21, %v3530_v39 }
 0xa8e   : > { %v4802_v3 = vpop.eup %4801  ;;  %v3587_v7 = vadd.f32 0.00028619796, %v3586_v56  ;;  %v3598_v22 = vadd.f32 0.001143296, %v3597_v14  ;;  %v7214_v61 = vmul.f32 0.70710677, %v7210_v29 }
 0xa8f   : > { %v3535_v43 = vsel %vm3534_vm8, %v4800_v21, %v3531_v10  ;;  %v3568_v52 = vmul.f32 %v4802_v3, %v3566_v28  ;;  %vm3573_vm10 = vweird.f32 %v4802_v3 }
 0xa90   : > { %v3540_v26 = vsel %vm3537_vm9, %v3539_v55, %v3535_v43  ;;  %v3599_v12 = vmul.f32 %v3598_v22, %v7200_v18  ;;  %v3624_v59 = vmul.f32 %v7214_v61, %v7214_v61  ;;  %v3588_v57 = vmul.f32 %v3587_v7, %v7200_v18  ;;  %vm3574_vm12 = vmor %vm3572_vm11, %vm3573_vm10 }
 0xa91   : > { %v3569_v20 = vsub.f32 1.0, %v3568_v52  ;;  %v3541_v37 = vmul.f32 %v3540_v26, %v3516_v48  ;;  %v3239_v52 = vmul.f32 0.5, %v7185_v54 }
 0xa92   : > { %v3600_v41 = vadd.f32 0.014752088, %v3599_v12  ;;  %v7220_v21 = vmin.f32 %v3624_v59, 16.0  ;;  %v3589_v39 = vadd.f32 0.0036580483, %v3588_v57 }
 0xa93   : > { %v3570_v63 = vmul.f32 %v4802_v3, %v3569_v20  ;;  %v4243_v38 = vclamps-f32 %v3541_v37, 1.0 }
 0xa94   : > { %v3601_v27 = vmul.f32 %v3600_v41, %v7200_v18  ;;  %v3626_v16 = vmul.f32 2.1237322e-06, %v7220_v21  ;;  %v3637_v0 = vmul.f32 3.8918573e-05, %v7220_v21  ;;  %v3590_v26 = vmul.f32 %v3589_v39, %v7200_v18 }
 0xa95   : > { %v3571_v49 = vadd.f32 %v4802_v3, %v3570_v63  ;;  %v3217_v10 = vpop.f32.mrf.mxu1  ;;  %v3910_v60 = vadd.f32 1.0, %v4243_v38  ;;  %v7255_v38 = vld [vmem:[%s7513_s12] ss:$0 sm:$0xff] }
 0xa96   : > { %v3602_v19 = vadd.f32 0.112945676, %v3601_v27  ;;  %v3627_v45 = vadd.f32 0.00028619796, %v3626_v16  ;;  %v3638_v33 = vadd.f32 0.001143296, %v3637_v0  ;;  %v7227_v43 = vadd.f32 %v7207_v62, %v3217_v10 }
 0xa97   : > { %v3575_v11 = vsel %vm3574_vm12, %v4802_v3, %v3571_v49  ;;  %v3926_v7 = vmul.f32 %v3910_v60, %v3238_v4  ;;  %v3591_v63 = vadd.f32 0.05243302, %v3590_v26 }
 0xa98   : > { %v3580_v58 = vsel %vm3577_vm13, %v3579_v51, %v3575_v11  ;;  %v3603_v3 = vmul.f32 %v3602_v19, %v7200_v18  ;;  %v3628_v55 = vmul.f32 %v3627_v45, %v7220_v21  ;;  %v3639_v36 = vmul.f32 %v3638_v33, %v7220_v21 }
 0xa99   : > { %v3581_v28 = vmul.f32 %v3580_v58, %v3556_v23  ;;  %v7236_v14 = vmul.f32 0.70710677, %v7227_v43  ;;  %v3592_v23 = vmul.f32 %v3591_v63, %v7200_v18 }
 0xa9a   : > { %v3604_v48 = vadd.f32 0.4994258, %v3603_v3  ;;  %v3629_v46 = vadd.f32 0.0036580483, %v3628_v55  ;;  %v3640_v20 = vadd.f32 0.014752088, %v3639_v36 }
 0xa9b   : > { %v4244_v32 = vclamps-f32 %v3581_v28, 1.0  ;;  %v3664_v53 = vmul.f32 %v7236_v14, %v7236_v14  ;;  %v3593_v10 = vadd.f32 0.18741608, %v3592_v23 }
 0xa9c   : > { %v3605_v22 = vmul.f32 %v3604_v48, %v7200_v18  ;;  %v3641_v37 = vmul.f32 %v3640_v20, %v7220_v21  ;;  %v3630_v59 = vmul.f32 %v3629_v46, %v7220_v21 }
 0xa9d   : > { %v3911_v56 = vadd.f32 1.0, %v4244_v32  ;;  %v7242_v54 = vmin.f32 %v3664_v53, 16.0  ;;  %v3219_v57 = vpop.f32.mrf.mxu1 }
 0xa9e   : > { %v7244_v12 = vadd.f32 1.0, %v3605_v22  ;;  %v3642_v49 = vadd.f32 0.112945676, %v3641_v37  ;;  %v7249_v41 = vadd.f32 %v7207_v62, %v3219_v57  ;;  %v3631_v0 = vadd.f32 0.05243302, %v3630_v59 }
 0xa9f   : > { %v3927_v17 = vmul.f32 %v3911_v56, %v3239_v52  ;;  %v3677_v51 = vmul.f32 3.8918573e-05, %v7242_v54  ;;  %v3666_v58 = vmul.f32 2.1237322e-06, %v7242_v54 }
 0xaa0   : > { %4803 = vrcp.f32 %v7244_v12  ;;  %v3643_v11 = vmul.f32 %v3642_v49, %v7220_v21  ;;  %v7261_v28 = vmul.f32 0.70710677, %v7249_v41  ;;  %v3632_v55 = vmul.f32 %v3631_v0, %v7220_v21 }
 0xaa1   : > { %v3939_v50 = vpack.c.bf16 %v3927_v17, %v3926_v7  ;;  %v3678_v27 = vadd.f32 0.001143296, %v3677_v51  ;;  %v3667_v32 = vadd.f32 0.00028619796, %v3666_v58  ;;  %v3594_v7 = vmul.f32 %v3593_v10, %v7200_v18 }
 0xaa2   : > { %v3644_v39 = vadd.f32 0.4994258, %v3643_v11  ;;  %v3704_v45 = vmul.f32 %v7261_v28, %v7261_v28  ;;  %v3618_v22 = vand.u32 2147483648, %v7244_v12  ;;  %v3633_v37 = vadd.f32 0.18741608, %v3632_v55 }
 0xaa3   : > { %4035 = vmatmul.bf16.gmra.mxu3 %v3939_v50  ;;  %v3679_v19 = vmul.f32 %v3678_v27, %v7242_v54  ;;  %v3668_v53 = vmul.f32 %v3667_v32, %v7242_v54  ;;  %vm3612_vm15 = vweird.f32 %v7244_v12  ;;  %v3616_v18 = vand.u32 2147483647, %v7244_v12 }
 0xaa4   : > { %v3645_v60 = vmul.f32 %v3644_v39, %v7220_v21  ;;  %v7276_v36 = vmin.f32 %v3704_v45, 16.0  ;;  %v3619_v0 = vor.u32 1.1754944e-38, %v3618_v22 }
 0xaa5   : > { %v3680_v4 = vadd.f32 0.014752088, %v3679_v19  ;;  %v3669_v11 = vadd.f32 0.0036580483, %v3668_v53  ;;  %vm3617_vm2 = vcmp.eq.f32.partialorder %v3616_v18, 8.507059e+37 }
 0xaa6   : > { %v4021_v16 = vpop.f32.mrf.mxu0  ;;  %v4804_v3 = vpop.eup %4803  ;;  %v7280_v26 = vadd.f32 1.0, %v3645_v60  ;;  %v3706_v46 = vmul.f32 2.1237322e-06, %v7276_v36  ;;  %v3717_v20 = vmul.f32 3.8918573e-05, %v7276_v36 }
 0xaa7   : > { %v4022_v33 = vadd.f32 %v7255_v38, %v4021_v16  ;;  %v3608_v56 = vmul.f32 %v4804_v3, %v7244_v12  ;;  %v3681_v48 = vmul.f32 %v3680_v4, %v7242_v54  ;;  %vm3613_vm14 = vweird.f32 %v4804_v3 }
 0xaa8   : > { %4805 = vrcp.f32 %v7280_v26  ;;  %v3707_v49 = vadd.f32 0.00028619796, %v3706_v46  ;;  %v3718_v57 = vadd.f32 0.001143296, %v3717_v20  ;;  %v3595_v16 = vadd.f32 1.1283791, %v3594_v7  ;;  %vm3614_vm1 = vmor %vm3612_vm15, %vm3613_vm14 }
 0xaa9   : > { %v4061_v52 = vadd.f32 %v4022_v33, %v6590_v13  ;;  %v3609_v17 = vsub.f32 1.0, %v3608_v56  ;;  %v3682_v59 = vadd.f32 0.112945676, %v3681_v48  ;;  %v3634_v12 = vmul.f32 %v3633_v37, %v7220_v21 }
 0xaaa   : > { %v3719_v27 = vmul.f32 %v3718_v57, %v7276_v36  ;;  %v3708_v39 = vmul.f32 %v3707_v49, %v7276_v36  ;;  %v3670_v32 = vmul.f32 %v3669_v11, %v7242_v54  ;;  %v3656_v53 = vand.u32 2147483647, %v7280_v26 }
 0xaab   : > { %4077 = vst.msk [vmem:[%s7272_s28] sm:$0xff] %vm458_vm0, %v4061_v52  ;;  %v3610_v50 = vmul.f32 %v4804_v3, %v3609_v17  ;;  %v3683_v58 = vmul.f32 %v3682_v59, %v7242_v54  ;;  %v3596_v52 = vmul.f32 %v3595_v16, %v7196_v30  ;;  %v3635_v46 = vadd.f32 1.1283791, %v3634_v12 }
 0xaac   : > { %v3709_v48 = vadd.f32 0.0036580483, %v3708_v39  ;;  %vm3652_vm4 = vweird.f32 %v7280_v26  ;;  %vm3657_vm6 = vcmp.eq.f32.partialorder %v3656_v53, 8.507059e+37 }
 0xaad   : > { %v3611_v23 = vadd.f32 %v4804_v3, %v3610_v50  ;;  %v3684_v33 = vadd.f32 0.4994258, %v3683_v58 }
 0xaae   : > { %v4023_v13 = vpop.f32.mrf.mxu0  ;;  %v4806_v19 = vpop.eup %4805  ;;  %v3710_v37 = vmul.f32 %v3709_v48, %v7276_v36 }
 0xaaf   : > { %v4024_v63 = vadd.f32 %v7255_v38, %v4023_v13  ;;  %v3615_v45 = vsel %vm3614_vm1, %v4804_v3, %v3611_v23  ;;  %v3648_v10 = vmul.f32 %v4806_v19, %v7280_v26  ;;  %v3685_v4 = vmul.f32 %v3684_v33, %v7242_v54 }
 0xab0   : > { %v3620_v60 = vsel %vm3617_vm2, %v3619_v0, %v3615_v45  ;;  %v3658_v3 = vand.u32 2147483648, %v7280_v26  ;;  %vm3653_vm3 = vweird.f32 %v4806_v19  ;;  %v3671_v13 = vadd.f32 0.05243302, %v3670_v32 }
 0xab1   : > { %v4062_v51 = vadd.f32 %v4024_v63, %v6600_v40  ;;  %v3720_v40 = vadd.f32 0.014752088, %v3719_v27  ;;  %v3649_v56 = vsub.f32 1.0, %v3648_v10  ;;  %v3686_v21 = vadd.f32 1.0, %v3685_v4  ;;  %vm3654_vm5 = vmor %vm3652_vm4, %vm3653_vm3  ;;  %v3227_v26 = vpop.f32.mrf.mxu2 }
 0xab2   : > { %v3621_v7 = vmul.f32 %v3620_v60, %v3596_v52  ;;  %v3636_v63 = vmul.f32 %v3635_v46, %v7214_v61  ;;  %v3659_v50 = vor.u32 1.1754944e-38, %v3658_v3  ;;  %v3711_v11 = vadd.f32 0.05243302, %v3710_v37 }
 0xab3   : > { %4078 = vst.msk [vmem:[%s7272_s28 + $0x8] sm:$0xff] %vm458_vm0, %v4062_v51  ;;  %v3721_v55 = vmul.f32 %v3720_v40, %v7276_v36  ;;  %v3650_v17 = vmul.f32 %v4806_v19, %v3649_v56  ;;  %4807 = vrcp.f32 %v3686_v21  ;;  %v3672_v51 = vmul.f32 %v3671_v13, %v7242_v54 }
 0xab4   : > { %v4245_v59 = vclamps-f32 %v3621_v7, 1.0  ;;  %v3240_v61 = vmul.f32 0.5, %v7193_v5  ;;  %v3712_v10 = vmul.f32 %v3711_v11, %v7276_v36  ;;  %v3698_v56 = vand.u32 2147483648, %v3686_v21 }
 0xab5   : > { %v3722_v20 = vadd.f32 0.112945676, %v3721_v55  ;;  %v3651_v22 = vadd.f32 %v4806_v19, %v3650_v17  ;;  %v3673_v45 = vadd.f32 0.18741608, %v3672_v51  ;;  %vm3692_vm8 = vweird.f32 %v3686_v21 }
 0xab6   : > { %v3912_v16 = vadd.f32 1.0, %v4245_v59  ;;  %v3713_v48 = vadd.f32 0.18741608, %v3712_v10  ;;  %v3696_v5 = vand.u32 2147483647, %v3686_v21  ;;  %v3699_v17 = vor.u32 1.1754944e-38, %v3698_v56 }
 0xab7   : > { %v3723_v30 = vmul.f32 %v3722_v20, %v7276_v36  ;;  %v3655_v49 = vsel %vm3654_vm5, %v4806_v19, %v3651_v22  ;;  %v3241_v19 = vmul.f32 0.5, %v7210_v29  ;;  %v3674_v55 = vmul.f32 %v3673_v45, %v7242_v54 }
 0xab8   : > { %v3660_v18 = vsel %vm3657_vm6, %v3659_v50, %v3655_v49  ;;  %v3928_v60 = vmul.f32 %v3912_v16, %v3240_v61  ;;  %v3714_v53 = vmul.f32 %v3713_v48, %v7276_v36  ;;  %vm3697_vm10 = vcmp.eq.f32.partialorder %v3696_v5, 8.507059e+37 }
 0xab9   : > { %v3724_v57 = vadd.f32 0.4994258, %v3723_v30  ;;  %v3661_v23 = vmul.f32 %v3660_v18, %v3636_v63  ;;  %v4808_v27 = vpop.eup %4807  ;;  %v3229_v3 = vpop.f32.mrf.mxu2  ;;  %v3675_v20 = vadd.f32 1.1283791, %v3674_v55  ;;  %v3242_v10 = vmul.f32 0.5, %v7227_v43 }
 0xaba   : > { %v3688_v39 = vmul.f32 %v4808_v27, %v3686_v21  ;;  %vm3693_vm7 = vweird.f32 %v4808_v27  ;;  %v7321_v54 = vadd.f32 %v7207_v62, %v3229_v3  ;;  %v3715_v21 = vadd.f32 1.1283791, %v3714_v53 }
 0xabb   : > { %v3725_v58 = vmul.f32 %v3724_v57, %v7276_v36  ;;  %v4246_v0 = vclamps-f32 %v3661_v23, 1.0  ;;  %vm3694_vm9 = vmor %vm3692_vm8, %vm3693_vm7  ;;  %v3676_v30 = vmul.f32 %v3675_v20, %v7236_v14  ;;  %v7325_v57 = vadd.f32 %v7207_v62, %v3227_v26 }
 0xabc   : > { %v3689_v40 = vsub.f32 1.0, %v3688_v39  ;;  %v7328_v36 = vmul.f32 0.70710677, %v7321_v54  ;;  %v3716_v23 = vmul.f32 %v3715_v21, %v7261_v28 }
 0xabd   : > { %v3726_v12 = vadd.f32 1.0, %v3725_v58  ;;  %v3913_v33 = vadd.f32 1.0, %v4246_v0 }
 0xabe   : > { %v3690_v4 = vmul.f32 %v4808_v27, %v3689_v40  ;;  %v3864_v26 = vmul.f32 %v7328_v36, %v7328_v36 }
 0xabf   : > { %4809 = vrcp.f32 %v3726_v12  ;;  %v3929_v32 = vmul.f32 %v3913_v33, %v3241_v19  ;;  %v3738_v63 = vand.u32 2147483648, %v3726_v12  ;;  %v3736_v59 = vand.u32 2147483647, %v3726_v12 }
 0xac0   : > { %v3691_v52 = vadd.f32 %v4808_v27, %v3690_v4  ;;  %vm3732_vm12 = vweird.f32 %v3726_v12  ;;  %v7340_v19 = vmin.f32 %v3864_v26, 16.0  ;;  %v3243_v33 = vmul.f32 0.5, %v7249_v41 }
 0xac1   : > { %v3940_v46 = vpack.c.bf16 %v3929_v32, %v3928_v60  ;;  %v3739_v51 = vor.u32 1.1754944e-38, %v3738_v63  ;;  %vm3737_vm14 = vcmp.eq.f32.partialorder %v3736_v59, 8.507059e+37 }
 0xac2   : > { %v3695_v7 = vsel %vm3694_vm9, %v4808_v27, %v3691_v52  ;;  %v7332_v27 = vmul.f32 0.70710677, %v7325_v57 }
 0xac3   : > { %4040 = vmatmul.bf16.gmra.mxu3 %v3940_v46  ;;  %v3700_v22 = vsel %vm3697_vm10, %v3699_v17, %v3695_v7 }
 0xac4   : > { %v3701_v49 = vmul.f32 %v3700_v22, %v3676_v30  ;;  %v3824_v28 = vmul.f32 %v7332_v27, %v7332_v27 }
 0xac5   : > { %v4810_v29 = vpop.eup %4809 }
 0xac6   : > { %v3728_v13 = vmul.f32 %v4810_v29, %v3726_v12  ;;  %vm3733_vm11 = vweird.f32 %v4810_v29  ;;  %v4247_v14 = vclamps-f32 %v3701_v49, 1.0  ;;  %v7346_v4 = vmin.f32 %v3824_v28, 16.0 }
 0xac7   : > { %vm3734_vm13 = vmor %vm3732_vm12, %vm3733_vm11 }
 0xac8   : > { %v3729_v37 = vsub.f32 1.0, %v3728_v13  ;;  %v3914_v12 = vadd.f32 1.0, %v4247_v14  ;;  %v3837_v48 = vmul.f32 3.8918573e-05, %v7346_v4 }
 0xaca   : > { %v3730_v50 = vmul.f32 %v4810_v29, %v3729_v37  ;;  %v3930_v32 = vmul.f32 %v3914_v12, %v3242_v10  ;;  %v3838_v43 = vadd.f32 0.001143296, %v3837_v48 }
 0xacc   : > { %v3731_v18 = vadd.f32 %v4810_v29, %v3730_v50  ;;  %v3839_v20 = vmul.f32 %v3838_v43, %v7346_v4 }
 0xace   : > { %v3735_v11 = vsel %vm3734_vm13, %v4810_v29, %v3731_v18  ;;  %v4026_v16 = vpop.f32.mrf.mxu3  ;;  %v3840_v22 = vadd.f32 0.014752088, %v3839_v20 }
 0xacf   : > { %v3740_v58 = vsel %vm3737_vm14, %v3739_v51, %v3735_v11  ;;  %v4027_v39 = vadd.f32 %v7255_v38, %v4026_v16 }
 0xad0   : > { %v3741_v0 = vmul.f32 %v3740_v58, %v3716_v23  ;;  %v3841_v18 = vmul.f32 %v3840_v22, %v7346_v4 }
 0xad1   : > { %v4063_v45 = vadd.f32 %v4027_v39, %v6611_v15  ;;  %v3877_v15 = vmul.f32 3.8918573e-05, %v7340_v19 }
 0xad2   : > { %v4248_v61 = vclamps-f32 %v3741_v0, 1.0  ;;  %v3842_v16 = vadd.f32 0.112945676, %v3841_v18 }
 0xad3   : > { %4079 = vst.msk [vmem:[%s7272_s28 + $0x10] sm:$0xff] %vm458_vm0, %v4063_v45  ;;  %v3878_v46 = vadd.f32 0.001143296, %v3877_v15 }
 0xad4   : > { %v3915_v40 = vadd.f32 1.0, %v4248_v61 }
 0xad5   : > { %v3879_v5 = vmul.f32 %v3878_v46, %v7340_v19 }
 0xad6   : > { %v3931_v60 = vmul.f32 %v3915_v40, %v3243_v33  ;;  %v4028_v55 = vpop.f32.mrf.mxu3  ;;  %v3843_v33 = vmul.f32 %v3842_v16, %v7346_v4 }
 0xad7   : > { %v4029_v52 = vadd.f32 %v7255_v38, %v4028_v55  ;;  %v3880_v7 = vadd.f32 0.014752088, %v3879_v5 }
 0xad8   : > { %v3941_v56 = vpack.c.bf16 %v3931_v60, %v3930_v32  ;;  %v3866_v32 = vmul.f32 2.1237322e-06, %v7340_v19  ;;  %v3844_v46 = vadd.f32 0.4994258, %v3843_v33 }
 0xad9   : > { %v4064_v41 = vadd.f32 %v4029_v52, %v6617_v35  ;;  %v3881_v37 = vmul.f32 %v3880_v7, %v7340_v19 }
 0xada   : > { %4045 = vmatmul.bf16.gmra.mxu3 %v3941_v56  ;;  %v3826_v56 = vmul.f32 2.1237322e-06, %v7346_v4 }
 0xadb   : > { %4080 = vst.msk [vmem:[%s7272_s28 + $0x18] sm:$0xff] %vm458_vm0, %v4064_v41  ;;  %v3882_v51 = vadd.f32 0.112945676, %v3881_v37  ;;  %v3845_v37 = vmul.f32 %v3844_v46, %v7346_v4 }
 0xadc   : > { %v3827_v22 = vadd.f32 0.00028619796, %v3826_v56 }
 0xadd   : > { %v3883_v0 = vmul.f32 %v3882_v51, %v7340_v19 }
 0xadf   : > { %v3884_v40 = vadd.f32 0.4994258, %v3883_v0 }
 0xae0   : > { %v4031_v53 = vpop.f32.mrf.mxu3 }
 0xae1   : > { %v4032_v35 = vadd.f32 %v7255_v38, %v4031_v53  ;;  %v3885_v41 = vmul.f32 %v3884_v40, %v7340_v19 }
 0xae3   : > { %v4065_v30 = vadd.f32 %v4032_v35, %v6623_v24 }
 0xae5   : > { %4081 = vst.msk [vmem:[%s7272_s28 + $0x20] sm:$0xff] %vm458_vm0, %v4065_v30  ;;  %v7404_v30 = vadd.f32 1.0, %v3885_v41 }
 0xae6   : > { %v3222_v3 = vpop.f32.mrf.mxu1 }
 0xae7   : > { %v7356_v29 = vadd.f32 %v7207_v62, %v3222_v3  ;;  %v3867_v3 = vadd.f32 0.00028619796, %v3866_v32  ;;  %vm3892_vm10 = vweird.f32 %v7404_v30 }
 0xae8   : > { %v4033_v14 = vpop.f32.mrf.mxu3 }
 0xae9   : > { %v7360_v17 = vmul.f32 0.70710677, %v7356_v29  ;;  %v4034_v58 = vadd.f32 %v7255_v38, %v4033_v14  ;;  %v7410_v14 = vadd.f32 1.0, %v3845_v37 }
 0xaeb   : > { %v3744_v13 = vmul.f32 %v7360_v17, %v7360_v17  ;;  %v4066_v39 = vadd.f32 %v4034_v58, %v6635_v8  ;;  %vm3852_vm11 = vweird.f32 %v7410_v14 }
 0xaed   : > { %v7367_v63 = vmin.f32 %v3744_v13, 16.0  ;;  %4082 = vst.msk [vmem:[%s7272_s28 + $0x28] sm:$0xff] %vm458_vm0, %v4066_v39 }
 0xaee   : > { %v3224_v21 = vpop.f32.mrf.mxu1 }
 0xaef   : > { %v3746_v50 = vmul.f32 2.1237322e-06, %v7367_v63  ;;  %v3757_v59 = vmul.f32 3.8918573e-05, %v7367_v63  ;;  %v7374_v49 = vadd.f32 %v7207_v62, %v3224_v21 }
 0xaf1   : > { %v3747_v23 = vadd.f32 0.00028619796, %v3746_v50  ;;  %v3758_v11 = vadd.f32 0.001143296, %v3757_v59  ;;  %v7378_v24 = vmul.f32 0.70710677, %v7374_v49  ;;  %v3868_v50 = vmul.f32 %v3867_v3, %v7340_v19 }
 0xaf3   : > { %v3759_v26 = vmul.f32 %v3758_v11, %v7367_v63  ;;  %v3784_v62 = vmul.f32 %v7378_v24, %v7378_v24  ;;  %v3748_v61 = vmul.f32 %v3747_v23, %v7367_v63  ;;  %v3828_v11 = vmul.f32 %v3827_v22, %v7346_v4 }
 0xaf5   : > { %v3760_v45 = vadd.f32 0.014752088, %v3759_v26  ;;  %v7387_v12 = vmin.f32 %v3784_v62, 16.0  ;;  %v3749_v15 = vadd.f32 0.0036580483, %v3748_v61 }
 0xaf6   : > { %v3869_v26 = vadd.f32 0.0036580483, %v3868_v50  ;;  %v3829_v39 = vadd.f32 0.0036580483, %v3828_v11 }
 0xaf7   : > { %v3761_v28 = vmul.f32 %v3760_v45, %v7367_v63  ;;  %v3786_v10 = vmul.f32 2.1237322e-06, %v7387_v12  ;;  %v3797_v60 = vmul.f32 3.8918573e-05, %v7387_v12  ;;  %v3750_v20 = vmul.f32 %v3749_v15, %v7367_v63 }
 0xaf8   : > { %v3830_v15 = vmul.f32 %v3829_v39, %v7346_v4 }
 0xaf9   : > { %v3762_v8 = vadd.f32 0.112945676, %v3761_v28  ;;  %v3787_v55 = vadd.f32 0.00028619796, %v3786_v10  ;;  %v3798_v52 = vadd.f32 0.001143296, %v3797_v60  ;;  %v3870_v28 = vmul.f32 %v3869_v26, %v7340_v19 }
 0xafa   : > { %v3751_v59 = vadd.f32 0.05243302, %v3750_v20  ;;  %v3831_v3 = vadd.f32 0.05243302, %v3830_v15 }
 0xafb   : > { %v3763_v48 = vmul.f32 %v3762_v8, %v7367_v63  ;;  %v3788_v43 = vmul.f32 %v3787_v55, %v7387_v12  ;;  %v3799_v5 = vmul.f32 %v3798_v52, %v7387_v12  ;;  %v3871_v55 = vadd.f32 0.05243302, %v3870_v28 }
 0xafc   : > { %v3752_v16 = vmul.f32 %v3751_v59, %v7367_v63  ;;  %v3832_v59 = vmul.f32 %v3831_v3, %v7346_v4 }
 0xafd   : > { %v3764_v7 = vadd.f32 0.4994258, %v3763_v48  ;;  %v3789_v53 = vadd.f32 0.0036580483, %v3788_v43  ;;  %v3800_v35 = vadd.f32 0.014752088, %v3799_v5 }
 0xafe   : > { %v3753_v33 = vadd.f32 0.18741608, %v3752_v16 }
 0xaff   : > { %v3765_v13 = vmul.f32 %v3764_v7, %v7367_v63  ;;  %v3801_v21 = vmul.f32 %v3800_v35, %v7387_v12  ;;  %v3790_v51 = vmul.f32 %v3789_v53, %v7387_v12  ;;  %v3872_v53 = vmul.f32 %v3871_v55, %v7340_v19 }
 0xb00   : > { %v3754_v56 = vmul.f32 %v3753_v33, %v7367_v63 }
 0xb01   : > { %v3766_v18 = vadd.f32 1.0, %v3765_v13  ;;  %v3802_v23 = vadd.f32 0.112945676, %v3801_v21  ;;  %v3791_v0 = vadd.f32 0.05243302, %v3790_v51 }
 0xb02   : > { %v3755_v35 = vadd.f32 1.1283791, %v3754_v56  ;;  %v3898_v56 = vand.u32 2147483648, %v7404_v30 }
 0xb03   : > { %4811 = vrcp.f32 %v3766_v18  ;;  %v3803_v58 = vmul.f32 %v3802_v23, %v7387_v12  ;;  %v3792_v60 = vmul.f32 %v3791_v0, %v7387_v12  ;;  %v3778_v41 = vand.u32 2147483648, %v3766_v18 }
 0xb04   : > { %4813 = vrcp.f32 %v7404_v30  ;;  %v3776_v5 = vand.u32 2147483647, %v3766_v18  ;;  %vm3772_vm1 = vweird.f32 %v3766_v18 }
 0xb05   : > { %v3804_v62 = vadd.f32 0.4994258, %v3803_v58  ;;  %4815 = vrcp.f32 %v7410_v14  ;;  %v3793_v43 = vadd.f32 0.18741608, %v3792_v60  ;;  %v3779_v37 = vor.u32 1.1754944e-38, %v3778_v41 }
 0xb06   : > { %vm3777_vm3 = vcmp.eq.f32.partialorder %v3776_v5, 8.507059e+37  ;;  %v3873_v58 = vadd.f32 0.18741608, %v3872_v53  ;;  %v3858_v41 = vand.u32 2147483648, %v7410_v14  ;;  %v3244_v53 = vmul.f32 0.5, %v7356_v29 }
 0xb07   : > { %v3805_v61 = vmul.f32 %v3804_v62, %v7387_v12  ;;  %v3794_v21 = vmul.f32 %v3793_v43, %v7387_v12 }
 0xb08   : > { %v3874_v33 = vmul.f32 %v3873_v58, %v7340_v19 }
 0xb09   : > { %v4812_v45 = vpop.eup %4811  ;;  %v3806_v32 = vadd.f32 1.0, %v3805_v61  ;;  %v3795_v16 = vadd.f32 1.1283791, %v3794_v21 }
 0xb0a   : > { %v7418_v40 = vpop.eup %4813  ;;  %v3768_v10 = vmul.f32 %v4812_v45, %v3766_v18  ;;  %vm3773_vm15 = vweird.f32 %v4812_v45  ;;  %v3756_v18 = vmul.f32 %v3755_v35, %v7360_v17  ;;  %v3245_v35 = vmul.f32 0.5, %v7374_v49 }
 0xb0b   : > { %4817 = vrcp.f32 %v3806_v32  ;;  %v3888_v52 = vmul.f32 %v7418_v40, %v7404_v30  ;;  %v7425_v48 = vpop.eup %4815  ;;  %vm3774_vm2 = vmor %vm3772_vm1, %vm3773_vm15  ;;  %v3818_v0 = vand.u32 2147483648, %v3806_v32  ;;  %v3816_v61 = vand.u32 2147483647, %v3806_v32 }
 0xb0c   : > { %v3769_v8 = vsub.f32 1.0, %v3768_v10  ;;  %v3848_v7 = vmul.f32 %v7425_v48, %v7410_v14  ;;  %vm3812_vm5 = vweird.f32 %v3806_v32  ;;  %vm3893_vm6 = vweird.f32 %v7418_v40 }
 0xb0d   : > { %v3889_v22 = vsub.f32 1.0, %v3888_v52  ;;  %v3819_v17 = vor.u32 1.1754944e-38, %v3818_v0  ;;  %v3796_v15 = vmul.f32 %v3795_v16, %v7378_v24  ;;  %vm3817_vm8 = vcmp.eq.f32.partialorder %v3816_v61, 8.507059e+37  ;;  %vm3894_vm12 = vmor %vm3892_vm10, %vm3893_vm6 }
 0xb0e   : > { %v3770_v46 = vmul.f32 %v4812_v45, %v3769_v8  ;;  %v3849_v23 = vsub.f32 1.0, %v3848_v7  ;;  %v3896_v52 = vand.u32 2147483647, %v7404_v30  ;;  %vm3853_vm9 = vweird.f32 %v7425_v48 }
 0xb0f   : > { %v3890_v26 = vmul.f32 %v7418_v40, %v3889_v22  ;;  %v3856_v24 = vand.u32 2147483647, %v7410_v14  ;;  %vm3854_vm13 = vmor %vm3852_vm11, %vm3853_vm9  ;;  %v3899_v7 = vor.u32 1.1754944e-38, %v3898_v56  ;;  %v3859_v14 = vor.u32 1.1754944e-38, %v3858_v41 }
 0xb10   : > { %v3771_v20 = vadd.f32 %v4812_v45, %v3770_v46  ;;  %v3850_v12 = vmul.f32 %v7425_v48, %v3849_v23  ;;  %vm3897_vm14 = vcmp.eq.f32.partialorder %v3896_v52, 8.507059e+37  ;;  %v3246_v0 = vmul.f32 0.5, %v7325_v57 }
 0xb11   : > { %v4818_v13 = vpop.eup %4817  ;;  %v3891_v10 = vadd.f32 %v7418_v40, %v3890_v26  ;;  %vm3857_vm15 = vcmp.eq.f32.partialorder %v3856_v24, 8.507059e+37  ;;  %v3247_v26 = vmul.f32 0.5, %v7321_v54 }
 0xb12   : > { %v3775_v63 = vsel %vm3774_vm2, %v4812_v45, %v3771_v20  ;;  %v3808_v50 = vmul.f32 %v4818_v13, %v3806_v32  ;;  %vm3813_vm4 = vweird.f32 %v4818_v13  ;;  %v3833_v45 = vadd.f32 0.18741608, %v3832_v59 }
 0xb13   : > { %v3780_v51 = vsel %vm3777_vm3, %v3779_v37, %v3775_v63  ;;  %vm3814_vm7 = vmor %vm3812_vm5, %vm3813_vm4  ;;  %v3851_v19 = vadd.f32 %v7425_v48, %v3850_v12  ;;  %v3895_v43 = vsel %vm3894_vm12, %v7418_v40, %v3891_v10 }
 0xb14   : > { %v3809_v11 = vsub.f32 1.0, %v3808_v50  ;;  %v3781_v62 = vmul.f32 %v3780_v51, %v3756_v18  ;;  %v3834_v55 = vmul.f32 %v3833_v45, %v7346_v4  ;;  %v3875_v4 = vadd.f32 1.1283791, %v3874_v33 }
 0xb15   : > { %v3855_v30 = vsel %vm3854_vm13, %v7425_v48, %v3851_v19  ;;  %v3900_v22 = vsel %vm3897_vm14, %v3899_v7, %v3895_v43 }
 0xb16   : > { %v3810_v39 = vmul.f32 %v4818_v13, %v3809_v11  ;;  %v4249_v60 = vclamps-f32 %v3781_v62, 1.0  ;;  %v3835_v20 = vadd.f32 1.1283791, %v3834_v55  ;;  %v3876_v63 = vmul.f32 %v3875_v4, %v7328_v36 }
 0xb17   : > { %v3860_v21 = vsel %vm3857_vm15, %v3859_v14, %v3855_v30 }
 0xb18   : > { %v3811_v28 = vadd.f32 %v4818_v13, %v3810_v39  ;;  %v3916_v5 = vadd.f32 1.0, %v4249_v60  ;;  %v3836_v50 = vmul.f32 %v3835_v20, %v7332_v27  ;;  %v3901_v59 = vmul.f32 %v3900_v22, %v3876_v63 }
 0xb1a   : > { %v3815_v8 = vsel %vm3814_vm7, %v4818_v13, %v3811_v28  ;;  %v3932_v40 = vmul.f32 %v3916_v5, %v3244_v53  ;;  %v3861_v23 = vmul.f32 %v3860_v21, %v3836_v50  ;;  %v4252_v49 = vclamps-f32 %v3901_v59, 1.0 }
 0xb1b   : > { %v3820_v32 = vsel %vm3817_vm8, %v3819_v17, %v3815_v8 }
 0xb1c   : > { %v3821_v46 = vmul.f32 %v3820_v32, %v3796_v15  ;;  %v4251_v11 = vclamps-f32 %v3861_v23, 1.0  ;;  %v3919_v36 = vadd.f32 1.0, %v4252_v49 }
 0xb1e   : > { %v4250_v3 = vclamps-f32 %v3821_v46, 1.0  ;;  %v3918_v58 = vadd.f32 1.0, %v4251_v11  ;;  %v3935_v62 = vmul.f32 %v3919_v36, %v3247_v26 }
 0xb20   : > { %v3917_v13 = vadd.f32 1.0, %v4250_v3  ;;  %v3934_v61 = vmul.f32 %v3918_v58, %v3246_v0 }
 0xb22   : > { %v3933_v37 = vmul.f32 %v3917_v13, %v3245_v35 }
 0xb24   : > { %v3942_v51 = vpack.c.bf16 %v3933_v37, %v3932_v40 }
 0xb26   : > { %v4036_v48 = vpop.f32.mrf.mxu3  ;;  %4050 = vmatmul.bf16.gmra.mxu3 %v3942_v51 }
 0xb27   : > { %v4037_v29 = vadd.f32 %v7255_v38, %v4036_v48 }
 0xb29   : > { %v4067_v18 = vadd.f32 %v4037_v29, %v6664_v6  ;;  %v3943_v6 = vpack.c.bf16 %v3935_v62, %v3934_v61 }
 0xb2b   : > { %4083 = vst.msk [vmem:[%s7272_s28 + $0x30] sm:$0xff] %vm458_vm0, %v4067_v18 }
 0xb2e   : > { %v4038_v27 = vpop.f32.mrf.mxu3 }
 0xb2f   : > { %v4039_v16 = vadd.f32 %v7255_v38, %v4038_v27 }
 0xb31   : > { %v4068_v39 = vadd.f32 %v4039_v16, %v6644_v2 }
 0xb33   : > { %4084 = vst.msk [vmem:[%s7272_s28 + $0x38] sm:$0xff] %vm458_vm0, %v4068_v39 }
 0xb36   : > { %4055 = vmatmul.bf16.gmra.mxu3 %v3943_v6 }
 0xb46   : > { %v4041_v45 = vpop.f32.mrf.mxu3 }
 0xb47   : > { %v4042_v12 = vadd.f32 %v7255_v38, %v4041_v45 }
 0xb49   : > { %v4069_v54 = vadd.f32 %v4042_v12, %v6650_v42 }
 0xb4b   : > { %4085 = vst.msk [vmem:[%s7272_s28 + $0x40] sm:$0xff] %vm458_vm0, %v4069_v54 }
 0xb4e   : > { %v4043_v28 = vpop.f32.mrf.mxu3 }
 0xb4f   : > { %v4044_v57 = vadd.f32 %v7255_v38, %v4043_v28 }
 0xb51   : > { %v4070_v2 = vadd.f32 %v4044_v57, %v6684_v34 }
 0xb53   : > { %4086 = vst.msk [vmem:[%s7272_s28 + $0x48] sm:$0xff] %vm458_vm0, %v4070_v2 }
 0xb5d   : > { %v4046_v33 = vpop.f32.mrf.mxu3 }
 0xb5e   : > { %v4047_v10 = vadd.f32 %v7255_v38, %v4046_v33 }
 0xb60   : > { %v4071_v17 = vadd.f32 %v4047_v10, %v6697_v1 }
 0xb62   : > { %4087 = vst.msk [vmem:[%s7272_s28 + $0x50] sm:$0xff] %vm458_vm0, %v4071_v17 }
 0xb65   : > { %v4048_v42 = vpop.f32.mrf.mxu3 }
 0xb66   : > { %v4049_v60 = vadd.f32 %v7255_v38, %v4048_v42 }
 0xb68   : > { %v4072_v15 = vadd.f32 %v4049_v60, %v6710_v44 }
 0xb6a   : > { %4088 = vst.msk [vmem:[%s7272_s28 + $0x58] sm:$0xff] %vm458_vm0, %v4072_v15 }
 0xba9   : > { %v4051_v34 = vpop.f32.mrf.mxu3 }
 0xbaa   : > { %v4052_v8 = vadd.f32 %v7255_v38, %v4051_v34 }
 0xbac   : > { %v4073_v55 = vadd.f32 %v4052_v8, %v6722_v47 }
 0xbae   : > { %4089 = vst.msk [vmem:[%s7272_s28 + $0x60] sm:$0xff] %vm458_vm0, %v4073_v55 }
 0xbb1   : > { %v4053_v52 = vpop.f32.mrf.mxu3 }
 0xbb2   : > { %v4054_v1 = vadd.f32 %v7255_v38, %v4053_v52 }
 0xbb4   : > { %v4074_v56 = vadd.f32 %v4054_v1, %v6762_v31 }
 0xbb6   : > { %4090 = vst.msk [vmem:[%s7272_s28 + $0x68] sm:$0xff] %vm458_vm0, %v4074_v56 }
 0xbb9   : > { %v4056_v32 = vpop.f32.mrf.mxu3 }
 0xbba   : > { %v4057_v44 = vadd.f32 %v7255_v38, %v4056_v32 }
 0xbbc   : > { %v4075_v19 = vadd.f32 %v4057_v44, %v6736_v9 }
 0xbbe   : > { %4091 = vst.msk [vmem:[%s7272_s28 + $0x70] sm:$0xff] %vm458_vm0, %v4075_v19 }
 0xbc1   : > { %v4058_v46 = vpop.f32.mrf.mxu3 }
 0xbc2   : > { %v4059_v24 = vadd.f32 %v7255_v38, %v4058_v46 }
 0xbc4   : > { %v4076_v47 = vadd.f32 %v4059_v24, %v6739_v25 }
 0xbc6   : > { %4092 = vst.msk [vmem:[%s7272_s28 + $0x78] sm:$0xff] %vm458_vm0, %v4076_v47 }
 0xbc7 PF: > { %s23_s25 = sadd.s32 1, %s4844_s25  }
 0xbc8   : > { %p20_p4 = scmp.ge.s32.totalorder %s23_s25, 4  }
 0xbca   :  { %22 = sbr.rel (!%p20_p4) target bundleno = 1 (0x1), region = 102 }

</bundles_post_ra>
